<compile_context>
chip_gen: v7x
topology: tpu7x:2x2x1
jax: 0.10.0
libtpu: 0.0.40
codegen_flags: <defaults>
</compile_context>

<pallas_src>
import numpy as np
import jax
import jax.numpy as jnp
from jax.experimental import pallas as pl
from jax.experimental.pallas import tpu as pltpu


def get_frequency_modes(seq_len, modes=64, mode_select_method='random'):
    modes = min(modes, seq_len // 2)
    if mode_select_method == 'random':
        index = list(range(0, seq_len // 2))
        np.random.shuffle(index)
        index = index[:modes]
    else:
        index = list(range(0, modes))
    index.sort()
    return index


def _round_up(x, m):
    return (x + m - 1) // m * m


def _dft_basis(seq_len, index, n_pad, dtype=np.float32):
    """(2*n_pad, L) stacked [cos; -sin] rows: basis @ x(L, C) gives [Re; Im]
    of rfft(x, axis=0) at the selected modes.  Padded rows are zero."""
    m = len(index)
    j = np.asarray(index)[:, None].astype(np.float64)            # (M, 1)
    l = np.arange(seq_len)[None, :].astype(np.float64)           # (1, L)
    ang = 2.0 * np.pi * j * l / seq_len                          # (M, L)
    cos = np.zeros((n_pad, seq_len), np.float64)
    sin = np.zeros((n_pad, seq_len), np.float64)
    cos[:m] = np.cos(ang)
    sin[:m] = -np.sin(ang)
    return np.concatenate([cos, sin], axis=0).astype(dtype)      # (2*n_pad, L)


def _idft_basis(seq_len, out_len, index, n_pad, norm, dtype=np.float32):
    """(2*n_pad, out_len) inverse-DFT rows: [Re | Im] @ basis is the real
    irfft contribution of the selected modes; the 1/L normalization and the
    module's 1/(in_ch*out_ch) scaling are folded into `norm`.  Columns beyond
    seq_len (lane padding) and rows beyond the real mode count are zero."""
    m = len(index)
    j = np.asarray(index).astype(np.float64)                     # (M,)
    l = np.arange(seq_len).astype(np.float64)                    # (L,)
    ang = 2.0 * np.pi * j[:, None] * l[None, :] / seq_len        # (M, L)
    scale = np.where((j == 0) | (2.0 * j == seq_len), 1.0, 2.0)[:, None]
    icos = np.zeros((n_pad, out_len), np.float64)
    isin = np.zeros((n_pad, out_len), np.float64)
    icos[:m, :seq_len] = scale * np.cos(ang) / norm
    isin[:m, :seq_len] = -scale * np.sin(ang) / norm
    return np.concatenate([icos, isin], axis=0).astype(dtype)    # (2*n_pad, out_len)


def _fourier_cross_attn_kernel(q_ref, k_ref, fq_ref, fk_ref, wr_ref, wi_ref,
                               ib_ref, out_ref):
    f32 = jnp.float32
    H, E, O, Mq = wr_ref.shape            # Mq already padded to a multiple of 8
    Mkv = fk_ref.shape[0] // 2

    xq = q_ref[0]                                     # (Lq,  H*E)
    xk = k_ref[0]                                     # (Lkv, H*E)

    # --- selected-mode rfft of all H*E channels (two large MXU matmuls) ----
    # basis rows [0:M) are cos, rows [M:2M) are -sin.
    tq = jnp.dot(fq_ref[...], xq, preferred_element_type=f32)    # (2Mq,  HE)
    tk = jnp.dot(fk_ref[...], xk, preferred_element_type=f32)    # (2Mkv, HE)

    # Head-major spectra: per-head data lives on sublane row ranges (free
    # views); one whole-array transpose per spectrum instead of 32 per-head
    # relayouts.
    ks = tk.T.reshape(H, E, 2 * Mkv)                  # (H, E, 2Mkv) = [Kr | Ki]
    qs = tq.T.reshape(H, E, 2 * Mq)                   # (H, E, 2Mq)  = [Qr | Qi]
    qsT = jnp.transpose(qs, (0, 2, 1))                # (H, 2Mq, E)  = [QrT; QiT]

    # --- fused complex cross-correlation: one batched MXU matmul -----------
    # g = [[Qr^T Kr, Qr^T Ki], [Qi^T Kr, Qi^T Ki]]  per head.
    g = jnp.einsum('hxe,hey->hxy', qsT, ks,
                   preferred_element_type=f32)        # (H, 2Mq, 2Mkv)
    ar = g[:, :Mq, :Mkv] - g[:, Mq:, Mkv:]            # Re(Q^T K)
    ai = g[:, :Mq, Mkv:] + g[:, Mq:, :Mkv]            # Im(Q^T K)

    # --- complex tanh: tanh(x+iy) = (sinh 2x + i sin 2y)/(cosh 2x + cos 2y)
    # exact divides (no chained approx reciprocals); clip keeps exp finite,
    # the ratio is unaffected for |2x| > 30.
    x2 = jnp.clip(2.0 * ar, -30.0, 30.0)
    y2 = 2.0 * ai
    e_p = jnp.exp(x2)
    e_m = jnp.exp(-x2)
    rden = 1.0 / (0.5 * (e_p + e_m) + jnp.cos(y2))
    tr = 0.5 * (e_p - e_m) * rden                     # (H, Mq, Mkv)
    ti = jnp.sin(y2) * rden

    # --- value-side complex product (batched A @ B^T matmuls, no transposes)
    # xqkv[e,x] = sum_y K[e,y] * T[x,y]
    kr = ks[:, :, :Mkv]
    ki = ks[:, :, Mkv:]
    vr = (jnp.einsum('hey,hxy->hex', kr, tr, preferred_element_type=f32)
          - jnp.einsum('hey,hxy->hex', ki, ti, preferred_element_type=f32))
    vi = (jnp.einsum('hey,hxy->hex', kr, ti, preferred_element_type=f32)
          + jnp.einsum('hey,hxy->hex', ki, tr, preferred_element_type=f32))
    # vr/vi: (H, E, Mq)

    # --- per-mode complex weight contraction over E (batched over heads) ---
    wr = wr_ref[...]                                  # (H, E, O, Mq)
    wi = wi_ref[...]
    ure = jnp.sum(vr[:, :, None, :] * wr - vi[:, :, None, :] * wi, axis=1)
    uim = jnp.sum(vr[:, :, None, :] * wi + vi[:, :, None, :] * wr, axis=1)
    # ure/uim: (H, O, Mq)

    # Lane-dense [Re | Im] operand built in registers (no VMEM scratch, no
    # masked partial stores), fed straight into the final IDFT matmul.
    u = jnp.concatenate([ure, uim], axis=-1).reshape(H * O, 2 * Mq)

    # --- scatter-into-spectrum + irfft + /(in_ch*out_ch): one MXU matmul ---
    # Output lane axis is padded to a multiple of 128 -> unmasked vst.
    out_ref[0] = jnp.dot(u, ib_ref[...],
                         preferred_element_type=f32).astype(out_ref.dtype)


class FourierCrossAttentionPallas:
    """Pallas-TPU forward of FEDformer's FourierCrossAttention (tanh branch)."""

    def __init__(self, in_channels, out_channels, seq_len_q, seq_len_kv,
                 modes=64, mode_select_method='random', activation='tanh'):
        assert activation == 'tanh'  # TODO(synk): 'softmax' branch not implemented
        assert in_channels % 8 == 0 and out_channels % 8 == 0
        self.in_channels = in_channels
        self.out_channels = out_channels
        self.seq_len_q = seq_len_q
        self.seq_len_kv = seq_len_kv
        self.heads = 8                       # weight layout hard-codes 8 heads
        self.E = in_channels // 8
        self.O = out_channels // 8

        self.index_q = get_frequency_modes(seq_len_q, modes, mode_select_method)
        self.index_kv = get_frequency_modes(seq_len_kv, modes, mode_select_method)
        Mq, Mkv = len(self.index_q), len(self.index_kv)
        self.Mq_pad = _round_up(max(Mq, 1), 8)
        self.Mkv_pad = _round_up(max(Mkv, 1), 8)
        self.Lq_pad = _round_up(seq_len_q, 128)   # lane-dense output stores

        # Parameters (same init distribution as the torch module).
        scale = 1.0 / (in_channels * out_channels)
        k1, k2 = jax.random.split(jax.random.PRNGKey(0))
        w_shape = (8, self.E, self.O, Mq)
        self.weights1_real = scale * jax.random.uniform(k1, w_shape, jnp.float32)
        self.weights1_imag = scale * jax.random.uniform(k2, w_shape, jnp.float32)
        pad = [(0, 0)] * 3 + [(0, self.Mq_pad - Mq)]
        self._wr = jnp.pad(self.weights1_real, pad)      # (8, E, O, Mq_pad)
        self._wi = jnp.pad(self.weights1_imag, pad)

        # Precomputed (padded) selected-mode DFT / inverse-DFT bases.
        self._fq = jnp.asarray(_dft_basis(seq_len_q, self.index_q, self.Mq_pad))
        self._fk = jnp.asarray(_dft_basis(seq_len_kv, self.index_kv, self.Mkv_pad))
        norm = float(seq_len_q) * in_channels * out_channels
        self._ib = jnp.asarray(
            _idft_basis(seq_len_q, self.Lq_pad, self.index_q, self.Mq_pad, norm))

    def __call__(self, q, k, v, mask=None):
        # q: (B, Lq, H, E); k/v: (B, Lkv, H, E).  v and mask are unused (as in
        # the torch reference).
        B, Lq, H, E = q.shape
        Lkv = k.shape[1]
        assert H == self.heads and E == self.E
        assert Lq == self.seq_len_q and Lkv == self.seq_len_kv
        O, Mq, Mkv, Lqp = self.O, self.Mq_pad, self.Mkv_pad, self.Lq_pad
        HE, HO = H * E, H * O

        # Free reshapes only -- no transpose, no extra HBM pass over q/k.
        q2 = q.reshape(B, Lq, HE)
        k2 = k.reshape(B, Lkv, HE)

        in_specs = [
            pl.BlockSpec((1, Lq, HE), lambda b: (b, 0, 0)),
            pl.BlockSpec((1, Lkv, HE), lambda b: (b, 0, 0)),
            pl.BlockSpec((2 * Mq, Lq), lambda b: (0, 0)),
            pl.BlockSpec((2 * Mkv, Lkv), lambda b: (0, 0)),
            pl.BlockSpec((H, E, O, Mq), lambda b: (0, 0, 0, 0)),
            pl.BlockSpec((H, E, O, Mq), lambda b: (0, 0, 0, 0)),
            pl.BlockSpec((2 * Mq, Lqp), lambda b: (0, 0)),
        ]
        out_spec = pl.BlockSpec((1, HO, Lqp), lambda b: (b, 0, 0))

        out = pl.pallas_call(
            _fourier_cross_attn_kernel,
            out_shape=jax.ShapeDtypeStruct((B, HO, Lqp), jnp.float32),
            grid=(B,),
            in_specs=in_specs,
            out_specs=out_spec,
            compiler_params=pltpu.CompilerParams(
                dimension_semantics=("parallel",)),
        )(q2, k2, self._fq, self._fk, self._wr, self._wi, self._ib)

        if Lqp != Lq:
            out = out[:, :, :Lq]            # strip lane padding
        return out.reshape(B, H, O, Lq), None


def _reference(q, k, index_q, index_kv, wr, wi, in_ch, out_ch):
    """Pure-JAX replica of the torch forward (verification only)."""
    B, L, H, E = q.shape
    xq = jnp.transpose(q, (0, 2, 3, 1))
    xk = jnp.transpose(k, (0, 2, 3, 1))
    iq = jnp.asarray(index_q)
    ikv = jnp.asarray(index_kv)
    xq_ft = jnp.fft.rfft(xq, axis=-1)[..., iq]
    xk_ft = jnp.fft.rfft(xk, axis=-1)[..., ikv]
    xqk = jnp.einsum('bhex,bhey->bhxy', xq_ft, xk_ft)
    xqk = jnp.tanh(xqk)
    xqkv = jnp.einsum('bhxy,bhey->bhex', xqk, xk_ft)
    w = (wr + 1j * wi).astype(jnp.complex64)
    xqkvw = jnp.einsum('bhex,heox->bhox', xqkv, w)
    out_ft = jnp.zeros((B, H, out_ch // 8, L // 2 + 1), dtype=jnp.complex64)
    out_ft = out_ft.at[..., iq].set(xqkvw)
    return jnp.fft.irfft(out_ft / in_ch / out_ch, n=L, axis=-1)


if __name__ == "__main__":
    np.random.seed(0)  # deterministic 'random' mode selection

    B, H = 2, 8                      # module hard-codes 8 heads in weights
    in_channels = out_channels = 64  # E = O = 8
    E = in_channels // 8
    seq_len_q = seq_len_kv = 16
    modes = 4

    module = FourierCrossAttentionPallas(
        in_channels, out_channels, seq_len_q, seq_len_kv,
        modes=modes, mode_select_method='random', activation='tanh')

    key = jax.random.PRNGKey(0)
    kq, kk, kv = jax.random.split(key, 3)
    q = jax.random.normal(kq, (B, seq_len_q, H, E), jnp.float32)
    k = jax.random.normal(kk, (B, seq_len_kv, H, E), jnp.float32)
    v = jax.random.normal(kv, (B, seq_len_kv, H, E), jnp.float32)  # unused

    out, _ = module(q, k, v, mask=None)
    out = jax.block_until_ready(out)

    ref = _reference(q, k, module.index_q, module.index_kv,
                     module.weights1_real, module.weights1_imag,
                     in_channels, out_channels)
    ref = jax.block_until_ready(ref)

    np.testing.assert_allclose(np.asarray(out), np.asarray(ref),
                               rtol=2e-2, atol=3e-7)
    print("KERNEL_OK")
</pallas_src>

<mosaic_0001>
module attributes {stable_mosaic.version = 11 : i64} {
  func.func @_fourier_cross_attn_kernel(%arg0: i32, %arg1: memref<1x16x64xf32, #tpu.memory_space<vmem>>, %arg2: memref<1x16x64xf32, #tpu.memory_space<vmem>>, %arg3: memref<16x16xf32, #tpu.memory_space<vmem>>, %arg4: memref<16x16xf32, #tpu.memory_space<vmem>>, %arg5: memref<8x8x8x8xf32, #tpu.memory_space<vmem>>, %arg6: memref<8x8x8x8xf32, #tpu.memory_space<vmem>>, %arg7: memref<16x128xf32, #tpu.memory_space<vmem>>, %arg8: memref<1x64x128xf32, #tpu.memory_space<vmem>>) attributes {dimension_semantics = [#tpu.dimension_semantics<parallel>], iteration_bounds = array<i64: 2>, scalar_prefetch = 0 : i64, scratch_operands = 0 : i64, tpu.core_type = #tpu.core_type<tc>, window_params = [{transform_indices = @transform_0, window_bounds = array<i64: 1, 16, 64>}, {transform_indices = @transform_1, window_bounds = array<i64: 1, 16, 64>}, {pipeline_mode = #tpu.pipeline_mode<synchronous>, transform_indices = @transform_2, window_bounds = array<i64: 16, 16>}, {pipeline_mode = #tpu.pipeline_mode<synchronous>, transform_indices = @transform_3, window_bounds = array<i64: 16, 16>}, {pipeline_mode = #tpu.pipeline_mode<synchronous>, transform_indices = @transform_4, window_bounds = array<i64: 8, 8, 8, 8>}, {pipeline_mode = #tpu.pipeline_mode<synchronous>, transform_indices = @transform_5, window_bounds = array<i64: 8, 8, 8, 8>}, {pipeline_mode = #tpu.pipeline_mode<synchronous>, transform_indices = @transform_6, window_bounds = array<i64: 16, 128>}, {transform_indices = @transform_7, window_bounds = array<i64: 1, 64, 128>}]} {
    %c0 = arith.constant 0 : index
    %c0_0 = arith.constant 0 : index
    %c0_1 = arith.constant 0 : index
    %0 = vector.load %arg1[%c0, %c0_0, %c0_1] : memref<1x16x64xf32, #tpu.memory_space<vmem>>, vector<1x16x64xf32>
    %1 = vector.shape_cast %0 : vector<1x16x64xf32> to vector<16x64xf32>
    %c0_2 = arith.constant 0 : index
    %c0_3 = arith.constant 0 : index
    %c0_4 = arith.constant 0 : index
    %2 = vector.load %arg2[%c0_2, %c0_3, %c0_4] : memref<1x16x64xf32, #tpu.memory_space<vmem>>, vector<1x16x64xf32>
    %3 = vector.shape_cast %2 : vector<1x16x64xf32> to vector<16x64xf32>
    %c0_5 = arith.constant 0 : index
    %c0_6 = arith.constant 0 : index
    %4 = vector.load %arg3[%c0_5, %c0_6] : memref<16x16xf32, #tpu.memory_space<vmem>>, vector<16x16xf32>
    %cst = arith.constant dense<0.000000e+00> : vector<16x64xf32>
    %5 = tpu.matmul %4, %1, %cst {dimension_numbers = #tpu.dot_dimension_numbers<[1], [0], [0], [1], [0, 0, 1, 1], [], []>} : vector<16x16xf32>, vector<16x64xf32>, vector<16x64xf32> -> vector<16x64xf32>
    %c0_7 = arith.constant 0 : index
    %c0_8 = arith.constant 0 : index
    %6 = vector.load %arg4[%c0_7, %c0_8] : memref<16x16xf32, #tpu.memory_space<vmem>>, vector<16x16xf32>
    %cst_9 = arith.constant dense<0.000000e+00> : vector<16x64xf32>
    %7 = tpu.matmul %6, %3, %cst_9 {dimension_numbers = #tpu.dot_dimension_numbers<[1], [0], [0], [1], [0, 0, 1, 1], [], []>} : vector<16x16xf32>, vector<16x64xf32>, vector<16x64xf32> -> vector<16x64xf32>
    %8 = tpu.transpose %7, [1, 0] : vector<16x64xf32> -> vector<64x16xf32>
    %9 = vector.shape_cast %8 : vector<64x16xf32> to vector<8x8x16xf32>
    %10 = tpu.transpose %5, [1, 0] : vector<16x64xf32> -> vector<64x16xf32>
    %11 = vector.shape_cast %10 : vector<64x16xf32> to vector<8x8x16xf32>
    %12 = tpu.transpose %11, [0, 2, 1] : vector<8x8x16xf32> -> vector<8x16x8xf32>
    "tpu.trace_start"() <{level = 10 : i32, message = "hxe,hey->hxy"}> : () -> ()
    %cst_10 = arith.constant dense<0.000000e+00> : vector<8x16x16xf32>
    %13 = tpu.matmul %12, %9, %cst_10 {dimension_numbers = #tpu.dot_dimension_numbers<[2], [1], [1], [2], [0, 0, 0, 1, 1, 2], [0], [0]>} : vector<8x16x8xf32>, vector<8x8x16xf32>, vector<8x16x16xf32> -> vector<8x16x16xf32>
    "tpu.trace_stop"() : () -> ()
    %14 = vector.extract_strided_slice %13 {offsets = [0, 0, 0], sizes = [8, 8, 8], strides = [1, 1, 1]} : vector<8x16x16xf32> to vector<8x8x8xf32>
    %15 = vector.extract_strided_slice %13 {offsets = [0, 8, 8], sizes = [8, 8, 8], strides = [1, 1, 1]} : vector<8x16x16xf32> to vector<8x8x8xf32>
    %16 = arith.subf %14, %15 : vector<8x8x8xf32>
    %17 = vector.extract_strided_slice %13 {offsets = [0, 0, 8], sizes = [8, 8, 8], strides = [1, 1, 1]} : vector<8x16x16xf32> to vector<8x8x8xf32>
    %18 = vector.extract_strided_slice %13 {offsets = [0, 8, 0], sizes = [8, 8, 8], strides = [1, 1, 1]} : vector<8x16x16xf32> to vector<8x8x8xf32>
    %19 = arith.addf %17, %18 : vector<8x8x8xf32>
    %cst_11 = arith.constant 2.000000e+00 : f32
    %20 = vector.broadcast %cst_11 : f32 to vector<8x8x8xf32>
    %21 = arith.mulf %20, %16 : vector<8x8x8xf32>
    %cst_12 = arith.constant -3.000000e+01 : f32
    %cst_13 = arith.constant 3.000000e+01 : f32
    %22 = vector.broadcast %cst_12 : f32 to vector<8x8x8xf32>
    %23 = arith.maximumf %22, %21 : vector<8x8x8xf32>
    %24 = vector.broadcast %cst_13 : f32 to vector<8x8x8xf32>
    %25 = arith.minimumf %24, %23 : vector<8x8x8xf32>
    %cst_14 = arith.constant 2.000000e+00 : f32
    %26 = vector.broadcast %cst_14 : f32 to vector<8x8x8xf32>
    %27 = arith.mulf %26, %19 : vector<8x8x8xf32>
    %28 = math.exp %25 : vector<8x8x8xf32>
    %cst_15 = arith.constant 0.000000e+00 : f32
    %29 = vector.broadcast %cst_15 : f32 to vector<8x8x8xf32>
    %30 = arith.subf %29, %25 : vector<8x8x8xf32>
    %31 = math.exp %30 : vector<8x8x8xf32>
    %32 = arith.addf %28, %31 : vector<8x8x8xf32>
    %cst_16 = arith.constant 5.000000e-01 : f32
    %33 = vector.broadcast %cst_16 : f32 to vector<8x8x8xf32>
    %34 = arith.mulf %33, %32 : vector<8x8x8xf32>
    %35 = math.cos %27 : vector<8x8x8xf32>
    %36 = arith.addf %34, %35 : vector<8x8x8xf32>
    %cst_17 = arith.constant 1.000000e+00 : f32
    %37 = vector.broadcast %cst_17 : f32 to vector<8x8x8xf32>
    %38 = arith.divf %37, %36 : vector<8x8x8xf32>
    %39 = arith.subf %28, %31 : vector<8x8x8xf32>
    %cst_18 = arith.constant 5.000000e-01 : f32
    %40 = vector.broadcast %cst_18 : f32 to vector<8x8x8xf32>
    %41 = arith.mulf %40, %39 : vector<8x8x8xf32>
    %42 = arith.mulf %41, %38 : vector<8x8x8xf32>
    %43 = math.sin %27 : vector<8x8x8xf32>
    %44 = arith.mulf %43, %38 : vector<8x8x8xf32>
    %45 = vector.extract_strided_slice %9 {offsets = [0, 0, 0], sizes = [8, 8, 8], strides = [1, 1, 1]} : vector<8x8x16xf32> to vector<8x8x8xf32>
    %46 = vector.extract_strided_slice %9 {offsets = [0, 0, 8], sizes = [8, 8, 8], strides = [1, 1, 1]} : vector<8x8x16xf32> to vector<8x8x8xf32>
    "tpu.trace_start"() <{level = 10 : i32, message = "hey,hxy->hex"}> : () -> ()
    %cst_19 = arith.constant dense<0.000000e+00> : vector<8x8x8xf32>
    %47 = tpu.matmul %45, %42, %cst_19 {dimension_numbers = #tpu.dot_dimension_numbers<[2], [2], [1], [1], [0, 0, 0, 1, 1, 1], [0], [0]>} : vector<8x8x8xf32>, vector<8x8x8xf32>, vector<8x8x8xf32> -> vector<8x8x8xf32>
    %cst_20 = arith.constant dense<0.000000e+00> : vector<8x8x8xf32>
    %48 = tpu.matmul %46, %44, %cst_20 {dimension_numbers = #tpu.dot_dimension_numbers<[2], [2], [1], [1], [0, 0, 0, 1, 1, 1], [0], [0]>} : vector<8x8x8xf32>, vector<8x8x8xf32>, vector<8x8x8xf32> -> vector<8x8x8xf32>
    "tpu.trace_stop"() : () -> ()
    %49 = arith.subf %47, %48 : vector<8x8x8xf32>
    "tpu.trace_start"() <{level = 10 : i32, message = "hey,hxy->hex"}> : () -> ()
    %cst_21 = arith.constant dense<0.000000e+00> : vector<8x8x8xf32>
    %50 = tpu.matmul %45, %44, %cst_21 {dimension_numbers = #tpu.dot_dimension_numbers<[2], [2], [1], [1], [0, 0, 0, 1, 1, 1], [0], [0]>} : vector<8x8x8xf32>, vector<8x8x8xf32>, vector<8x8x8xf32> -> vector<8x8x8xf32>
    %cst_22 = arith.constant dense<0.000000e+00> : vector<8x8x8xf32>
    %51 = tpu.matmul %46, %42, %cst_22 {dimension_numbers = #tpu.dot_dimension_numbers<[2], [2], [1], [1], [0, 0, 0, 1, 1, 1], [0], [0]>} : vector<8x8x8xf32>, vector<8x8x8xf32>, vector<8x8x8xf32> -> vector<8x8x8xf32>
    "tpu.trace_stop"() : () -> ()
    %52 = arith.addf %50, %51 : vector<8x8x8xf32>
    %c0_23 = arith.constant 0 : index
    %c0_24 = arith.constant 0 : index
    %c0_25 = arith.constant 0 : index
    %c0_26 = arith.constant 0 : index
    %53 = vector.load %arg5[%c0_23, %c0_24, %c0_25, %c0_26] : memref<8x8x8x8xf32, #tpu.memory_space<vmem>>, vector<8x8x8x8xf32>
    %c0_27 = arith.constant 0 : index
    %c0_28 = arith.constant 0 : index
    %c0_29 = arith.constant 0 : index
    %c0_30 = arith.constant 0 : index
    %54 = vector.load %arg6[%c0_27, %c0_28, %c0_29, %c0_30] : memref<8x8x8x8xf32, #tpu.memory_space<vmem>>, vector<8x8x8x8xf32>
    %55 = vector.shape_cast %49 : vector<8x8x8xf32> to vector<8x8x1x8xf32>
    %56 = vector.broadcast %55 : vector<8x8x1x8xf32> to vector<8x8x8x8xf32>
    %57 = arith.mulf %56, %53 : vector<8x8x8x8xf32>
    %58 = vector.shape_cast %52 : vector<8x8x8xf32> to vector<8x8x1x8xf32>
    %59 = vector.broadcast %58 : vector<8x8x1x8xf32> to vector<8x8x8x8xf32>
    %60 = arith.mulf %59, %54 : vector<8x8x8x8xf32>
    %61 = arith.subf %57, %60 : vector<8x8x8x8xf32>
    %cst_31 = arith.constant dense<0.000000e+00> : vector<8x8x8xf32>
    %62 = vector.multi_reduction <add>, %61, %cst_31 [1] : vector<8x8x8x8xf32> to vector<8x8x8xf32>
    %63 = vector.shape_cast %49 : vector<8x8x8xf32> to vector<8x8x1x8xf32>
    %64 = vector.broadcast %63 : vector<8x8x1x8xf32> to vector<8x8x8x8xf32>
    %65 = arith.mulf %64, %54 : vector<8x8x8x8xf32>
    %66 = vector.shape_cast %52 : vector<8x8x8xf32> to vector<8x8x1x8xf32>
    %67 = vector.broadcast %66 : vector<8x8x1x8xf32> to vector<8x8x8x8xf32>
    %68 = arith.mulf %67, %53 : vector<8x8x8x8xf32>
    %69 = arith.addf %65, %68 : vector<8x8x8x8xf32>
    %cst_32 = arith.constant dense<0.000000e+00> : vector<8x8x8xf32>
    %70 = vector.multi_reduction <add>, %69, %cst_32 [1] : vector<8x8x8x8xf32> to vector<8x8x8xf32>
    %71 = tpu.concatenate %62, %70 in 2 : vector<8x8x8xf32>, vector<8x8x8xf32> -> vector<8x8x16xf32>
    %72 = vector.shape_cast %71 : vector<8x8x16xf32> to vector<64x16xf32>
    %c0_33 = arith.constant 0 : index
    %c0_34 = arith.constant 0 : index
    %73 = vector.load %arg7[%c0_33, %c0_34] : memref<16x128xf32, #tpu.memory_space<vmem>>, vector<16x128xf32>
    %cst_35 = arith.constant dense<0.000000e+00> : vector<64x128xf32>
    %74 = tpu.matmul %72, %73, %cst_35 {dimension_numbers = #tpu.dot_dimension_numbers<[1], [0], [0], [1], [0, 0, 1, 1], [], []>} : vector<64x16xf32>, vector<16x128xf32>, vector<64x128xf32> -> vector<64x128xf32>
    %c0_36 = arith.constant 0 : index
    %c0_37 = arith.constant 0 : index
    %c0_38 = arith.constant 0 : index
    %75 = vector.load %arg8[%c0_36, %c0_37, %c0_38] : memref<1x64x128xf32, #tpu.memory_space<vmem>>, vector<1x64x128xf32>
    %76 = vector.shape_cast %75 : vector<1x64x128xf32> to vector<64x128xf32>
    %77 = vector.shape_cast %74 : vector<64x128xf32> to vector<1x64x128xf32>
    tpu.vector_store %arg8[%c0_36, %c0_37, %c0_38], %77 {strides = array<i32>} : memref<1x64x128xf32, #tpu.memory_space<vmem>>, vector<1x64x128xf32>,
    return
  }
  func.func @transform_0(%arg0: i32) -> (i32, i32, i32) {
    %c0_i32 = arith.constant 0 : i32
    %c0_i32_0 = arith.constant 0 : i32
    %c0_i32_1 = arith.constant 0 : i32
    return %arg0, %c0_i32, %c0_i32_0 : i32, i32, i32
  }
  func.func @transform_1(%arg0: i32) -> (i32, i32, i32) {
    %c0_i32 = arith.constant 0 : i32
    %c0_i32_0 = arith.constant 0 : i32
    %c0_i32_1 = arith.constant 0 : i32
    return %arg0, %c0_i32, %c0_i32_0 : i32, i32, i32
  }
  func.func @transform_2(%arg0: i32) -> (i32, i32) {
    %c0_i32 = arith.constant 0 : i32
    %c0_i32_0 = arith.constant 0 : i32
    %c0_i32_1 = arith.constant 0 : i32
    return %c0_i32, %c0_i32_0 : i32, i32
  }
  func.func @transform_3(%arg0: i32) -> (i32, i32) {
    %c0_i32 = arith.constant 0 : i32
    %c0_i32_0 = arith.constant 0 : i32
    %c0_i32_1 = arith.constant 0 : i32
    return %c0_i32, %c0_i32_0 : i32, i32
  }
  func.func @transform_4(%arg0: i32) -> (i32, i32, i32, i32) {
    %c0_i32 = arith.constant 0 : i32
    %c0_i32_0 = arith.constant 0 : i32
    %c0_i32_1 = arith.constant 0 : i32
    %c0_i32_2 = arith.constant 0 : i32
    %c0_i32_3 = arith.constant 0 : i32
    return %c0_i32, %c0_i32_0, %c0_i32_1, %c0_i32_2 : i32, i32, i32, i32
  }
  func.func @transform_5(%arg0: i32) -> (i32, i32, i32, i32) {
    %c0_i32 = arith.constant 0 : i32
    %c0_i32_0 = arith.constant 0 : i32
    %c0_i32_1 = arith.constant 0 : i32
    %c0_i32_2 = arith.constant 0 : i32
    %c0_i32_3 = arith.constant 0 : i32
    return %c0_i32, %c0_i32_0, %c0_i32_1, %c0_i32_2 : i32, i32, i32, i32
  }
  func.func @transform_6(%arg0: i32) -> (i32, i32) {
    %c0_i32 = arith.constant 0 : i32
    %c0_i32_0 = arith.constant 0 : i32
    %c0_i32_1 = arith.constant 0 : i32
    return %c0_i32, %c0_i32_0 : i32, i32
  }
  func.func @transform_7(%arg0: i32) -> (i32, i32, i32) {
    %c0_i32 = arith.constant 0 : i32
    %c0_i32_0 = arith.constant 0 : i32
    %c0_i32_1 = arith.constant 0 : i32
    return %arg0, %c0_i32, %c0_i32_0 : i32, i32, i32
  }
}

</mosaic_0001>

<bundles_post_ra>
// kernel: tpu_custom_call.1
= control target key start
LH: loop header
LB: loop body
LE: loop exit
PB: predicated region body
PF: predicated region fallthrough
CT: control target
= control target key end

     0   :  { %s13084_s0 = inlined_call_operand.hbm [shape: f32[2,16,64], index: 0, kind: input, shape index: {}]   ;;  %s13085_s1 = inlined_call_operand.hbm [shape: f32[2,16,64], index: 1, kind: input, shape index: {}]   ;;  %s13086_s2 = inlined_call_operand.hbm [shape: f32[16,16], index: 2, kind: input, shape index: {}]   ;;  %s13087_s3 = inlined_call_operand.hbm [shape: f32[16,16], index: 3, kind: input, shape index: {}]   ;;  %s13088_s4 = inlined_call_operand.hbm [shape: f32[8,8,8,8], index: 4, kind: input, shape index: {}]   ;;  %s13089_s5 = inlined_call_operand.hbm [shape: f32[8,8,8,8], index: 5, kind: input, shape index: {}]   ;;  %s13090_s6 = inlined_call_operand.vmem [shape: f32[16,128], index: 6, kind: input, shape index: {}]   ;;  %s13091_s7 = inlined_call_operand.hbm [shape: f32[2,64,128], index: 7, kind: output, shape index: {}]  }
   0x1   :  { %13280 = sst [smem:[#allocation221_spill]] %s13084_s0 }
   0x2   :  { %13281 = sst [smem:[#allocation222_spill]] %s13086_s2 }
   0x3   :  { %13282 = sst [smem:[#allocation223_spill]] %s13087_s3 }
   0x4   :  { %12 = vsyncpa [#allocation3], 0 }
   0x5   :  { %14 = vsyncpa [#allocation3 + $0x1], 0 }
   0x6   :  { %15 = vsyncpa [#allocation6], 0 }
   0x7   :  { %17 = vsyncpa [#allocation6 + $0x1], 0 }
   0x8   :  { %18 = vsyncpa [#allocation9], 0 }
   0x9   :  { %19 = vsyncpa [#allocation12], 0 }
   0xa   :  { %20 = vsyncpa [#allocation4], 0 }
   0xb   :  { %22 = vsyncpa [#allocation4 + $0x1], 0  ;;  %s9473_s24 = smov 0   ;;  %s9475_s25 = smov 0  }
   0xc   :  { %s9477_s26 = smov 0   ;;  %s9479_s27 = smov 0  }
   0xd LB: > { %s9494_s28 = sadd.s32 4294967295, %s9410_s27   ;;  %s8358_s29 = sadd.s32 4294967294, %s9410_s27   ;;  %s9410_s27 = sphi %s9479_s27, %s13938_s27   ;;  %s9406_s26 = sphi %s9477_s26, %s13937_s26   ;;  %s9402_s25 = sphi %s9475_s25, %s13936_s25   ;;  %s9398_s24 = sphi %s9473_s24, %s13935_s24  }
   0xe   : > { %p48_p0 = scmp.ne.s32.totalorder %s9402_s25, %s9398_s24  ;;  %p13092_p1 = scmp.eq.s32.totalorder %s9494_s28, 0 }
   0xf   : > { %p209_p3 = scmp.eq.s32.totalorder %s8358_s29, 1  ;;  %p8359_p5 = scmp.ge.s32.totalorder %s9410_s27, 1 }
  0x10   : > { %p9503_p4 = por %p13092_p1, %p48_p0  ;;  %p216_p7 = scmp.lt.s32.totalorder %s9410_s27, 3 }
  0x11   : > { %p9508_p6 = por %p209_p3, %p48_p0  ;;  %s9412_s10 = smov [#allocation7]  }
  0x12   : > { %s13283_s30 = scalar_select %p9503_p4, 1, 0 }
  0x13   : > { %s13284_s8 = scalar_select %p9508_p6, 1, 0 }
  0x14   : > { %p9513_p8 = pnand %p8359_p5, %p216_p7  ;;  %s228_s11 = sshll.u32 %s9412_s10, 4  ;;  %s9517_s11 = int_to_ptr.vmem [resolvable:$true] %s228_s11 }
  0x15   : > { %13285 = sst [smem:[#allocation20_spill]] %s13284_s8  ;;  %s9413_s13 = smov [#allocation8]  }
  0x16   : > { %s13286_s9 = scalar_select %p9513_p8, 1, 0 }
  0x17   : > { %p8971_p9 = pneg %p9513_p8  ;;  %s241_s14 = sshll.u32 %s9413_s13, 4  ;;  %s9528_s14 = int_to_ptr.vmem [resolvable:$true] %s241_s14 }
  0x18   : > { %s9414_s15 = smov [#allocation10]   ;;  %s13288_s2 = sld [smem:[#allocation222_spill]] }
  0x19   : > { %p9524_p11 = pnand %p8971_p9, %p13092_p1  ;;  %s9530_s16 = sshll.u32 %s9414_s15, 4  ;;  %s255_s16 = int_to_ptr.vmem [resolvable:$true] %s9530_s16 }
  0x1b   : > { %p9540_p13 = pneg %p9524_p11 }
  0x1e   : > { %s9156_s19 = scalar_lea.hbm %s13288_s2, 256 }
  0x1f   : > { %p9157_p12 = scmp.ne.s32.totalorder %s13288_s2, %s9156_s19  ;;  %p9163_p5 = scmp.lt.u32.totalorder %s9156_s19, %s13288_s2 }
  0x21   : > { %p9159_p0 = pnand %p9540_p13, %p9157_p12 }
  0x23   : > { %p9160_p3 = pneg %p9159_p0 }
  0x25   : > { %p9165_p7 = pnand %p9163_p5, %p9160_p3 }
  0x27   : > { %9168 = shalt.err (!%p9165_p7)
}
  0x28   : > { %s9169_s10 = scalar_lea.vmem %s9517_s11, 256  ;;  %p9177_p2 = scmp.lt.s32.totalorder %s9517_s11, %s9517_s11 }
  0x29   : > { %p9170_p9 = scmp.ne.s32.totalorder %s9517_s11, %s9169_s10  ;;  %p9178_p6 = scmp.lt.s32.totalorder %s9169_s10, %s9169_s10 }
  0x2b   : > { %p9172_p10 = pnand %p9170_p9, %p9540_p13  ;;  %p9179_p12 = por %p9178_p6, %p9177_p2 }
  0x2d   : > { %p9173_p1 = pneg %p9172_p10 }
  0x2f   : > { %p9180_p0 = pnand %p9179_p12, %p9173_p1 }
  0x31   : > { %9183 = shalt.err (!%p9180_p0)
}
  0x32   : > { %s13096_s13 = smov 128   ;;  %s13098_s15 = smov 8  }
  0x33   : > { %8974 = dma.hbm_to_vmem [thread:$0]  (!%p9524_p11), %s13288_s2, 256, %s9517_s11, [#allocation6], %s13096_s13, %s13096_s13, %s13098_s15  }
  0x34   : > { %s13290_s3 = sld [smem:[#allocation223_spill]] }
  0x3a   : > { %s9184_s21 = scalar_lea.hbm %s13290_s3, 256 }
  0x3b   : > { %p9185_p1 = scmp.ne.s32.totalorder %s13290_s3, %s9184_s21  ;;  %p9191_p10 = scmp.lt.u32.totalorder %s9184_s21, %s13290_s3 }
  0x3d   : > { %p9187_p2 = pnand %p9185_p1, %p9540_p13 }
  0x3f   : > { %p9188_p6 = pneg %p9187_p2 }
  0x41   : > { %p9193_p3 = pnand %p9191_p10, %p9188_p6 }
  0x43   : > { %9196 = shalt.err (!%p9193_p3)
}
  0x44   : > { %s9197_s11 = scalar_lea.vmem %s9528_s14, 256  ;;  %p9205_p12 = scmp.lt.s32.totalorder %s9528_s14, %s9528_s14 }
  0x45   : > { %p9198_p5 = scmp.ne.s32.totalorder %s9528_s14, %s9197_s11  ;;  %p9206_p0 = scmp.lt.s32.totalorder %s9197_s11, %s9197_s11 }
  0x47   : > { %p9200_p7 = pnand %p9198_p5, %p9540_p13  ;;  %p9207_p1 = por %p9206_p0, %p9205_p12 }
  0x49   : > { %p9201_p9 = pneg %p9200_p7 }
  0x4b   : > { %p9208_p2 = pnand %p9207_p1, %p9201_p9 }
  0x4d   : > { %9211 = shalt.err (!%p9208_p2)
}
  0x4e   : > { %8977 = dma.hbm_to_vmem [thread:$0]  (!%p9524_p11), %s13290_s3, 256, %s9528_s14, [#allocation9], %s13096_s13, %s13096_s13, %s13098_s15  }
  0x4f   : > { %s9212_s20 = scalar_lea.hbm %s13088_s4, 8192 }
  0x50   : > { %p9213_p6 = scmp.ne.s32.totalorder %s13088_s4, %s9212_s20  ;;  %p9219_p5 = scmp.lt.u32.totalorder %s9212_s20, %s13088_s4 }
  0x52   : > { %p9215_p10 = pnand %p9213_p6, %p9540_p13 }
  0x54   : > { %p9216_p3 = pneg %p9215_p10 }
  0x56   : > { %p9221_p7 = pnand %p9219_p5, %p9216_p3 }
  0x58   : > { %9224 = shalt.err (!%p9221_p7)
}
  0x59   : > { %s9225_s11 = scalar_lea.vmem %s255_s16, 8192  ;;  %p9233_p1 = scmp.lt.s32.totalorder %s255_s16, %s255_s16 }
  0x5a   : > { %p9226_p9 = scmp.ne.s32.totalorder %s255_s16, %s9225_s11  ;;  %p9234_p2 = scmp.lt.s32.totalorder %s9225_s11, %s9225_s11 }
  0x5c   : > { %p9228_p12 = pnand %p9226_p9, %p9540_p13  ;;  %p9235_p4 = por %p9234_p2, %p9233_p1 }
  0x5e   : > { %p9229_p0 = pneg %p9228_p12 }
  0x60   : > { %p9236_p8 = pnand %p9235_p4, %p9229_p0 }
  0x62   : > { %9239 = shalt.err (!%p9236_p8)
}
  0x63   : > { %8980 = dma.hbm_to_vmem [thread:$0]  (!%p9524_p11), %s13088_s4, 8192, %s255_s16, [#allocation9], %s13096_s13, %s13096_s13, %s13098_s15  }
  0x64   : > { %s9417_s17 = smov [#allocation11]   ;;  %s9240_s21 = scalar_lea.hbm %s13089_s5, 8192 }
  0x65   : > { %s267_s18 = sshll.u32 %s9417_s17, 4  ;;  %p9241_p4 = scmp.ne.s32.totalorder %s13089_s5, %s9240_s21  ;;  %s268_s18 = int_to_ptr.vmem [resolvable:$true] %s267_s18 }
  0x66   : > { %p9247_p10 = scmp.lt.u32.totalorder %s9240_s21, %s13089_s5 }
  0x67   : > { %p9243_p8 = pnand %p9241_p4, %p9540_p13 }
  0x69   : > { %p9244_p6 = pneg %p9243_p8 }
  0x6b   : > { %p9249_p3 = pnand %p9247_p10, %p9244_p6 }
  0x6d   : > { %9252 = shalt.err (!%p9249_p3)
}
  0x6e   : > { %s9253_s16 = scalar_lea.vmem %s268_s18, 8192  ;;  %p9261_p12 = scmp.lt.s32.totalorder %s268_s18, %s268_s18 }
  0x6f   : > { %p9254_p5 = scmp.ne.s32.totalorder %s268_s18, %s9253_s16  ;;  %p9262_p0 = scmp.lt.s32.totalorder %s9253_s16, %s9253_s16 }
  0x71   : > { %p9256_p7 = pnand %p9254_p5, %p9540_p13  ;;  %p9263_p1 = por %p9262_p0, %p9261_p12 }
  0x73   : > { %p9257_p9 = pneg %p9256_p7 }
  0x75   : > { %p9264_p2 = pnand %p9263_p1, %p9257_p9 }
  0x77   : > { %9267 = shalt.err (!%p9264_p2)
}
  0x78   : > { %8983 = dma.hbm_to_vmem [thread:$0]  (!%p9524_p11), %s13089_s5, 8192, %s268_s18, [#allocation12], %s13096_s13, %s13096_s13, %s13098_s15  }
  0x79   : > { %s9634_s22 = sadd.s32 1, %s9410_s27   ;;  %s35_s12 = sadd.s32 1, %s9406_s26 }
  0x7a   : > { %s32_s17 = ssub.s32 %s9410_s27, %s9634_s22  ;;  %p42_p13 = scmp.ne.s32.totalorder %s9406_s26, %s9402_s25 }
  0x7b   : > { %p33_p4 = scmp.eq.s32.totalorder %s32_s17, 0  ;;  %p43_p8 = scmp.eq.s32.totalorder %s9410_s27, 0 }
  0x7c   : > { %p13291_p6 = scmp.eq.s32.totalorder %s9494_s28, 1  ;;  %p8999_p3 = scmp.lt.s32.totalorder %s9410_s27, 2 }
  0x7d   : > { %s9650_s20 = scalar_select %p33_p4, %s9406_s26, %s35_s12  }
  0x7e   : > { %p9644_p10 = por %p13291_p6, %p42_p13  ;;  %p44_p5 = por %p43_p8, %p42_p13 }
  0x7f   : > { %s284_s21 = sand.u32 1, %s9406_s26   ;;  %s8548_s18 = sshll.u32 %s9410_s27, 8 }
  0x80   : > { %s8365_s23 = sshll.u32 %s284_s21, 4  ;;  %s13293_s0 = sld [smem:[#allocation221_spill]] }
  0x81   : > { %s288_s16 = scalar_lea.vmem [#allocation2], %s8365_s23  ;;  %p9661_p11 = pnand %p8999_p3, %p44_p5 }
  0x82   : > { %s295_s14 = sshll.u32 %s288_s16, 4  ;;  %s9668_s29 = scalar_lea.hbm %s13085_s1, %s8548_s18  ;;  %s9659_s14 = int_to_ptr.vmem [resolvable:$true] %s295_s14 }
  0x83   : > { %s309_s10 = scalar_lea.vmem [#allocation5], %s8365_s23  ;;  %s9672_s15 = scalar_lea.sflag [#allocation3], %s284_s21 }
  0x84   : > { %s9670_s13 = sshll.u32 %s309_s10, 4  ;;  %p9270_p9 = pneg %p9661_p11  ;;  %s9704_s13 = int_to_ptr.vmem [resolvable:$true] %s9670_s13 }
  0x86   : > { %s9657_s11 = scalar_lea.hbm %s13293_s0, %s8548_s18  ;;  %s9273_s12 = scalar_lea.hbm %s13293_s0, 512 }
  0x87   : > { %s9268_s16 = scalar_lea.hbm %s9657_s11, 256  ;;  %p9274_p1 = scmp.lt.u32.totalorder %s9657_s11, %s13293_s0 }
  0x88   : > { %p9269_p7 = scmp.ne.s32.totalorder %s9657_s11, %s9268_s16  ;;  %p9275_p2 = scmp.lt.u32.totalorder %s9273_s12, %s9268_s16 }
  0x89   : > { %p9277_p4 = scmp.lt.u32.totalorder %s9268_s16, %s9657_s11 }
  0x8a   : > { %p9271_p12 = pnand %p9270_p9, %p9269_p7  ;;  %p9276_p13 = por %p9275_p2, %p9274_p1 }
  0x8c   : > { %p9272_p0 = pneg %p9271_p12  ;;  %p9278_p8 = por %p9277_p4, %p9276_p13 }
  0x8e   : > { %p9279_p6 = pnand %p9278_p8, %p9272_p0 }
  0x90   : > { %9282 = shalt.err (!%p9279_p6)
}
  0x91   : > { %s9283_s21 = scalar_lea.vmem %s9659_s14, 256  ;;  %s9418_s2 = smov [#allocation2]  }
  0x92   : > { %p9284_p3 = scmp.ne.s32.totalorder %s9659_s14, %s9283_s21  ;;  %s9288_s3 = sshll.u32 %s9418_s2, 4  ;;  %s9289_s3 = int_to_ptr.vmem [resolvable:$false] %s9288_s3 }
  0x93   : > { %s9290_s23 = scalar_lea.vmem %s9289_s3, 512  ;;  %p9291_p12 = scmp.lt.s32.totalorder %s9659_s14, %s9289_s3 }
  0x94   : > { %p9286_p5 = pnand %p9284_p3, %p9270_p9  ;;  %p9292_p1 = scmp.lt.s32.totalorder %s9290_s23, %s9283_s21 }
  0x96   : > { %p9287_p7 = pneg %p9286_p5  ;;  %p9293_p2 = por %p9292_p1, %p9291_p12 }
  0x98   : > { %p9294_p13 = pnand %p9293_p2, %p9287_p7 }
  0x9a   : > { %9297 = shalt.err (!%p9294_p13)
}
  0x9b   : > { %s13295_s10 = smov 8   ;;  %s13296_s16 = smov 128  }
  0x9c   : > { %8987 = dma.hbm_to_vmem [thread:$0]  (!%p9661_p11), %s9657_s11, 256, %s9659_s14, %s9672_s15, %s13296_s16, %s13296_s16, %s13295_s10  }
  0x9d   : > { %s305_s12 = sand.u32 1, %s9410_s27   ;;  %s9298_s18 = scalar_lea.hbm %s9668_s29, 256 }
  0x9e   : > { %s9707_s17 = scalar_lea.sflag [#allocation6], %s305_s12  ;;  %p9299_p0 = scmp.ne.s32.totalorder %s9668_s29, %s9298_s18 }
  0x9f   : > { %s9303_s3 = scalar_lea.hbm %s13085_s1, 512  ;;  %p9304_p6 = scmp.lt.u32.totalorder %s9668_s29, %s13085_s1 }
  0xa0   : > { %p9301_p4 = pnand %p9299_p0, %p9270_p9  ;;  %p9305_p3 = scmp.lt.u32.totalorder %s9303_s3, %s9298_s18 }
  0xa1   : > { %p9307_p7 = scmp.lt.u32.totalorder %s9298_s18, %s9668_s29 }
  0xa2   : > { %p9302_p8 = pneg %p9301_p4  ;;  %p9306_p5 = por %p9305_p3, %p9304_p6 }
  0xa4   : > { %p9308_p12 = por %p9307_p7, %p9306_p5 }
  0xa6   : > { %p9309_p1 = pnand %p9308_p12, %p9302_p8 }
  0xa8   : > { %9312 = shalt.err (!%p9309_p1)
}
  0xa9   : > { %s9313_s15 = scalar_lea.vmem %s9704_s13, 256  ;;  %s9419_s11 = smov [#allocation5]  }
  0xaa   : > { %p9314_p2 = scmp.ne.s32.totalorder %s9704_s13, %s9313_s15  ;;  %s9318_s14 = sshll.u32 %s9419_s11, 4  ;;  %s9319_s14 = int_to_ptr.vmem [resolvable:$false] %s9318_s14 }
  0xab   : > { %s9320_s0 = scalar_lea.vmem %s9319_s14, 512  ;;  %p9321_p4 = scmp.lt.s32.totalorder %s9704_s13, %s9319_s14 }
  0xac   : > { %p9316_p13 = pnand %p9314_p2, %p9270_p9  ;;  %p9322_p6 = scmp.lt.s32.totalorder %s9320_s0, %s9313_s15 }
  0xae   : > { %p9317_p0 = pneg %p9316_p13  ;;  %p9323_p3 = por %p9322_p6, %p9321_p4 }
  0xb0   : > { %p9324_p5 = pnand %p9323_p3, %p9317_p0 }
  0xb2   : > { %9327 = shalt.err (!%p9324_p5)
}
  0xb3   : > { %8990 = dma.hbm_to_vmem [thread:$0]  (!%p9661_p11), %s9668_s29, 256, %s9704_s13, %s9707_s17, %s13296_s16, %s13296_s16, %s13295_s10  }
  0xb4   : > { %p13297_p9 = scmp.ne.s32.totalorder %s13286_s9, 0 }
  0xb6   : > { %328 = sbr.rel (%p13297_p9) target bundleno = 2358 (0x936), region = 48 }
  0xbd   : > { %s9739_s12 = sand.u32 1, %s9402_s25   ;;  %p13298_p8 = scmp.ne.s32.totalorder %s13283_s30, 0 }
  0xbe   : > { %s8372_s18 = sshll.u32 %s9739_s12, 4  ;;  %s331_s21 = scalar_lea.sflag [#allocation3], %s9739_s12 }
  0xbf   : > { %s334_s2 = scalar_lea.vmem [#allocation2], %s8372_s18 }
  0xc0   : > { %9373 = dma.done.wait (%p13298_p8), %s331_s21, 256  }
  0xc1   : > { %9375 = vsyncadd (%p13298_p8), %s331_s21, 4294967040  ;;  %s339_s13 = sand.u32 1, %s9494_s28   ;;  %s343_s9 = scalar_lea.vmem [#allocation5], %s8372_s18 }
  0xc2   : > { %s340_s8 = scalar_lea.sflag [#allocation6], %s339_s13 }
  0xc3   : > { %9377 = dma.done.wait (%p13298_p8), %s340_s8, 256  }
  0xc4   : > { %9379 = vsyncadd (%p13298_p8), %s340_s8, 4294967040  ;;  %p13299_p11 = scmp.eq.s32.totalorder %s9494_s28, 0 }
  0xc6   : > { %9381 = dma.done.wait (%p13299_p11), [#allocation6], 256   ;;  %p13300_p7 = pmov %p13299_p11 }
  0xc8   : > { %9383 = vsyncadd (%p13300_p7), [#allocation6], 4294967040  ;;  %p13301_p12 = pmov %p13300_p7 }
  0xc9   : > { %p13302_p1 = pmov %p13300_p7 }
  0xca   : > { %9385 = dma.done.wait (%p13301_p12), [#allocation9], 8448  }
  0xcb   : > { %9387 = vsyncadd (%p13302_p1), [#allocation9], 4294958848  ;;  %p13303_p2 = pmov %p13302_p1 }
  0xcc   : > { %p13304_p13 = pmov %p13302_p1 }
  0xcd   : > { %9389 = dma.done.wait (%p13303_p2), [#allocation12], 8192  }
  0xce   : > { %9391 = vsyncadd (%p13304_p13), [#allocation12], 4294959104  ;;  %vm13162_vm0 = vcmask 130048   ;;  %v395_v0 = vld [vmem:[%s334_s2] sm:$0xff]  ;;  %v396_v1 = vld [vmem:[%s334_s2 + $0x8] sm:$0xff]  ;;  %vm886_vm1 = vcmask 64512  }
  0xcf   : > { %v399_v2 = vld [vmem:[#allocation7] sm:$0xff]  ;;  %v8887_v3 = vpack.c.bf16 %v396_v1, %v395_v0  ;;  %v398_v5 = vld [vmem:[%s343_s9 + $0x8] sm:$0xff]  ;;  %v483_v7 = vld [vmem:[#allocation8] sm:$0xff]  ;;  %s9420_s30 = smov 8   ;;  %s9421_s29 = smov 120  }
  0xd0   : > { %8661 = vmatprep.mubr.msk.f32.mxu0 %vm13162_vm0, %v399_v2  ;;  %v397_v4 = vld [vmem:[%s343_s9] sm:$0xff]  ;;  %8668 = vmatprep.mubr.msk.f32.mxu1 %vm13162_vm0, %v483_v7  ;;  %v400_v8 = vld [vmem:[#allocation7 + $0x8] sm:$0xff]  ;;  %v484_v9 = vld [vmem:[#allocation8 + $0x8] sm:$0xff]  ;;  %s8378_s23 = sshll.u32 %s9739_s12, 6  ;;  %s8550_s14 = sshll.u32 %s9494_s28, 10 }
  0xd1   : > { %v8891_v6 = vpack.c.bf16 %v398_v5, %v397_v4  ;;  %8888 = vmatprep.subr.bf16.mxu0 %v8887_v3  ;;  %s394_s15 = scalar_lea.vmem [#allocation13], %s8378_s23  ;;  %s13039_s21 = scalar_lea.hbm %s13091_s7, %s8550_s14 }
  0xd2   : > { %8890 = vmatpush3.bf16.msra.mxu0 %v8887_v3  ;;  %s8224_s11 = sshll.u32 %s394_s15, 4  ;;  %s8211_s2 = scalar_lea.sflag [#allocation4], %s9739_s12  ;;  %s13034_s11 = int_to_ptr.vmem [resolvable:$true] %s8224_s11 }
  0xd3   : > { %8892 = vmatprep.subr.bf16.mxu1 %v8891_v6  ;;  %s9328_s13 = scalar_lea.vmem %s13034_s11, 1024  ;;  %s9431_s28 = smov [#allocation13]  }
  0xd4   : > { %8894 = vmatpush3.bf16.msra.mxu1 %v8891_v6  ;;  %p9329_p0 = scmp.ne.s32.totalorder %s13034_s11, %s9328_s13  ;;  %s9332_s8 = sshll.u32 %s9431_s28, 4  ;;  %s9333_s8 = int_to_ptr.vmem [resolvable:$false] %s9332_s8 }
  0xd5   : > { %8662 = vmatmul.mubr.msk.f32.vlgmr.msra.gmra.mrb[0].mxu0 %vm13162_vm0, %v400_v8  ;;  %s9334_s9 = scalar_lea.vmem %s9333_s8, 2048  ;;  %p9335_p3 = scmp.lt.s32.totalorder %s13034_s11, %s9333_s8 }
  0xd6   : > { %p9330_p4 = pnand %p9329_p0, %p9644_p10  ;;  %p9336_p5 = scmp.lt.s32.totalorder %s9334_s9, %s9328_s13 }
  0xd7   : > { %8669 = vmatmul.mubr.msk.f32.vlgmr.msra.gmra.mrb[0].mxu1 %vm13162_vm0, %v484_v9 }
  0xd8   : > { %p9331_p6 = pneg %p9330_p4  ;;  %p9337_p9 = por %p9336_p5, %p9335_p3 }
  0xda   : > { %p9338_p8 = pnand %p9337_p9, %p9331_p6 }
 0x1a8   : > { %v8663_v10 = vpop.f32.mrb[0].mxu0 }
 0x1a9   : > { %v474_v11 = vpop.f32.mrb[1].mxu0 }
 0x1aa   : > { %v8670_v12 = vpop.f32.mrb[0].mxu1  ;;  %598 = vxpose.xlu0.b32.start [1/2] (short) (narrow) %v474_v11, 64 }
 0x1ab   : > { %v557_v13 = vpop.f32.mrb[1].mxu1 }
 0x1ac   : > { %566 = vxpose.xlu1.b32.start [1/2] (short) (narrow) %v557_v13, 64 }
 0x1ae   : > { %599 = vxpose.xlu0.b32.end [2/2] (short) (narrow) %v8663_v10, 64 }
 0x1b0   : > { %567 = vxpose.xlu1.b32.end [2/2] (short) (narrow) %v8670_v12, 64 }
 0x22a   : > { %v614_v14 = vpop.trf.xlu0 }
 0x22b   : > { %630 = vxpose.xlu0.b32.start.end [1/1] (short) (narrow) %v614_v14, 16 }
 0x22c   : > { %v9768_v15 = vpop.trf.xlu1 }
 0x22d   : > { %13305 = vst [vmem:[#allocation21_spill] sm:$0xff] %v9768_v15  ;;  %8671 = vmatprep.subr.mxu0 %v9768_v15 }
 0x22e   : > { %8672 = vmatpush3.msra.mxu0 %v9768_v15  ;;  %v615_v16 = vpop.trf.xlu0 }
 0x22f   : > { %662 = vxpose.xlu1.b32.start.end [1/1] (short) (narrow) %v615_v16, 16 }
 0x230   : > { %v9772_v17 = vpop.trf.xlu1 }
 0x231   : > { %13306 = vst [vmem:[#allocation22_spill] sm:$0xff] %v9772_v17  ;;  %8676 = vmatprep.subr.mxu1 %v9772_v17 }
 0x232   : > { %8677 = vmatpush3.msra.mxu1 %v9772_v17  ;;  %v616_v18 = vpop.trf.xlu0 }
 0x233   : > { %694 = vxpose.xlu0.b32.start.end [1/1] (short) (narrow) %v616_v18, 16 }
 0x234   : > { %v9776_v19 = vpop.trf.xlu1 }
 0x235   : > { %13307 = vst [vmem:[#allocation23_spill] sm:$0xff] %v9776_v19  ;;  %8681 = vmatprep.subr.mxu0 %v9776_v19 }
 0x236   : > { %v617_v20 = vpop.trf.xlu0 }
 0x237   : > { %726 = vxpose.xlu1.b32.start.end [1/1] (short) (narrow) %v617_v20, 16 }
 0x238   : > { %v9779_v21 = vpop.trf.xlu1 }
 0x239   : > { %13308 = vst [vmem:[#allocation24_spill] sm:$0xff] %v9779_v21  ;;  %8686 = vmatprep.subr.mxu1 %v9779_v21 }
 0x23a   : > { %v618_v22 = vpop.trf.xlu0 }
 0x23b   : > { %758 = vxpose.xlu0.b32.start.end [1/1] (short) (narrow) %v618_v22, 16 }
 0x23c   : > { %v9782_v26 = vpop.trf.xlu1 }
 0x23d   : > { %13309 = vst [vmem:[#allocation25_spill] sm:$0xff] %v9782_v26 }
 0x23e   : > { %v619_v23 = vpop.trf.xlu0 }
 0x23f   : > { %790 = vxpose.xlu1.b32.start.end [1/1] (short) (narrow) %v619_v23, 16 }
 0x240   : > { %v9784_v27 = vpop.trf.xlu1 }
 0x241   : > { %13310 = vst [vmem:[#allocation26_spill] sm:$0xff] %v9784_v27 }
 0x242   : > { %v620_v24 = vpop.trf.xlu0 }
 0x243   : > { %822 = vxpose.xlu0.b32.start.end [1/1] (short) (narrow) %v620_v24, 16 }
 0x244   : > { %v9786_v28 = vpop.trf.xlu1 }
 0x245   : > { %13311 = vst [vmem:[#allocation27_spill] sm:$0xff] %v9786_v28 }
 0x246   : > { %v621_v25 = vpop.trf.xlu0 }
 0x247   : > { %854 = vxpose.xlu1.b32.start.end [1/1] (short) (narrow) %v621_v25, 16 }
 0x248   : > { %v9788_v29 = vpop.trf.xlu1 }
 0x249   : > { %13312 = vst [vmem:[#allocation28_spill] sm:$0xff] %v9788_v29 }
 0x2ab   : > { %v646_v30 = vpop.trf.xlu0 }
 0x2ac   : > { %8673 = vmatprep.mubr.msk.f32.mxu0 %vm886_vm1, %v646_v30 }
 0x2af   : > { %v678_v31 = vpop.trf.xlu1  ;;  %v647_v32 = vpop.trf.xlu0 }
 0x2b0   : > { %8674 = vmatmul.mubr.msk.f32.vlgmr.msra.gmra.mrb[2].mxu0 %vm886_vm1, %v647_v32  ;;  %8678 = vmatprep.mubr.msk.f32.mxu1 %vm886_vm1, %v678_v31 }
 0x2b1   : > { %8682 = vmatpush3.msra.mxu0 %v9776_v19 }
 0x2b2   : > { %8691 = vmatprep.subr.mxu0 %v9782_v26 }
 0x2b3   : > { %v679_v33 = vpop.trf.xlu1  ;;  %v710_v34 = vpop.trf.xlu0 }
 0x2b4   : > { %8679 = vmatmul.mubr.msk.f32.vlgmr.msra.gmra.mrb[2].mxu1 %vm886_vm1, %v679_v33  ;;  %8683 = vmatprep.mubr.msk.f32.mxu0 %vm886_vm1, %v710_v34 }
 0x2b5   : > { %8687 = vmatpush3.msra.mxu1 %v9779_v21 }
 0x2b6   : > { %8696 = vmatprep.subr.mxu1 %v9784_v27 }
 0x2b7   : > { %v742_v35 = vpop.trf.xlu1  ;;  %v711_v36 = vpop.trf.xlu0 }
 0x2b8   : > { %8684 = vmatmul.mubr.msk.f32.vlgmr.msra.gmra.mrb[4].mxu0 %vm886_vm1, %v711_v36  ;;  %8688 = vmatprep.mubr.msk.f32.mxu1 %vm886_vm1, %v742_v35 }
 0x2b9   : > { %8692 = vmatpush3.msra.mxu0 %v9782_v26 }
 0x2ba   : > { %8701 = vmatprep.subr.mxu0 %v9786_v28 }
 0x2bb   : > { %v743_v37 = vpop.trf.xlu1  ;;  %v774_v38 = vpop.trf.xlu0 }
 0x2bc   : > { %8689 = vmatmul.mubr.msk.f32.vlgmr.msra.gmra.mrb[4].mxu1 %vm886_vm1, %v743_v37  ;;  %8693 = vmatprep.mubr.msk.f32.mxu0 %vm886_vm1, %v774_v38 }
 0x2bd   : > { %8697 = vmatpush3.msra.mxu1 %v9784_v27 }
 0x2be   : > { %8706 = vmatprep.subr.mxu1 %v9788_v29 }
 0x2bf   : > { %v806_v39 = vpop.trf.xlu1  ;;  %v775_v40 = vpop.trf.xlu0 }
 0x2c0   : > { %8694 = vmatmul.mubr.msk.f32.vlgmr.msra.gmra.mrb[6].mxu0 %vm886_vm1, %v775_v40  ;;  %8698 = vmatprep.mubr.msk.f32.mxu1 %vm886_vm1, %v806_v39 }
 0x2c1   : > { %8702 = vmatpush3.msra.mxu0 %v9786_v28 }
 0x2c3   : > { %v807_v41 = vpop.trf.xlu1  ;;  %v838_v42 = vpop.trf.xlu0 }
 0x2c4   : > { %8699 = vmatmul.mubr.msk.f32.vlgmr.msra.gmra.mrb[6].mxu1 %vm886_vm1, %v807_v41  ;;  %8703 = vmatprep.mubr.msk.f32.mxu0 %vm886_vm1, %v838_v42 }
 0x2c5   : > { %8707 = vmatpush3.msra.mxu1 %v9788_v29 }
 0x2c7   : > { %v870_v43 = vpop.trf.xlu1  ;;  %v839_v44 = vpop.trf.xlu0 }
 0x2c8   : > { %8704 = vmatmul.mubr.msk.f32.vlgmr.msra.gmra.mrb[8].mxu0 %vm886_vm1, %v839_v44  ;;  %8708 = vmatprep.mubr.msk.f32.mxu1 %vm886_vm1, %v870_v43 }
 0x2cb   : > { %v871_v45 = vpop.trf.xlu1 }
 0x2cc   : > { %8709 = vmatmul.mubr.msk.f32.vlgmr.msra.gmra.mrb[8].mxu1 %vm886_vm1, %v871_v45 }
 0x383   : > { %v8675_v46 = vpop.f32.mrb[2].mxu0 }
 0x384   : > { %1575 = vrot.lane.b32.xlu0 %v8675_v46, %s9420_s30  ;;  %v9817_v47 = vpop.f32.mrb[3].mxu0 }
 0x385   : > { %13313 = vst [vmem:[#allocation29_spill] sm:$0xff] %v9817_v47 }
 0x387   : > { %v8680_v48 = vpop.f32.mrb[2].mxu1 }
 0x388   : > { %v9819_v49 = vpop.f32.mrb[3].mxu1  ;;  %1577 = vrot.lane.b32.xlu1 %v8680_v48, %s9420_s30 }
 0x389   : > { %13314 = vst [vmem:[#allocation30_spill] sm:$0xff] %v9819_v49 }
 0x38b   : > { %v8685_v50 = vpop.f32.mrb[4].mxu0 }
 0x38c   : > { %1579 = vrot.lane.b32.xlu1 %v8685_v50, %s9420_s30  ;;  %v9823_v51 = vpop.f32.mrb[5].mxu0 }
 0x38d   : > { %13315 = vst [vmem:[#allocation31_spill] sm:$0xff] %v9823_v51 }
 0x38f   : > { %v8690_v52 = vpop.f32.mrb[4].mxu1 }
 0x390   : > { %v9825_v53 = vpop.f32.mrb[5].mxu1  ;;  %1581 = vrot.lane.b32.xlu1 %v8690_v52, %s9420_s30 }
 0x391   : > { %13316 = vst [vmem:[#allocation32_spill] sm:$0xff] %v9825_v53 }
 0x393   : > { %v8695_v54 = vpop.f32.mrb[6].mxu0 }
 0x394   : > { %1583 = vrot.lane.b32.xlu1 %v8695_v54, %s9420_s30  ;;  %v9829_v55 = vpop.f32.mrb[7].mxu0 }
 0x395   : > { %13317 = vst [vmem:[#allocation33_spill] sm:$0xff] %v9829_v55 }
 0x397   : > { %v8700_v56 = vpop.f32.mrb[6].mxu1 }
 0x398   : > { %v9831_v57 = vpop.f32.mrb[7].mxu1  ;;  %1585 = vrot.lane.b32.xlu0 %v8700_v56, %s9420_s30 }
 0x399   : > { %13318 = vst [vmem:[#allocation34_spill] sm:$0xff] %v9831_v57 }
 0x39b   : > { %v8705_v58 = vpop.f32.mrb[8].mxu0 }
 0x39c   : > { %1587 = vrot.lane.b32.xlu1 %v8705_v58, %s9420_s30  ;;  %v9835_v59 = vpop.f32.mrb[9].mxu0 }
 0x39d   : > { %13319 = vst [vmem:[#allocation35_spill] sm:$0xff] %v9835_v59 }
 0x39f   : > { %v8710_v60 = vpop.f32.mrb[8].mxu1 }
 0x3a0   : > { %v9837_v61 = vpop.f32.mrb[9].mxu1  ;;  %1589 = vrot.lane.b32.xlu0 %v8710_v60, %s9420_s30  ;;  %1543 = vrot.lane.b32.xlu1 %v8675_v46, %s9421_s29 }
 0x3a1   : > { %13320 = vst [vmem:[#allocation36_spill] sm:$0xff] %v9837_v61 }
 0x3a4   : > { %1545 = vrot.lane.b32.xlu0 %v8680_v48, %s9421_s29  ;;  %1547 = vrot.lane.b32.xlu1 %v8685_v50, %s9421_s29 }
 0x3a8   : > { %1549 = vrot.lane.b32.xlu0 %v8690_v52, %s9421_s29  ;;  %1551 = vrot.lane.b32.xlu1 %v8695_v54, %s9421_s29 }
 0x3ac   : > { %1553 = vrot.lane.b32.xlu0 %v8700_v56, %s9421_s29  ;;  %1555 = vrot.lane.b32.xlu1 %v8705_v58, %s9421_s29 }
 0x3b0   : > { %1557 = vrot.lane.b32.xlu0 %v8710_v60, %s9421_s29 }
 0x3f6   : > { %v1576_v1 = vpop.permute.xlu0 %1575 }
 0x3f7   : > { %v1599_v3 = vadd.f32 %v1576_v1, %v9817_v47  ;;  %v13126_v1 = vmov 920167782   ;;  %v13136_v47 = vmov 2131351028  }
 0x3f9   : > { %v9853_v8 = vmul.f32 2.0, %v1599_v3  ;;  %v13102_v3 = vmov 1326507024  }
 0x3fa   : > { %v1578_v62 = vpop.permute.xlu1 %1577 }
 0x3fb   : > { %v1600_v5 = vadd.f32 %v1578_v62, %v9819_v49  ;;  %v1698_v14 = vand.u32 2139095040, %v9853_v8  ;;  %v13132_v49 = vmov 2475754826  }
 0x3fd   : > { %v9857_v11 = vmul.f32 2.0, %v1600_v5  ;;  %v1699_v25 = vshrl.u32 %v1698_v14, 23 }
 0x3fe   : > { %v1580_v63 = vpop.permute.xlu1 %1579 }
 0x3ff   : > { %v1601_v10 = vadd.f32 %v1580_v63, %v9823_v51  ;;  %v1801_v22 = vand.u32 2139095040, %v9857_v11  ;;  %v8407_v38 = vadd.s32 4294967169, %v1699_v25 }
 0x401   : > { %v9863_v18 = vmul.f32 2.0, %v1601_v10  ;;  %v1802_v34 = vshrl.u32 %v1801_v22, 23  ;;  %v1705_v52 = vadd.s32 1, %v8407_v38 }
 0x402   : > { %v1582_v0 = vpop.permute.xlu1 %1581 }
 0x403   : > { %v1602_v24 = vadd.f32 %v1582_v0, %v9825_v53  ;;  %v1904_v32 = vand.u32 2139095040, %v9863_v18  ;;  %v8411_v43 = vadd.s32 4294967169, %v1802_v34  ;;  %vm1706_vm4 = vcmp.gt.s32.totalorder %v1705_v52, 0 }
 0x404   : > { %v1707_v22 = vsel %vm1706_vm4, %v1705_v52, 0  ;;  %v13134_v53 = vmov 683565275  }
 0x405   : > { %v9872_v35 = vmul.f32 2.0, %v1602_v24  ;;  %v1905_v40 = vshrl.u32 %v1904_v32, 23  ;;  %v1808_v62 = vadd.s32 1, %v8411_v43  ;;  %v13100_v43 = vand.u32 2147483647, %v9857_v11 }
 0x406   : > { %v1584_v2 = vpop.permute.xlu1 %1583 }
 0x407   : > { %v1603_v4 = vadd.f32 %v1584_v2, %v9829_v55  ;;  %v2007_v46 = vand.u32 2139095040, %v9872_v35  ;;  %v8415_v58 = vadd.s32 4294967169, %v1905_v40  ;;  %vm1809_vm6 = vcmp.gt.s32.totalorder %v1808_v62, 0 }
 0x408   : > { %v1810_v32 = vsel %vm1809_vm6, %v1808_v62, 0 }
 0x409   : > { %v9851_v7 = vmul.f32 2.0, %v1603_v4  ;;  %v2008_v0 = vshrl.u32 %v2007_v46, 23  ;;  %v1911_v10 = vadd.s32 1, %v8415_v58  ;;  %v9978_v29 = vshrl.u32 %v1810_v32, 5 }
 0x40a   : > { %v1586_v6 = vpop.permute.xlu0 %1585 }
 0x40b   : > { %13321 = vst [vmem:[#allocation37_spill] sm:$0xff] %v9851_v7  ;;  %v1604_v9 = vadd.f32 %v1586_v6, %v9831_v57  ;;  %v2110_v13 = vand.u32 2139095040, %v9851_v7  ;;  %vm1912_vm7 = vcmp.gt.s32.totalorder %v1911_v10, 0  ;;  %vm1833_vm11 = vcmp.lt.s32.totalorder %v9978_v29, 4 }
 0x40c   : > { %v1913_v46 = vsel %vm1912_vm7, %v1911_v10, 0  ;;  %vm1832_vm4 = vcmp.lt.s32.totalorder %v9978_v29, 3  ;;  %vm1831_vm6 = vcmp.lt.s32.totalorder %v9978_v29, 2 }
 0x40d   : > { %v9861_v16 = vmul.f32 2.0, %v1604_v9  ;;  %v2111_v23 = vshrl.u32 %v2110_v13, 23  ;;  %v9945_v62 = vand.u32 31, %v1913_v46 }
 0x40e   : > { %v1588_v12 = vpop.permute.xlu1 %1587 }
 0x40f   : > { %13322 = vst [vmem:[#allocation38_spill] sm:$0xff] %v9861_v16  ;;  %v1605_v20 = vadd.f32 %v1588_v12, %v9835_v59  ;;  %v8423_v30 = vadd.s32 4294967169, %v2111_v23  ;;  %v2213_v31 = vand.u32 2139095040, %v9861_v16  ;;  %v8419_v23 = vadd.s32 4294967169, %v2008_v0 }
 0x410   : > { %v9964_v52 = vsub.s32 32, %v9945_v62  ;;  %v13116_v12 = vmov 2102212464   ;;  %v1930_v55 = vshll.u32 %v13126_v1, %v9945_v62 }
 0x411   : > { %v9870_v33 = vmul.f32 2.0, %v1605_v20  ;;  %v2117_v36 = vadd.s32 1, %v8423_v30  ;;  %v2214_v37 = vshrl.u32 %v2213_v31, 23  ;;  %v13101_v20 = vand.u32 2147483647, %v9853_v8 }
 0x412   : > { %v1590_v42 = vpop.permute.xlu0 %1589  ;;  %v2014_v40 = vadd.s32 1, %v8419_v23  ;;  %v1928_v21 = vshrl.u32 %v13126_v1, %v9964_v52 }
 0x413   : > { %13323 = vst [vmem:[#allocation39_spill] sm:$0xff] %v9870_v33  ;;  %v2316_v39 = vand.u32 2139095040, %v9870_v33  ;;  %vm2118_vm2 = vcmp.gt.s32.totalorder %v2117_v36, 0  ;;  %v8427_v41 = vadd.s32 4294967169, %v2214_v37  ;;  %v1606_v56 = vadd.f32 %v1590_v42, %v9837_v61 }
 0x414   : > { %v9875_v44 = vsel %vm2118_vm2, %v2117_v36, 0  ;;  %v9923_v36 = vand.u32 31, %v1707_v22  ;;  %vm2015_vm8 = vcmp.gt.s32.totalorder %v2014_v40, 0 }
 0x415   : > { %v2317_v45 = vshrl.u32 %v2316_v39, 23  ;;  %v9879_v48 = vand.u32 31, %v9875_v44  ;;  %v2220_v50 = vadd.s32 1, %v8427_v41  ;;  %v9898_v9 = vmul.f32 2.0, %v1606_v56 }
 0x416   : > { %v1702_v39 = vand.u32 8388607, %v13101_v20  ;;  %v1712_v51 = vshll.u32 %v13134_v53, %v9923_v36 }
 0x417   : > { %v8431_v54 = vadd.s32 4294967169, %v2317_v45  ;;  %v9883_v60 = vsub.s32 32, %v9879_v48  ;;  %vm2221_vm3 = vcmp.gt.s32.totalorder %v2220_v50, 0  ;;  %v9887_v2 = vshll.u32 %v13126_v1, %v9879_v48  ;;  %13324 = vst [vmem:[#allocation40_spill] sm:$0xff] %v9898_v9 }
 0x418   : > { %v9893_v5 = vsel %vm2221_vm3, %v2220_v50, 0  ;;  %v2419_v31 = vand.u32 2139095040, %v9898_v9  ;;  %v9938_v45 = vand.u32 31, %v1810_v32  ;;  %v1703_v58 = vor.u32 8388608, %v1702_v39 }
 0x419   : > { %v2323_v63 = vadd.s32 1, %v8431_v54  ;;  %v9891_v4 = vshrl.u32 %v13102_v3, %v9883_v60  ;;  %v9896_v6 = vand.u32 31, %v9893_v5  ;;  %v9943_v54 = vsub.s32 32, %v9923_v36 }
 0x41a   : > { %v2420_v38 = vshrl.u32 %v2419_v31, 23  ;;  %v9950_v0 = vsub.s32 32, %v9938_v45  ;;  %v2016_v31 = vsel %vm2015_vm8, %v2014_v40, 0  ;;  %v9959_v39 = vshll.u32 %v1703_v58, 8 }
 0x41b   : > { %vm2324_vm5 = vcmp.gt.s32.totalorder %v2323_v63, 0  ;;  %v9905_v14 = vsub.s32 32, %v9896_v6  ;;  %v9913_v25 = vshll.u32 %v13126_v1, %v9896_v6  ;;  %v1722_v23 = vshrl.u32 %v13126_v1, %v9943_v54 }
 0x41c   : > { %v9902_v13 = vsel %vm2324_vm5, %v2323_v63, 0  ;;  %v8435_v50 = vadd.s32 4294967169, %v2420_v38  ;;  %v1805_v63 = vand.u32 8388607, %v13100_v43  ;;  %v1721_v40 = vshll.u32 %v13116_v12, %v9923_v36 }
 0x41d   : > { %v9909_v24 = vand.u32 31, %v9902_v13  ;;  %v9917_v30 = vshrl.u32 %v13102_v3, %v9905_v14  ;;  %v1825_v20 = vshrl.u32 %v13126_v1, %v9950_v0  ;;  %v1824_v27 = vshll.u32 %v13116_v12, %v9938_v45 }
 0x41e   : > { %v2426_v56 = vadd.s32 1, %v8435_v50  ;;  %v1725_v50 = vshrl.u32 %v13102_v3, %v9943_v54  ;;  %v1806_v37 = vor.u32 8388608, %v1805_v63  ;;  %v13331_v63 = vmov 1326507024  }
 0x41f   : > { %13325 = vst [vmem:[#allocation41_spill] sm:$0xff] %v9909_v24  ;;  %v9921_v34 = vsub.s32 32, %v9909_v24  ;;  %v9931_v41 = vshll.u32 %v13126_v1, %v9909_v24  ;;  %v1828_v43 = vshrl.u32 %v13331_v63, %v9950_v0  ;;  %v1723_v28 = vor.u32 %v1722_v23, %v1721_v40 }
 0x420   : > { %vm2427_vm9 = vcmp.gt.s32.totalorder %v2426_v56, 0  ;;  %v1827_v32 = vshll.u32 %v13126_v1, %v9938_v45  ;;  %v1931_v23 = vshrl.u32 %v13331_v63, %v9964_v52  ;;  %v10001_v40 = vor.u32 %v1825_v20, %v1824_v27 }
 0x421   : > { %13326 = vst [vmem:[#allocation42_spill] sm:$0xff] %v9931_v41  ;;  %v9935_v42 = vshrl.u32 %v13102_v3, %v9921_v34  ;;  %v9952_v10 = vsel %vm2427_vm9, %v2426_v56, 0  ;;  %v9967_v56 = vshrl.u32 %v1707_v22, 5  ;;  %v1724_v3 = vshll.u32 %v13126_v1, %v9923_v36 }
 0x422   : > { %13328 = vst [vmem:[#allocation44_spill] sm:$0xff] %v9952_v10  ;;  %v9957_v38 = vand.u32 31, %v9952_v10  ;;  %v9982_v22 = vand.u32 31, %v2016_v31  ;;  %v10003_v12 = vshrl.u32 %v1913_v46, 5  ;;  %v1829_v19 = vor.u32 %v1828_v43, %v1827_v32 }
 0x423   : > { %13327 = vst [vmem:[#allocation43_spill] sm:$0xff] %v9935_v42  ;;  %v1726_v59 = vor.u32 %v1725_v50, %v1724_v3  ;;  %vm1730_vm10 = vcmp.lt.s32.totalorder %v9967_v56, 4  ;;  %v13334_v3 = vmov 2102212464   ;;  %v10017_v27 = vshll.u32 %v1806_v37, 8 }
 0x424   : > { %13329 = vst [vmem:[#allocation45_spill] sm:$0xff] %v9957_v38  ;;  %v9974_v58 = vsub.s32 32, %v9957_v38  ;;  %v9988_v26 = vshll.u32 %v13126_v1, %v9957_v38  ;;  %v1927_v50 = vshll.u32 %v13334_v3, %v9945_v62  ;;  %v10012_v17 = vsub.s32 32, %v9982_v22 }
 0x425   : > { %v1736_v15 = vsel %vm1730_vm10, %v1723_v28, 920167782  ;;  %v13335_v20 = vand.u32 2147483647, %v9863_v18  ;;  %v1740_v43 = vsel %vm1730_vm10, %v1726_v59, 1326507024  ;;  %v1932_v57 = vor.u32 %v1931_v23, %v1930_v55 }
 0x426   : > { %13330 = vst [vmem:[#allocation46_spill] sm:$0xff] %v9974_v58  ;;  %13332 = vst [vmem:[#allocation47_spill] sm:$0xff] %v9988_v26  ;;  %v9992_v61 = vshrl.u32 %v13331_v63, %v9974_v58  ;;  %v10025_v32 = vor.u32 %v1928_v21, %v1927_v50  ;;  %v10027_v1 = vshrl.u32 %v2016_v31, 5  ;;  %v1713_v37 = vshrl.u32 %v13132_v49, %v9943_v54 }
 0x427   : > { %v10021_v46 = vand.u32 8388607, %v13335_v20  ;;  %v1715_v20 = vshll.u32 %v13132_v49, %v9923_v36  ;;  %v1716_v59 = vshrl.u32 %v13136_v47, %v9943_v54  ;;  %v1839_v21 = vsel %vm1833_vm11, %v10001_v40, 920167782 }
 0x428   : > { %13333 = vst [vmem:[#allocation48_spill] sm:$0xff] %v9992_v61  ;;  %v1843_v55 = vsel %vm1833_vm11, %v1829_v19, 1326507024  ;;  %vm1936_vm12 = vcmp.lt.s32.totalorder %v10003_v12, 4  ;;  %v13336_v31 = vmov 920167782   ;;  %v2030_v50 = vshll.u32 %v13334_v3, %v9982_v22 }
 0x429   : > { %v2031_v23 = vshrl.u32 %v13336_v31, %v10012_v17  ;;  %v2034_v49 = vshrl.u32 %v13331_v63, %v10012_v17  ;;  %v1714_v53 = vor.u32 %v1713_v37, %v1712_v51  ;;  %v1717_v47 = vor.u32 %v1716_v59, %v1715_v20 }
 0x42a   : > { %v2033_v9 = vshll.u32 %v13336_v31, %v9982_v22  ;;  %vm2039_vm13 = vcmp.lt.s32.totalorder %v10027_v1, 4  ;;  %v13337_v19 = vmov 2131351028   ;;  %v1719_v61 = vshrl.u32 %v13334_v3, %v9943_v54 }
 0x42b   : > { %v1718_v26 = vshll.u32 %v13337_v19, %v9923_v36  ;;  %v10059_v33 = vsel %vm1936_vm12, %v10025_v32, 920167782  ;;  %v10063_v51 = vsel %vm1936_vm12, %v1932_v57, 1326507024  ;;  %v13338_v63 = vmov 683565275  }
 0x42c   : > { %v1711_v37 = vshrl.u32 %v13338_v63, %v9943_v54  ;;  %vm1727_vm14 = vcmp.lt.s32.totalorder %v9967_v56, 1  ;;  %v10068_v20 = vor.u32 %v2031_v23, %v2030_v50  ;;  %vm1729_vm15 = vcmp.lt.s32.totalorder %v9967_v56, 3 }
 0x42d   : > { %v1720_v36 = vor.u32 %v1719_v61, %v1718_v26  ;;  %v1735_v59 = vsel %vm1727_vm14, %v1714_v53, %v1717_v47  ;;  %v2035_v38 = vor.u32 %v2034_v49, %v2033_v9  ;;  %v10072_v58 = vshrl.u32 %v9875_v44, 5 }
 0x42e   : > { %v1731_v10 = vsel %vm1727_vm14, %v1711_v37, %v1714_v53  ;;  %v1741_v41 = vsel %vm1729_vm15, %v1723_v28, %v1740_v43  ;;  %vm1728_vm2 = vcmp.lt.s32.totalorder %v9967_v56, 2  ;;  %v13339_v26 = vmov 2475754826  }
 0x42f   : > { %v1732_v57 = vsel %vm1730_vm10, %v1720_v36, 2102212464  ;;  %v1737_v54 = vsel %vm1729_vm15, %v1720_v36, %v1736_v15  ;;  %v1739_v42 = vsel %vm1727_vm14, %v1717_v47, %v1720_v36  ;;  %v1816_v61 = vshrl.u32 %v13339_v26, %v9950_v0 }
 0x430   : > { %v1733_v16 = vsel %vm1729_vm15, %v1717_v47, %v1732_v57  ;;  %v1738_v23 = vsel %vm1728_vm2, %v1735_v59, %v1737_v54  ;;  %v1742_v50 = vsel %vm1728_vm2, %v1739_v42, %v1741_v41  ;;  %v1815_v28 = vshll.u32 %v13338_v63, %v9938_v45 }
 0x431   : > { %v1734_v7 = vsel %vm1728_vm2, %v1731_v10, %v1733_v16  ;;  %v10080_v49 = vmul.u32.u64.low %v9959_v39, %v1742_v50  ;;  %v10081_v44 = vmul.u32.u64.high %v9959_v39, %v1742_v50, %v10080_v49  ;;  %v10088_v53 = vsel %vm2039_vm13, %v10068_v20, 920167782 }
 0x432   : > { %v10091_v15 = vmul.u32.u64.low %v9959_v39, %v1738_v23  ;;  %v10092_v47 = vmul.u32.u64.high %v9959_v39, %v1738_v23, %v10091_v15  ;;  %v1818_v16 = vshll.u32 %v13339_v26, %v9938_v45  ;;  %v1817_v9 = vor.u32 %v1816_v61, %v1815_v28 }
 0x433   : > { %v1819_v41 = vshrl.u32 %v13337_v19, %v9950_v0  ;;  %v1821_v42 = vshll.u32 %v13337_v19, %v9938_v45  ;;  %v1822_v10 = vshrl.u32 %v13334_v3, %v9950_v0  ;;  %v10105_v56 = vsel %vm2039_vm13, %v2035_v38, 1326507024 }
 0x434   : > { %v2133_v43 = vshll.u32 %v13334_v3, %v9879_v48  ;;  %v1750_v37 = vmul.u32 %v9959_v39, %v1734_v7  ;;  %v1814_v36 = vshrl.u32 %v13338_v63, %v9950_v0  ;;  %vm1752_vm3 = vc.u32 %v10081_v44, %v10091_v15 }
 0x435   : > { %v1820_v59 = vor.u32 %v1819_v41, %v1818_v16  ;;  %v1823_v45 = vor.u32 %v1822_v10, %v1821_v42  ;;  %v1753_v57 = vadd.s32 1, %v10092_v47  ;;  %vm1830_vm5 = vcmp.lt.s32.totalorder %v9978_v29, 1 }
 0x436   : > { %v1844_v38 = vsel %vm1832_vm4, %v10001_v40, %v1843_v55  ;;  %v1834_v50 = vsel %vm1830_vm5, %v1814_v36, %v1817_v9  ;;  %vm2142_vm7 = vcmp.lt.s32.totalorder %v10072_v58, 4  ;;  %v1919_v41 = vshrl.u32 %v13339_v26, %v9964_v52 }
 0x437   : > { %v1835_v7 = vsel %vm1833_vm11, %v1823_v45, 2102212464  ;;  %v1838_v39 = vsel %vm1830_vm5, %v1817_v9, %v1820_v59  ;;  %v1840_v0 = vsel %vm1832_vm4, %v1823_v45, %v1839_v21  ;;  %v1842_v54 = vsel %vm1830_vm5, %v1820_v59, %v1823_v45 }
 0x438   : > { %v1754_v23 = vsel %vm1752_vm3, %v1753_v57, %v10092_v47  ;;  %v1841_v61 = vsel %vm1831_vm6, %v1838_v39, %v1840_v0  ;;  %v1845_v49 = vsel %vm1831_vm6, %v1842_v54, %v1844_v38  ;;  %v1836_v16 = vsel %vm1832_vm4, %v1820_v59, %v1835_v7 }
 0x439   : > { %v1755_v28 = vadd.s32 %v1754_v23, %v1750_v37  ;;  %v10128_v40 = vmul.u32.u64.low %v10017_v27, %v1845_v49  ;;  %v10129_v55 = vmul.u32.u64.high %v10017_v27, %v1845_v49, %v10128_v40  ;;  %v2134_v21 = vshrl.u32 %v13336_v31, %v9883_v60 }
 0x43a   : > { %v10134_v47 = vmul.u32.u64.low %v10017_v27, %v1841_v61  ;;  %v10135_v9 = vmul.u32.u64.high %v10017_v27, %v1841_v61, %v10134_v47  ;;  %v1918_v10 = vshll.u32 %v13338_v63, %v9945_v62  ;;  %v1921_v37 = vshll.u32 %v13339_v26, %v9945_v62 }
 0x43b   : > { %v1756_v42 = vadd.s32 536870912, %v1755_v28  ;;  %v1922_v36 = vshrl.u32 %v13337_v19, %v9964_v52  ;;  %vm1697_vm8 = vcmp.lt.s32.totalorder %v9853_v8, 0  ;;  %v10148_v59 = vshrl.u32 %v9893_v5, 5 }
 0x43c   : > { %v1837_v45 = vsel %vm1831_vm6, %v1834_v50, %v1836_v16  ;;  %v1924_v57 = vshll.u32 %v13337_v19, %v9945_v62  ;;  %v1925_v38 = vshrl.u32 %v13334_v3, %v9964_v52  ;;  %vm1855_vm9 = vc.u32 %v10129_v55, %v10134_v47 }
 0x43d   : > { %v1757_v7 = vshrl.u32 %v1756_v42, 30  ;;  %v1920_v39 = vor.u32 %v1919_v41, %v1918_v10  ;;  %v1923_v0 = vor.u32 %v1922_v36, %v1921_v37  ;;  %v10158_v54 = vor.u32 %v2134_v21, %v2133_v43 }
 0x43e   : > { %v1856_v5 = vadd.s32 1, %v10135_v9  ;;  %v1909_v23 = vor.u32 8388608, %v10021_v46  ;;  %v1926_v29 = vor.u32 %v1925_v38, %v1924_v57  ;;  %v13340_v50 = vand.u32 2147483647, %v9853_v8 }
 0x43f   : > { %v1758_v61 = vshll.u32 %v1757_v7, 30  ;;  %v1853_v49 = vmul.u32 %v10017_v27, %v1837_v45  ;;  %vm1933_vm11 = vcmp.lt.s32.totalorder %v10003_v12, 1  ;;  %vm1935_vm14 = vcmp.lt.s32.totalorder %v10003_v12, 3 }
 0x440   : > { %vm10164_vm10 = vcmp.le.f32.partialorder %v13340_v50, 0.7853982  ;;  %v1781_v43 = vsub.s32 4, %v1757_v7  ;;  %v1857_v16 = vsel %vm1855_vm9, %v1856_v5, %v10135_v9  ;;  %v1945_v46 = vsel %vm1933_vm11, %v1923_v0, %v1926_v29 }
 0x441   : > { %v1947_v40 = vsel %vm1935_vm14, %v10025_v32, %v10063_v51  ;;  %v10178_v21 = vsub.s32 %v1755_v28, %v1758_v61  ;;  %v1858_v41 = vadd.s32 %v1857_v16, %v1853_v49  ;;  %v1941_v27 = vsel %vm1933_vm11, %v1920_v39, %v1923_v0 }
 0x442   : > { %v1943_v42 = vsel %vm1935_vm14, %v1926_v29, %v10059_v33  ;;  %v10188_v9 = vsel %vm2142_vm7, %v10158_v54, 920167782  ;;  %v2236_v10 = vshll.u32 %v13334_v3, %v9896_v6  ;;  %v1917_v32 = vshrl.u32 %v13338_v63, %v9964_v52 }
 0x443   : > { %vm1934_vm15 = vcmp.lt.s32.totalorder %v10003_v12, 2  ;;  %v1761_v51 = vsub.s32 0, %v10178_v21  ;;  %v1859_v28 = vadd.s32 536870912, %v1858_v41  ;;  %v1938_v37 = vsel %vm1936_vm12, %v1926_v29, 2102212464 }
 0x444   : > { %v1948_v33 = vsel %vm1934_vm15, %v1945_v46, %v1947_v40  ;;  %v13343_v36 = vor.u32 %v9891_v4, %v9887_v2  ;;  %v2237_v52 = vshrl.u32 %v13336_v31, %v9905_v14  ;;  %v1944_v57 = vsel %vm1934_vm15, %v1941_v27, %v1943_v42 }
 0x445   : > { %v1949_v38 = vshll.u32 %v1909_v23, 8  ;;  %v2340_v5 = vshrl.u32 %v13336_v31, %v9921_v34  ;;  %v8408_v29 = vmin.u32 %v1761_v51, %v10178_v21  ;;  %v1782_v50 = vsel %vm1697_vm8, %v1781_v43, %v1757_v7 }
 0x446   : > { %v10205_v45 = vsel %vm2142_vm7, %v13343_v36, 1326507024  ;;  %v1937_v2 = vsel %vm1933_vm11, %v1917_v32, %v1920_v39  ;;  %v1860_v4 = vshrl.u32 %v1859_v28, 30  ;;  %v1939_v61 = vsel %vm1935_vm14, %v1923_v0, %v1938_v37 }
 0x447   : > { %v10220_v49 = vmul.u32.u64.low %v1949_v38, %v1948_v33  ;;  %v10221_v16 = vmul.u32.u64.high %v1949_v38, %v1948_v33, %v10220_v49  ;;  %vm1800_vm12 = vcmp.lt.s32.totalorder %v9857_v11, 0  ;;  %v2339_v23 = vshll.u32 %v13334_v3, %v9909_v24 }
 0x448   : > { %v1763_v46 = vclz %v8408_v29  ;;  %v10226_v40 = vmul.u32.u64.low %v1949_v38, %v1944_v57  ;;  %v10227_v27 = vmul.u32.u64.high %v1949_v38, %v1944_v57, %v10226_v40  ;;  %v10230_v7 = vor.u32 %v2237_v52, %v2236_v10 }
 0x449   : > { %v10233_v39 = vshrl.u32 %v9902_v13, 5  ;;  %v10237_v0 = vsel %vm10164_vm10, 0, %v1782_v50  ;;  %v1861_v43 = vshll.u32 %v1860_v4, 30  ;;  %v10239_v42 = vor.u32 %v2340_v5, %v2339_v23 }
 0x44a   : > { %13344 = vst [vmem:[#allocation49_spill] sm:$0xff] %v10237_v0  ;;  %v8409_v32 = vadd.s32 4294967294, %v1763_v46  ;;  %v1940_v51 = vsel %vm1934_vm15, %v1937_v2, %v1939_v61  ;;  %v13155_v28 = vand.u32 2147483647, %v9872_v35  ;;  %v1751_v10 = vadd.s32 %v10091_v15, %v10081_v44 }
 0x44b   : > { %v13345_v37 = vand.u32 2147483647, %v9857_v11  ;;  %v1854_v33 = vadd.s32 %v10134_v47, %v10129_v55  ;;  %v10254_v36 = vsub.s32 %v1858_v41, %v1861_v43  ;;  %vm1958_vm3 = vc.u32 %v10221_v16, %v10226_v40 }
 0x44c   : > { %vm8410_vm4 = vcmp.lt.s32.totalorder %v8409_v32, 0  ;;  %v10259_v12 = vand.u32 3, %v10237_v0  ;;  %v1959_v44 = vadd.s32 1, %v10227_v27  ;;  %v2021_v15 = vshll.u32 %v13338_v63, %v9982_v22 }
 0x44d   : > { %vm10248_vm2 = vcmp.le.f32.partialorder %v13345_v37, 0.7853982  ;;  %v1766_v52 = vsel %vm8410_vm4, 0, %v8409_v32  ;;  %v1864_v57 = vsub.s32 0, %v10254_v36  ;;  %v1884_v5 = vsub.s32 4, %v1860_v4 }
 0x44e   : > { %v1956_v29 = vmul.u32 %v1949_v38, %v1940_v51  ;;  %v1767_v55 = vsub.s32 32, %v1766_v52  ;;  %v1771_v47 = vsub.s32 4294967266, %v1766_v52  ;;  %v1960_v41 = vsel %vm1958_vm3, %v1959_v44, %v10227_v27 }
 0x44f   : > { %v2011_v50 = vand.u32 8388607, %v13155_v28  ;;  %v8412_v2 = vmin.u32 %v1864_v57, %v10254_v36  ;;  %v2022_v61 = vshrl.u32 %v13339_v26, %v10012_v17  ;;  %v2024_v49 = vshll.u32 %v13339_v26, %v9982_v22 }
 0x450   : > { %v2025_v23 = vshrl.u32 %v13337_v19, %v10012_v17  ;;  %v1768_v38 = vshll.u32 %v10178_v21, %v1766_v52  ;;  %v1769_v46 = vshrl.u32 %v1751_v10, %v1767_v55  ;;  %v1772_v43 = vadd.s32 127, %v1771_v47 }
 0x451   : > { %v1961_v32 = vadd.s32 %v1960_v41, %v1956_v29  ;;  %v1866_v27 = vclz %v8412_v2  ;;  %v1885_v51 = vsel %vm1800_vm12, %v1884_v5, %v1860_v4  ;;  %v2027_v37 = vshll.u32 %v13337_v19, %v9982_v22 }
 0x452   : > { %v2028_v44 = vshrl.u32 %v13334_v3, %v10012_v17  ;;  %v1770_v57 = vor.u32 %v1769_v46, %v1768_v38  ;;  %v1773_v28 = vshll.u32 %v1772_v43, 23  ;;  %v2020_v24 = vshrl.u32 %v13338_v63, %v10012_v17 }
 0x453   : > { %v1962_v0 = vadd.s32 536870912, %v1961_v32  ;;  %v8413_v21 = vadd.s32 4294967294, %v1866_v27  ;;  %v2023_v10 = vor.u32 %v2022_v61, %v2021_v15  ;;  %v2026_v52 = vor.u32 %v2025_v23, %v2024_v49 }
 0x454   : > { %v2029_v29 = vor.u32 %v2028_v44, %v2027_v37  ;;  %v1774_v55 = vor.u32 4788187, %v1773_v28  ;;  %v10286_v4 = vsel %vm10248_vm2, 0, %v1885_v51  ;;  %v2012_v22 = vor.u32 8388608, %v2011_v50 }
 0x455   : > { %v1963_v5 = vshrl.u32 %v1962_v0, 30  ;;  %vm8414_vm5 = vcmp.lt.s32.totalorder %v8413_v21, 0  ;;  %vm2036_vm6 = vcmp.lt.s32.totalorder %v10027_v1, 1  ;;  %vm2037_vm9 = vcmp.lt.s32.totalorder %v10027_v1, 2 }
 0x456   : > { %vm2038_vm11 = vcmp.lt.s32.totalorder %v10027_v1, 3  ;;  %v1775_v47 = vand.u32 2147483647, %v1774_v55  ;;  %v1777_v17 = vcvt.s32.f32 %v1770_v57  ;;  %v1869_v41 = vsel %vm8414_vm5, 0, %v8413_v21 }
 0x457   : > { %v1964_v15 = vshll.u32 %v1963_v5, 30  ;;  %vm2245_vm14 = vcmp.lt.s32.totalorder %v10148_v59, 4  ;;  %v1870_v28 = vsub.s32 32, %v1869_v41  ;;  %v1874_v2 = vsub.s32 4294967266, %v1869_v41 }
 0x458   : > { %v2041_v61 = vsel %vm2039_vm13, %v2029_v29, 2102212464  ;;  %v2044_v0 = vsel %vm2036_vm6, %v2023_v10, %v2026_v52  ;;  %v1778_v50 = vmul.f32 %v1777_v17, %v1775_v47  ;;  %v2048_v23 = vsel %vm2036_vm6, %v2026_v52, %v2029_v29 }
 0x459   : > { %v10296_v49 = vsub.s32 %v1961_v32, %v1964_v15  ;;  %v2050_v38 = vsel %vm2038_vm11, %v10068_v20, %v10105_v56  ;;  %vm1903_vm15 = vcmp.lt.s32.totalorder %v9863_v18, 0  ;;  %v1871_v46 = vshll.u32 %v10254_v36, %v1869_v41 }
 0x45a   : > { %v1872_v43 = vshrl.u32 %v1854_v33, %v1870_v28  ;;  %v1875_v27 = vadd.s32 127, %v1874_v2  ;;  %v2046_v51 = vsel %vm2038_vm11, %v2029_v29, %v10088_v53  ;;  %v1779_v32 = vxor.u32 2147483648, %v1778_v50 }
 0x45b   : > { %v1967_v37 = vsub.s32 0, %v10296_v49  ;;  %v2040_v44 = vsel %vm2036_vm6, %v2020_v24, %v2023_v10  ;;  %v2042_v57 = vsel %vm2038_vm11, %v2026_v52, %v2041_v61  ;;  %v1987_v21 = vsub.s32 4, %v1963_v5 }
 0x45c   : > { %v1873_v20 = vor.u32 %v1872_v43, %v1871_v46  ;;  %v1876_v56 = vshll.u32 %v1875_v27, 23  ;;  %v2051_v33 = vsel %vm2037_vm9, %v2048_v23, %v2050_v38  ;;  %v1780_v36 = vsel %vm1697_vm8, %v1779_v32, %v1778_v50  ;;  %v13349_v32 = vld [vmem:[#allocation37_spill] sm:$0xff] }
 0x45d   : > { %v8416_v53 = vmin.u32 %v1967_v37, %v10296_v49  ;;  %v2047_v29 = vsel %vm2037_vm9, %v2044_v0, %v2046_v51  ;;  %v2052_v55 = vshll.u32 %v2012_v22, 8  ;;  %v1783_v24 = vsel %vm10164_vm10, %v9853_v8, %v1780_v36 }
 0x45e   : > { %v1877_v10 = vor.u32 4788187, %v1876_v56  ;;  %v1880_v52 = vcvt.s32.f32 %v1873_v20  ;;  %v2043_v47 = vsel %vm2037_vm9, %v2040_v44, %v2042_v57  ;;  %9055 = vcosq.f32 %v1783_v24 }
 0x45f   : > { %v1969_v17 = vclz %v8416_v53  ;;  %v10326_v41 = vmul.u32.u64.low %v2052_v55, %v2051_v33  ;;  %v10327_v15 = vmul.u32.u64.high %v2052_v55, %v2051_v33, %v10326_v41  ;;  %9057 = vsinq.f32 %v1783_v24 }
 0x460   : > { %v1878_v28 = vand.u32 2147483647, %v1877_v10  ;;  %v10329_v2 = vmul.u32.u64.low %v2052_v55, %v2047_v29  ;;  %v10330_v61 = vmul.u32.u64.high %v2052_v55, %v2047_v29, %v10329_v2  ;;  %v10336_v62 = vsel %vm2245_vm14, %v10230_v7, 920167782 }
 0x461   : > { %v13348_v1 = vor.u32 %v9917_v30, %v9913_v25  ;;  %vm2348_vm13 = vcmp.lt.s32.totalorder %v10233_v39, 4  ;;  %v8417_v0 = vadd.s32 4294967294, %v1969_v17  ;;  %v10352_v38 = vand.u32 3, %v10286_v4 }
 0x462   : > { %v10349_v50 = vsel %vm2348_vm13, %v10239_v42, 920167782  ;;  %v1881_v23 = vmul.f32 %v1880_v52, %v1878_v28  ;;  %v1957_v46 = vadd.s32 %v10226_v40, %v10221_v16  ;;  %vm1793_vm8 = vcmp.eq.s32.totalorder %v10259_v12, 2 }
 0x463   : > { %v10343_v22 = vsel %vm2245_vm14, %v13348_v1, 1326507024  ;;  %vm8418_vm10 = vcmp.lt.s32.totalorder %v8417_v0, 0  ;;  %v1988_v25 = vsel %vm1903_vm15, %v1987_v21, %v1963_v5  ;;  %v2059_v30 = vmul.u32 %v2052_v55, %v2043_v47 }
 0x464   : > { %vm2061_vm3 = vc.u32 %v10327_v15, %v10329_v2  ;;  %vm1790_vm4 = vcmp.eq.s32.totalorder %v10259_v12, 0  ;;  %v1882_v43 = vxor.u32 2147483648, %v1881_v23  ;;  %v1972_v27 = vsel %vm8418_vm10, 0, %v8417_v0 }
 0x465   : > { %v2062_v51 = vadd.s32 1, %v10330_v61  ;;  %v2107_v37 = vand.u32 2147483647, %v13349_v32  ;;  %vm1789_vm5 = vcmp.lt.s32.totalorder %v10259_v12, 2  ;;  %v13350_v16 = vand.u32 2147483647, %v9863_v18 }
 0x466   : > { %v1973_v5 = vsub.s32 32, %v1972_v27  ;;  %v1977_v44 = vsub.s32 4294967266, %v1972_v27  ;;  %v2124_v57 = vshll.u32 %v13338_v63, %v9879_v48  ;;  %v2125_v20 = vshrl.u32 %v13339_v26, %v9883_v60 }
 0x467   : > { %vm10367_vm6 = vcmp.le.f32.partialorder %v13350_v16, 0.7853982  ;;  %vm1787_vm9 = vweird.f32 %v9853_v8  ;;  %v1883_v56 = vsel %vm1800_vm12, %v1882_v43, %v1881_v23  ;;  %v1974_v21 = vshll.u32 %v10296_v49, %v1972_v27 }
 0x468   : > { %v2063_v33 = vsel %vm2061_vm3, %v2062_v51, %v10330_v61  ;;  %v2128_v36 = vshrl.u32 %v13337_v19, %v9883_v60  ;;  %v1886_v53 = vsel %vm10248_vm2, %v9857_v11, %v1883_v56  ;;  %v1975_v29 = vshrl.u32 %v1957_v46, %v1973_v5  ;;  %v10391_v47 = vpop.eup %9055 }
 0x469   : > { %v1978_v55 = vadd.s32 127, %v1977_v44  ;;  %v2064_v24 = vadd.s32 %v2063_v33, %v2059_v30  ;;  %9059 = vcosq.f32 %v1886_v53  ;;  %v2127_v10 = vshll.u32 %v13339_v26, %v9879_v48  ;;  %v10393_v28 = vpop.eup %9057 }
 0x46a   : > { %v2130_v52 = vshll.u32 %v13337_v19, %v9879_v48  ;;  %v2131_v49 = vshrl.u32 %v13334_v3, %v9883_v60  ;;  %9061 = vsinq.f32 %v1886_v53  ;;  %v1976_v17 = vor.u32 %v1975_v29, %v1974_v21 }
 0x46b   : > { %v1979_v41 = vshll.u32 %v1978_v55, 23  ;;  %v2065_v13 = vadd.s32 536870912, %v2064_v24  ;;  %v1794_v61 = vxor.u32 2147483648, %v10391_v47  ;;  %v2123_v1 = vshrl.u32 %v13338_v63, %v9883_v60 }
 0x46c   : > { %v2126_v0 = vor.u32 %v2125_v20, %v2124_v57  ;;  %v2132_v23 = vor.u32 %v2131_v49, %v2130_v52  ;;  %v1791_v48 = vxor.u32 2147483648, %v10393_v28  ;;  %v2129_v43 = vor.u32 %v2128_v36, %v2127_v10 }
 0x46d   : > { %v1980_v46 = vor.u32 4788187, %v1979_v41  ;;  %v10399_v30 = vshrl.u32 %v2065_v13, 30  ;;  %v1795_v27 = vsel %vm1793_vm8, %v1794_v61, %v10393_v28  ;;  %v2114_v51 = vand.u32 8388607, %v2107_v37 }
 0x46e   : > { %vm2139_vm12 = vcmp.lt.s32.totalorder %v10072_v58, 1  ;;  %v2144_v60 = vsel %vm2142_vm7, %v2132_v23, 2102212464  ;;  %v1792_v16 = vsel %vm1790_vm4, %v10391_v47, %v1791_v48  ;;  %v1983_v44 = vcvt.s32.f32 %v1976_v17 }
 0x46f   : > { %v1981_v5 = vand.u32 2147483647, %v1980_v46  ;;  %v2067_v57 = vshll.u32 %v10399_v30, 30  ;;  %v1796_v20 = vsel %vm1789_vm5, %v1792_v16, %v1795_v27  ;;  %vm1892_vm2 = vcmp.lt.s32.totalorder %v10352_v38, 2  ;;  %v13353_v16 = vld [vmem:[#allocation38_spill] sm:$0xff] }
 0x470   : > { %v10422_v56 = vsel %vm10367_vm6, 0, %v1988_v25  ;;  %vm2141_vm7 = vcmp.lt.s32.totalorder %v10072_v58, 3  ;;  %v2143_v21 = vsel %vm2139_vm12, %v2123_v1, %v2126_v0  ;;  %v1797_v33 = vsel %vm1787_vm9, nan, %v1796_v20 }
 0x471   : > { %vm1890_vm11 = vweird.f32 %v9857_v11  ;;  %v1984_v36 = vmul.f32 %v1983_v44, %v1981_v5  ;;  %v10430_v53 = vsub.s32 %v2064_v24, %v2067_v57  ;;  %v2145_v12 = vsel %vm2141_vm7, %v2129_v43, %v2144_v60  ;;  %2527 = vrot.lane.b32.xlu1 %v1797_v33, %s9421_s29 }
 0x472   : > { %v2115_v29 = vor.u32 8388608, %v2114_v51  ;;  %vm2140_vm8 = vcmp.lt.s32.totalorder %v10072_v58, 2  ;;  %v2147_v25 = vsel %vm2139_vm12, %v2126_v0, %v2129_v43  ;;  %v2151_v55 = vsel %vm2139_vm12, %v2129_v43, %v2132_v23 }
 0x473   : > { %v1985_v10 = vxor.u32 2147483648, %v1984_v36  ;;  %v2070_v52 = vsub.s32 0, %v10430_v53  ;;  %v2149_v49 = vsel %vm2141_vm7, %v2132_v23, %v10188_v9  ;;  %v2153_v24 = vsel %vm2141_vm7, %v10158_v54, %v10205_v45  ;;  %v10442_v17 = vpop.eup %9059 }
 0x474   : > { %vm1893_vm10 = vcmp.eq.s32.totalorder %v10352_v38, 0  ;;  %vm1896_vm3 = vcmp.eq.s32.totalorder %v10352_v38, 2  ;;  %v10447_v41 = vand.u32 3, %v10422_v56  ;;  %v2146_v13 = vsel %vm2140_vm8, %v2143_v21, %v2145_v12  ;;  %v10451_v1 = vpop.eup %9061  ;;  %v13355_v12 = vld [vmem:[#allocation42_spill] sm:$0xff] }
 0x475   : > { %v13159_v0 = vxor.u32 2147483648, %v10442_v17  ;;  %v1986_v9 = vsel %vm1903_vm15, %v1985_v10, %v1984_v36  ;;  %v8420_v54 = vmin.u32 %v2070_v52, %v10430_v53  ;;  %v2154_v45 = vsel %vm2140_vm8, %v2151_v55, %v2153_v24  ;;  %v13354_v36 = vld [vmem:[#allocation43_spill] sm:$0xff]  ;;  %v13357_v55 = vld [vmem:[#allocation44_spill] sm:$0xff] }
 0x476   : > { %v1894_v23 = vxor.u32 2147483648, %v10451_v1  ;;  %v1989_v46 = vsel %vm10367_vm6, %v9863_v18, %v1986_v9  ;;  %v2150_v43 = vsel %vm2140_vm8, %v2147_v25, %v2149_v49  ;;  %v2155_v27 = vshll.u32 %v2115_v29, 8 }
 0x477   : > { %v1898_v51 = vsel %vm1896_vm3, %v13159_v0, %v10451_v1  ;;  %9063 = vcosq.f32 %v1989_v46  ;;  %v2072_v60 = vclz %v8420_v54  ;;  %v2210_v5 = vand.u32 2147483647, %v13353_v16 }
 0x478   : > { %v1895_v44 = vsel %vm1893_vm10, %v10442_v17, %v1894_v23  ;;  %9065 = vsinq.f32 %v1989_v46  ;;  %v10474_v40 = vmul.u32.u64.low %v2155_v27, %v2154_v45  ;;  %v10475_v57 = vmul.u32.u64.high %v2155_v27, %v2154_v45, %v10474_v40 }
 0x479   : > { %v1899_v58 = vsel %vm1892_vm2, %v1895_v44, %v1898_v51  ;;  %v8421_v20 = vadd.s32 4294967294, %v2072_v60  ;;  %v10479_v21 = vmul.u32.u64.low %v2155_v27, %v2150_v43  ;;  %v10480_v33 = vmul.u32.u64.high %v2155_v27, %v2150_v43, %v10479_v21 }
 0x47a   : > { %v13356_v29 = vor.u32 %v13354_v36, %v13355_v12  ;;  %v10490_v10 = vshrl.u32 %v13357_v55, 5  ;;  %v1900_v52 = vsel %vm1890_vm11, nan, %v1899_v58  ;;  %v2060_v38 = vadd.s32 %v10329_v2, %v10327_v15 }
 0x47b   : > { %2529 = vrot.lane.b32.xlu0 %v1900_v52, %s9421_s29  ;;  %vm1999_vm15 = vcmp.eq.s32.totalorder %v10447_v41, 2  ;;  %vm8422_vm4 = vcmp.lt.s32.totalorder %v8421_v20, 0  ;;  %v2162_v49 = vmul.u32 %v2155_v27, %v2146_v13  ;;  %v2217_v24 = vand.u32 8388607, %v2210_v5 }
 0x47c   : > { %v10487_v25 = vsel %vm2348_vm13, %v13356_v29, 1326507024  ;;  %v2228_v9 = vshrl.u32 %v13339_v26, %v9905_v14  ;;  %vm1996_vm5 = vcmp.eq.s32.totalorder %v10447_v41, 0  ;;  %v2075_v54 = vsel %vm8422_vm4, 0, %v8421_v20 }
 0x47d   : > { %v10504_v45 = vadd.s32 %v10479_v21, %v10475_v57  ;;  %vm2164_vm6 = vc.u32 %v10475_v57, %v10479_v21  ;;  %v2227_v15 = vshll.u32 %v13338_v63, %v9896_v6  ;;  %vm1995_vm12 = vcmp.lt.s32.totalorder %v10447_v41, 2  ;;  %v13358_v41 = vld [vmem:[#allocation46_spill] sm:$0xff] }
 0x47e   : > { %v2076_v2 = vsub.s32 32, %v2075_v54  ;;  %v2080_v13 = vsub.s32 4294967266, %v2075_v54  ;;  %v2165_v46 = vadd.s32 1, %v10480_v33  ;;  %v2230_v43 = vshll.u32 %v13339_v26, %v9896_v6 }
 0x47f   : > { %vm1993_vm2 = vweird.f32 %v9863_v18  ;;  %v2077_v27 = vshll.u32 %v10430_v53, %v2075_v54  ;;  %v2231_v51 = vshrl.u32 %v13337_v19, %v9905_v14  ;;  %v2233_v60 = vshll.u32 %v13337_v19, %v9896_v6 }
 0x480   : > { %v2234_v44 = vshrl.u32 %v13334_v3, %v9905_v14  ;;  %vm2006_vm7 = vcmp.lt.s32.totalorder %v9872_v35, 0  ;;  %v2078_v40 = vshrl.u32 %v2060_v38, %v2076_v2  ;;  %v2081_v57 = vadd.s32 127, %v2080_v13 }
 0x481   : > { %v2166_v58 = vsel %vm2164_vm6, %v2165_v46, %v10480_v33  ;;  %v2229_v20 = vor.u32 %v2228_v9, %v2227_v15  ;;  %v2090_v21 = vsub.s32 4, %v10399_v30  ;;  %v2232_v53 = vor.u32 %v2231_v51, %v2230_v43  ;;  %v10524_v29 = vpop.eup %9063 }
 0x482   : > { %v2167_v36 = vadd.s32 %v2166_v58, %v2162_v49  ;;  %v2235_v12 = vor.u32 %v2234_v44, %v2233_v60  ;;  %v2079_v55 = vor.u32 %v2078_v40, %v2077_v27  ;;  %v2082_v52 = vshll.u32 %v2081_v57, 23  ;;  %v10528_v0 = vpop.eup %9065 }
 0x483   : > { %v2218_v6 = vor.u32 8388608, %v2217_v24  ;;  %v2226_v54 = vshrl.u32 %v13338_v63, %v9905_v14  ;;  %v13160_v38 = vxor.u32 2147483648, %v10524_v29  ;;  %vm2242_vm8 = vcmp.lt.s32.totalorder %v10148_v59, 1 }
 0x484   : > { %v2168_v2 = vadd.s32 536870912, %v2167_v36  ;;  %vm2243_vm10 = vcmp.lt.s32.totalorder %v10148_v59, 2  ;;  %v13161_v33 = vxor.u32 2147483648, %v10528_v0  ;;  %v2083_v49 = vor.u32 4788187, %v2082_v52 }
 0x485   : > { %vm2244_vm3 = vcmp.lt.s32.totalorder %v10148_v59, 3  ;;  %v2250_v24 = vsel %vm2242_vm8, %v2229_v20, %v2232_v53  ;;  %v2001_v14 = vsel %vm1999_vm15, %v13160_v38, %v10528_v0  ;;  %v2247_v15 = vsel %vm2245_vm14, %v2235_v12, 2102212464 }
 0x486   : > { %v10542_v9 = vshrl.u32 %v2168_v2, 30  ;;  %v2252_v13 = vsel %vm2244_vm3, %v2235_v12, %v10336_v62  ;;  %v1998_v46 = vsel %vm1996_vm5, %v10524_v29, %v13161_v33  ;;  %v2084_v43 = vand.u32 2147483647, %v2083_v49 }
 0x487   : > { %v2086_v27 = vcvt.s32.f32 %v2079_v55  ;;  %v2254_v51 = vsel %vm2242_vm8, %v2232_v53, %v2235_v12  ;;  %v2002_v60 = vsel %vm1995_vm12, %v1998_v46, %v2001_v14  ;;  %v2253_v40 = vsel %vm2243_vm10, %v2250_v24, %v2252_v13 }
 0x488   : > { %v2170_v44 = vshll.u32 %v10542_v9, 30  ;;  %v2256_v62 = vsel %vm2244_vm3, %v10230_v7, %v10343_v22  ;;  %v2003_v57 = vsel %vm1993_vm2, nan, %v2002_v60  ;;  %v2258_v55 = vshll.u32 %v2218_v6, 8 }
 0x489   : > { %v2087_v58 = vmul.f32 %v2086_v27, %v2084_v43  ;;  %v2257_v12 = vsel %vm2243_vm10, %v2254_v51, %v2256_v62  ;;  %v2443_v52 = vshrl.u32 %v13336_v31, %v13358_v41  ;;  %2531 = vrot.lane.b32.xlu1 %v2003_v57, %s9421_s29  ;;  %v2091_v2 = vsel %vm2006_vm7, %v2090_v21, %v10399_v30  ;;  %v13360_v30 = vld [vmem:[#allocation45_spill] sm:$0xff] }
 0x48a   : > { %v10575_v49 = vsub.s32 %v2167_v36, %v2170_v44  ;;  %v2246_v7 = vsel %vm2242_vm8, %v2226_v54, %v2229_v20  ;;  %v2248_v24 = vsel %vm2244_vm3, %v2232_v53, %v2247_v15  ;;  %v13359_v31 = vand.u32 2147483647, %v9872_v35  ;;  %v13361_v53 = vld [vmem:[#allocation39_spill] sm:$0xff] }
 0x48b   : > { %v2088_v22 = vxor.u32 2147483648, %v2087_v58  ;;  %v10581_v14 = vmul.u32.u64.low %v2258_v55, %v2257_v12  ;;  %v10582_v6 = vmul.u32.u64.high %v2258_v55, %v2257_v12, %v10581_v14  ;;  %vm2109_vm15 = vcmp.lt.s32.totalorder %v13349_v32, 0 }
 0x48c   : > { %vm2005_vm14 = vcmp.le.f32.partialorder %v13359_v31, 0.7853982  ;;  %v2173_v13 = vsub.s32 0, %v10575_v49  ;;  %v10587_v46 = vmul.u32.u64.low %v2258_v55, %v2253_v40  ;;  %v10588_v43 = vmul.u32.u64.high %v2258_v55, %v2253_v40, %v10587_v46 }
 0x48d   : > { %v2442_v20 = vshll.u32 %v13334_v3, %v13360_v30  ;;  %v2089_v21 = vsel %vm2006_vm7, %v2088_v22, %v2087_v58  ;;  %v10595_v36 = vsel %vm2005_vm14, 0, %v2091_v2  ;;  %v2313_v54 = vand.u32 2147483647, %v13361_v53  ;;  %v13362_v22 = vld [vmem:[#allocation41_spill] sm:$0xff] }
 0x48e   : > { %vm2451_vm4 = vcmp.lt.s32.totalorder %v10490_v10, 4  ;;  %v2092_v15 = vsel %vm2005_vm14, %v9872_v35, %v2089_v21  ;;  %v8424_v27 = vmin.u32 %v2173_v13, %v10575_v49  ;;  %v2249_v51 = vsel %vm2243_vm10, %v2246_v7, %v2248_v24 }
 0x48f   : > { %v10603_v60 = vor.u32 %v2443_v52, %v2442_v20  ;;  %9067 = vcosq.f32 %v2092_v15  ;;  %v10606_v44 = vadd.s32 %v10587_v46, %v10582_v6  ;;  %vm2267_vm5 = vc.u32 %v10582_v6, %v10587_v46 }
 0x490   : > { %9069 = vsinq.f32 %v2092_v15  ;;  %v2097_v40 = vand.u32 3, %v10595_v36  ;;  %v2175_v62 = vclz %v8424_v27  ;;  %v2268_v57 = vadd.s32 1, %v10588_v43 }
 0x491   : > { %v2193_v58 = vsub.s32 4, %v10542_v9  ;;  %v2265_v12 = vmul.u32 %v2258_v55, %v2249_v51  ;;  %v2320_v59 = vand.u32 8388607, %v2313_v54  ;;  %v2331_v52 = vshrl.u32 %v13339_v26, %v9921_v34 }
 0x492   : > { %v8425_v2 = vadd.s32 4294967294, %v2175_v62  ;;  %v2269_v7 = vsel %vm2267_vm5, %v2268_v57, %v10588_v43  ;;  %v2333_v24 = vshll.u32 %v13339_v26, %v13362_v22  ;;  %v2334_v14 = vshrl.u32 %v13337_v19, %v9921_v34 }
 0x493   : > { %v2270_v6 = vadd.s32 %v2269_v7, %v2265_v12  ;;  %v2330_v31 = vshll.u32 %v13338_v63, %v13362_v22  ;;  %v2336_v55 = vshll.u32 %v13337_v19, %v13362_v22  ;;  %v2337_v13 = vshrl.u32 %v13334_v3, %v9921_v34 }
 0x494   : > { %v10630_v46 = vsel %vm2451_vm4, %v10603_v60, 920167782  ;;  %vm2099_vm6 = vcmp.eq.s32.totalorder %v2097_v40, 0  ;;  %vm8426_vm12 = vcmp.lt.s32.totalorder %v8425_v2, 0  ;;  %v2335_v43 = vor.u32 %v2334_v14, %v2333_v24 }
 0x495   : > { %vm2098_vm7 = vcmp.lt.s32.totalorder %v2097_v40, 2  ;;  %v2178_v20 = vsel %vm8426_vm12, 0, %v8425_v2  ;;  %v2271_v21 = vadd.s32 536870912, %v2270_v6  ;;  %v2332_v15 = vor.u32 %v2331_v52, %v2330_v31 }
 0x496   : > { %v2338_v27 = vor.u32 %v2337_v13, %v2336_v55  ;;  %vm2096_vm8 = vweird.f32 %v9872_v35  ;;  %vm2102_vm10 = vcmp.eq.s32.totalorder %v2097_v40, 2  ;;  %v2179_v51 = vsub.s32 32, %v2178_v20 }
 0x497   : > { %v2183_v62 = vsub.s32 4294967266, %v2178_v20  ;;  %v2194_v57 = vsel %vm2109_vm15, %v2193_v58, %v10542_v9  ;;  %v10636_v12 = vshrl.u32 %v2271_v21, 30  ;;  %v2321_v7 = vor.u32 8388608, %v2320_v59 }
 0x498   : > { %vm2345_vm3 = vcmp.lt.s32.totalorder %v10233_v39, 1  ;;  %vm2347_vm14 = vcmp.lt.s32.totalorder %v10233_v39, 3  ;;  %v2180_v2 = vshll.u32 %v10575_v49, %v2178_v20  ;;  %v2181_v52 = vshrl.u32 %v10504_v45, %v2179_v51 }
 0x499   : > { %v2184_v22 = vadd.s32 127, %v2183_v62  ;;  %v2357_v24 = vsel %vm2345_vm3, %v2335_v43, %v2338_v27  ;;  %v10644_v14 = vpop.eup %9067  ;;  %v2273_v31 = vshll.u32 %v10636_v12, 30  ;;  %vm2346_vm5 = vcmp.lt.s32.totalorder %v10233_v39, 2 }
 0x49a   : > { %v2353_v9 = vsel %vm2345_vm3, %v2332_v15, %v2335_v43  ;;  %v2359_v49 = vsel %vm2347_vm14, %v10239_v42, %v10487_v25  ;;  %v10654_v58 = vpop.eup %9069  ;;  %v2103_v45 = vxor.u32 2147483648, %v10644_v14  ;;  %v2182_v59 = vor.u32 %v2181_v52, %v2180_v2 }
 0x49b   : > { %v2185_v55 = vshll.u32 %v2184_v22, 23  ;;  %v2355_v13 = vsel %vm2347_vm14, %v2338_v27, %v10349_v50  ;;  %v2100_v20 = vxor.u32 2147483648, %v10654_v58  ;;  %v10661_v21 = vsub.s32 %v2270_v6, %v2273_v31 }
 0x49c   : > { %v2329_v51 = vshrl.u32 %v13338_v63, %v9921_v34  ;;  %v2360_v42 = vsel %vm2346_vm5, %v2357_v24, %v2359_v49  ;;  %v2104_v25 = vsel %vm2102_vm10, %v2103_v45, %v10654_v58  ;;  %v2350_v2 = vsel %vm2348_vm13, %v2338_v27, 2102212464 }
 0x49d   : > { %v2186_v62 = vor.u32 4788187, %v2185_v55  ;;  %v2361_v50 = vshll.u32 %v2321_v7, 8  ;;  %v2101_v6 = vsel %vm2099_vm6, %v10644_v14, %v2100_v20  ;;  %v2189_v52 = vcvt.s32.f32 %v2182_v59 }
 0x49e   : > { %v2276_v34 = vsub.s32 0, %v10661_v21  ;;  %v2356_v22 = vsel %vm2346_vm5, %v2353_v9, %v2355_v13  ;;  %v2105_v24 = vsel %vm2098_vm7, %v2101_v6, %v2104_v25  ;;  %v2349_v38 = vsel %vm2345_vm3, %v2329_v51, %v2332_v15  ;;  %v13365_v25 = vld [vmem:[#allocation48_spill] sm:$0xff] }
 0x49f   : > { %v2187_v31 = vand.u32 2147483647, %v2186_v62  ;;  %v10681_v49 = vmul.u32.u64.low %v2361_v50, %v2360_v42  ;;  %v10682_v55 = vmul.u32.u64.high %v2361_v50, %v2360_v42, %v10681_v49  ;;  %v2106_v27 = vsel %vm2096_vm8, nan, %v2105_v24  ;;  %v13366_v62 = vld [vmem:[#allocation47_spill] sm:$0xff] }
 0x4a0   : > { %v8428_v7 = vmin.u32 %v2276_v34, %v10661_v21  ;;  %v2351_v59 = vsel %vm2347_vm14, %v2335_v43, %v2350_v2  ;;  %2533 = vrot.lane.b32.xlu0 %v2106_v27, %s9421_s29  ;;  %vm10694_vm13 = vcmp.le.f32.partialorder %v2107_v37, 0.7853982  ;;  %v13367_v6 = vor.u32 %v13365_v25, %v13366_v62  ;;  %v13368_v2 = vld [vmem:[#allocation40_spill] sm:$0xff] }
 0x4a1   : > { %v2190_v9 = vmul.f32 %v2189_v52, %v2187_v31  ;;  %v10698_v13 = vmul.u32.u64.low %v2361_v50, %v2356_v22  ;;  %v10699_v42 = vmul.u32.u64.high %v2361_v50, %v2356_v22, %v10698_v13  ;;  %v10708_v43 = vsel %vm10694_vm13, 0, %v2194_v57 }
 0x4a2   : > { %v2461_v15 = vsel %vm2451_vm4, %v13367_v6, 1326507024  ;;  %v2278_v51 = vclz %v8428_v7  ;;  %v2416_v37 = vand.u32 2147483647, %v13368_v2  ;;  %v2352_v52 = vsel %vm2346_vm5, %v2349_v38, %v2351_v59 }
 0x4a3   : > { %v2191_v34 = vxor.u32 2147483648, %v2190_v9  ;;  %v10714_v22 = vadd.s32 %v10698_v13, %v10682_v55  ;;  %vm2370_vm6 = vc.u32 %v10682_v55, %v10698_v13  ;;  %v2433_v57 = vshll.u32 %v13338_v63, %v13360_v30 }
 0x4a4   : > { %v8429_v24 = vadd.s32 4294967294, %v2278_v51  ;;  %v2423_v31 = vand.u32 8388607, %v2416_v37  ;;  %v2434_v49 = vshrl.u32 %v13339_v26, %v13358_v41  ;;  %v2371_v39 = vadd.s32 1, %v10699_v42 }
 0x4a5   : > { %v2192_v27 = vsel %vm2109_vm15, %v2191_v34, %v2190_v9  ;;  %v2436_v38 = vshll.u32 %v13339_v26, %v13360_v30  ;;  %v2437_v55 = vshrl.u32 %v13337_v19, %v13358_v41  ;;  %v2368_v59 = vmul.u32 %v2361_v50, %v2352_v52 }
 0x4a6   : > { %v2195_v7 = vsel %vm10694_vm13, %v13349_v32, %v2192_v27  ;;  %vm8430_vm12 = vcmp.lt.s32.totalorder %v8429_v24, 0  ;;  %v2435_v13 = vor.u32 %v2434_v49, %v2433_v57  ;;  %v2372_v62 = vsel %vm2370_vm6, %v2371_v39, %v10699_v42 }
 0x4a7   : > { %9071 = vcosq.f32 %v2195_v7  ;;  %v2281_v25 = vsel %vm8430_vm12, 0, %v8429_v24  ;;  %v2438_v9 = vor.u32 %v2437_v55, %v2436_v38  ;;  %v2432_v26 = vshrl.u32 %v13338_v63, %v13358_v41 }
 0x4a8   : > { %9073 = vsinq.f32 %v2195_v7  ;;  %v2282_v6 = vsub.s32 32, %v2281_v25  ;;  %v2286_v51 = vsub.s32 4294967266, %v2281_v25  ;;  %v2373_v34 = vadd.s32 %v2372_v62, %v2368_v59 }
 0x4a9   : > { %v2424_v33 = vor.u32 8388608, %v2423_v31  ;;  %v2439_v40 = vshll.u32 %v13337_v19, %v13360_v30  ;;  %v2440_v50 = vshrl.u32 %v13334_v3, %v13358_v41  ;;  %v2283_v52 = vshll.u32 %v10661_v21, %v2281_v25 }
 0x4aa   : > { %v2284_v24 = vshrl.u32 %v10606_v44, %v2282_v6  ;;  %v2287_v42 = vadd.s32 127, %v2286_v51  ;;  %vm2448_vm15 = vcmp.lt.s32.totalorder %v10490_v10, 1  ;;  %v2374_v57 = vadd.s32 536870912, %v2373_v34 }
 0x4ab   : > { %v2441_v49 = vor.u32 %v2440_v50, %v2439_v40  ;;  %vm2450_vm7 = vcmp.lt.s32.totalorder %v10490_v10, 3  ;;  %v2456_v63 = vsel %vm2448_vm15, %v2435_v13, %v2438_v9  ;;  %vm2449_vm10 = vcmp.lt.s32.totalorder %v10490_v10, 2 }
 0x4ac   : > { %v2285_v31 = vor.u32 %v2284_v24, %v2283_v52  ;;  %v2288_v27 = vshll.u32 %v2287_v42, 23  ;;  %v2462_v3 = vsel %vm2450_vm7, %v10603_v60, %v2461_v15  ;;  %v10750_v19 = vshrl.u32 %v2374_v57, 30 }
 0x4ad   : > { %v2453_v41 = vsel %vm2451_vm4, %v2441_v49, 2102212464  ;;  %v2458_v30 = vsel %vm2450_vm7, %v2441_v49, %v10630_v46  ;;  %v2460_v44 = vsel %vm2448_vm15, %v2438_v9, %v2441_v49  ;;  %v2200_v21 = vand.u32 3, %v10708_v43 }
 0x4ae   : > { %v2289_v39 = vor.u32 4788187, %v2288_v27  ;;  %v2459_v38 = vsel %vm2449_vm10, %v2456_v63, %v2458_v30  ;;  %v2464_v55 = vshll.u32 %v2424_v33, 8  ;;  %v2292_v60 = vcvt.s32.f32 %v2285_v31 }
 0x4af   : > { %v2376_v15 = vshll.u32 %v10750_v19, 30  ;;  %v2452_v7 = vsel %vm2448_vm15, %v2432_v26, %v2435_v13  ;;  %v2463_v59 = vsel %vm2449_vm10, %v2460_v44, %v2462_v3  ;;  %v2454_v25 = vsel %vm2450_vm7, %v2438_v9, %v2453_v41  ;;  %v1544_v44 = vpop.permute.xlu1 %1543 }
 0x4b0   : > { %v2290_v46 = vand.u32 2147483647, %v2289_v39  ;;  %v10769_v62 = vmul.u32.u64.low %v2464_v55, %v2463_v59  ;;  %v10770_v6 = vmul.u32.u64.high %v2464_v55, %v2463_v59, %v10769_v62  ;;  %vm2212_vm4 = vcmp.lt.s32.totalorder %v13353_v16, 0  ;;  %v13371_v59 = vld [vmem:[#allocation29_spill] sm:$0xff] }
 0x4b1   : > { %v10772_v51 = vpop.eup %9071  ;;  %v2377_v33 = vsub.s32 %v2373_v34, %v2376_v15  ;;  %v10775_v40 = vmul.u32.u64.low %v2464_v55, %v2459_v38  ;;  %v10776_v50 = vmul.u32.u64.high %v2464_v55, %v2459_v38, %v10775_v40  ;;  %vm2199_vm3 = vweird.f32 %v13349_v32  ;;  %v1546_v62 = vpop.permute.xlu0 %1545 }
 0x4b2   : > { %v10778_v52 = vpop.eup %9073  ;;  %vm2202_vm14 = vcmp.eq.s32.totalorder %v2200_v21, 0  ;;  %v2206_v13 = vxor.u32 2147483648, %v10772_v51  ;;  %v2293_v26 = vmul.f32 %v2292_v60, %v2290_v46  ;;  %vm2205_vm5 = vcmp.eq.s32.totalorder %v2200_v21, 2 }
 0x4b3   : > { %v2203_v9 = vxor.u32 2147483648, %v10778_v52  ;;  %v2379_v24 = vsub.s32 0, %v2377_v33  ;;  %v2455_v42 = vsel %vm2449_vm10, %v2452_v7, %v2454_v25  ;;  %v10789_v49 = vadd.s32 %v10775_v40, %v10770_v6 }
 0x4b4   : > { %v2207_v34 = vsel %vm2205_vm5, %v2206_v13, %v10778_v52  ;;  %v2294_v57 = vxor.u32 2147483648, %v2293_v26  ;;  %vm2473_vm13 = vc.u32 %v10770_v6, %v10775_v40  ;;  %vm2201_vm6 = vcmp.lt.s32.totalorder %v2200_v21, 2 }
 0x4b5   : > { %v2204_v63 = vsel %vm2202_vm14, %v10772_v51, %v2203_v9  ;;  %vm10797_vm12 = vcmp.le.f32.partialorder %v2210_v5, 0.7853982  ;;  %v8432_v31 = vmin.u32 %v2379_v24, %v2377_v33  ;;  %v2296_v41 = vsub.s32 4, %v10636_v12  ;;  %v1550_v32 = vpop.permute.xlu0 %1549 }
 0x4b6   : > { %v2208_v27 = vsel %vm2201_vm6, %v2204_v63, %v2207_v34  ;;  %v2295_v3 = vsel %vm2212_vm4, %v2294_v57, %v2293_v26  ;;  %v2474_v30 = vadd.s32 1, %v10776_v50  ;;  %v2471_v38 = vmul.u32 %v2464_v55, %v2455_v42  ;;  %v13372_v34 = vld [vmem:[#allocation30_spill] sm:$0xff] }
 0x4b7   : > { %v2209_v21 = vsel %vm2199_vm3, nan, %v2208_v27  ;;  %v2298_v5 = vsel %vm10797_vm12, %v13353_v16, %v2295_v3  ;;  %v2381_v39 = vclz %v8432_v31  ;;  %v1567_v46 = vsub.f32 %v13371_v59, %v1544_v44 }
 0x4b8   : > { %2535 = vrot.lane.b32.xlu1 %v2209_v21, %s9421_s29  ;;  %9075 = vcosq.f32 %v2298_v5  ;;  %v2475_v60 = vsel %vm2473_vm13, %v2474_v30, %v10776_v50  ;;  %v2297_v25 = vsel %vm2212_vm4, %v2296_v41, %v10636_v12  ;;  %v9428_v55 = vmov 0.0   ;;  %v1548_v41 = vpop.permute.xlu1 %1547 }
 0x4b9   : > { %9077 = vsinq.f32 %v2298_v5  ;;  %v8433_v15 = vadd.s32 4294967294, %v2381_v39  ;;  %v2476_v7 = vadd.s32 %v2475_v60, %v2471_v38  ;;  %8711 = vmatprep.subr.mxu0 %v9428_v55  ;;  %8716 = vmatprep.subr.mxu1 %v9428_v55  ;;  %v10822_v6 = vsel %vm10797_vm12, 0, %v2297_v25 }
 0x4ba   : > { %vm9429_vm7 = vmmov 0   ;;  %v1607_v12 = vmul.f32 2.0, %v1567_v46  ;;  %v1568_v57 = vsub.f32 %v13372_v34, %v1546_v62  ;;  %v2303_v3 = vand.u32 3, %v10822_v6 }
 0x4bb   : > { %vm8434_vm15 = vcmp.lt.s32.totalorder %v8433_v15, 0  ;;  %v2477_v26 = vadd.s32 536870912, %v2476_v7  ;;  %8713 = vmatprep.mubr.msk.f32.mxu0 %vm9429_vm7, %v9428_v55  ;;  %8718 = vmatprep.mubr.msk.f32.mxu1 %vm9429_vm7, %v9428_v55  ;;  %vm2302_vm5 = vweird.f32 %v13353_v16  ;;  %vm2315_vm13 = vcmp.lt.s32.totalorder %v13361_v53, 0 }
 0x4bc   : > { %v2384_v24 = vsel %vm8434_vm15, 0, %v8433_v15  ;;  %v1608_v39 = vmul.f32 2.0, %v1568_v57  ;;  %v8399_v60 = vclamps-f32 %v1607_v12, 30.0  ;;  %vm2305_vm10 = vcmp.eq.s32.totalorder %v2303_v3, 0 }
 0x4bd   : > { %v2385_v40 = vsub.s32 32, %v2384_v24  ;;  %v2389_v50 = vsub.s32 4294967266, %v2384_v24  ;;  %v10824_v42 = vshrl.u32 %v2477_v26, 30  ;;  %v2386_v63 = vshll.u32 %v2377_v33, %v2384_v24 }
 0x4be   : > { %vm2308_vm4 = vcmp.eq.s32.totalorder %v2303_v3, 2  ;;  %vm2304_vm14 = vcmp.lt.s32.totalorder %v2303_v3, 2  ;;  %v2399_v12 = vsub.s32 4, %v10750_v19  ;;  %vm2314_vm6 = vcmp.le.f32.partialorder %v2313_v54, 0.7853982 }
 0x4bf   : > { %v2387_v31 = vshrl.u32 %v10714_v22, %v2385_v40  ;;  %v2390_v10 = vadd.s32 127, %v2389_v50  ;;  %v2479_v27 = vshll.u32 %v10824_v42, 30  ;;  %v13373_v22 = vld [vmem:[#allocation31_spill] sm:$0xff]  ;;  %v8400_v40 = vclamps-f32 %v1608_v39, 30.0 }
 0x4c0   : > { %v1569_v46 = vsub.f32 %v13373_v22, %v1548_v41  ;;  %v1639_v41 = vmul.f32 1.442695, %v8399_v60  ;;  %vm2418_vm15 = vcmp.lt.s32.totalorder %v13368_v2, 0 }
 0x4c1   : > { %v2388_v30 = vor.u32 %v2387_v31, %v2386_v63  ;;  %v2391_v44 = vshll.u32 %v2390_v10, 23  ;;  %v2480_v21 = vsub.s32 %v2476_v7, %v2479_v27  ;;  %v1655_v31 = vsub.f32 0.0, %v8399_v60 }
 0x4c2   : > { %v10834_v5 = vpop.eup %9075  ;;  %v1656_v39 = vsub.f32 0.0, %v8400_v40 }
 0x4c3   : > { %v10836_v38 = vpop.eup %9077  ;;  %v2309_v15 = vxor.u32 2147483648, %v10834_v5  ;;  %v2392_v33 = vor.u32 4788187, %v2391_v44  ;;  %v2482_v59 = vsub.s32 0, %v2480_v21  ;;  %v2395_v26 = vcvt.s32.f32 %v2388_v30 }
 0x4c4   : > { %v2306_v25 = vxor.u32 2147483648, %v10836_v38  ;;  %v10853_v30 = vmul.f32 2.0, %v1569_v46  ;;  %v2400_v44 = vsel %vm2315_vm13, %v2399_v12, %v10750_v19  ;;  %v1665_v19 = vmul.f32 1.442695, %v1656_v39 }
 0x4c5   : > { %v2310_v7 = vsel %vm2308_vm4, %v2309_v15, %v10836_v38  ;;  %v2393_v62 = vand.u32 2147483647, %v2392_v33  ;;  %v8436_v24 = vmin.u32 %v2482_v59, %v2480_v21  ;;  %v1663_v59 = vmul.f32 1.442695, %v1655_v31 }
 0x4c6   : > { %v2307_v50 = vsel %vm2305_vm10, %v10834_v5, %v2306_v25  ;;  %v8401_v46 = vclamps-f32 %v10853_v30, 30.0  ;;  %vm10869_vm10 = vcmp.le.f32.partialorder %v2416_v37, 0.7853982  ;;  %v3212_v39 = vadd.s32 3, %v10822_v6 }
 0x4c7   : > { %v2311_v34 = vsel %vm2304_vm14, %v2307_v50, %v2310_v7  ;;  %v2396_v57 = vmul.f32 %v2395_v26, %v2393_v62  ;;  %v2484_v63 = vclz %v8436_v24  ;;  %v3004_v62 = vadd.s32 3, %v10595_v36 }
 0x4c8   : > { %v2312_v10 = vsel %vm2302_vm5, nan, %v2311_v34  ;;  %v2402_v26 = vsel %vm2314_vm6, 0, %v2400_v44  ;;  %v1641_v50 = vmul.f32 1.442695, %v8400_v40  ;;  %v10865_v36 = vsub.f32 0.0, %v8401_v46 }
 0x4c9   : > { %2537 = vrot.lane.b32.xlu0 %v2312_v10, %s9421_s29  ;;  %v2397_v27 = vxor.u32 2147483648, %v2396_v57  ;;  %v8437_v3 = vadd.s32 4294967294, %v2484_v63  ;;  %v3005_v63 = vand.u32 3, %v3004_v62  ;;  %v2502_v40 = vsub.s32 4, %v10824_v42 }
 0x4ca   : > { %v3108_v44 = vadd.s32 3, %v10708_v43  ;;  %v3213_v43 = vand.u32 3, %v3212_v39 }
 0x4cb   : > { %v2398_v33 = vsel %vm2315_vm13, %v2397_v27, %v2396_v57  ;;  %vm8438_vm12 = vcmp.lt.s32.totalorder %v8437_v3, 0  ;;  %v2406_v57 = vand.u32 3, %v2402_v26  ;;  %vm3007_vm13 = vcmp.eq.s32.totalorder %v3005_v63, 0 }
 0x4cc   : > { %v2401_v22 = vsel %vm2314_vm6, %v13361_v53, %v2398_v33  ;;  %v2487_v7 = vsel %vm8438_vm12, 0, %v8437_v3  ;;  %vm3010_vm6 = vcmp.eq.s32.totalorder %v3005_v63, 2  ;;  %vm3006_vm12 = vcmp.lt.s32.totalorder %v3005_v63, 2 }
 0x4cd   : > { %9079 = vcosq.f32 %v2401_v22  ;;  %v2488_v24 = vsub.s32 32, %v2487_v7  ;;  %v2492_v60 = vsub.s32 4294967266, %v2487_v7  ;;  %v2489_v12 = vshll.u32 %v2480_v21, %v2487_v7 }
 0x4ce   : > { %9081 = vsinq.f32 %v2401_v22  ;;  %vm2407_vm4 = vcmp.lt.s32.totalorder %v2406_v57, 2  ;;  %vm2408_vm14 = vcmp.eq.s32.totalorder %v2406_v57, 0  ;;  %v3012_v37 = vsel %vm3010_vm6, %v2103_v45, %v10654_v58 }
 0x4cf   : > { %v2490_v54 = vshrl.u32 %v10789_v49, %v2488_v24  ;;  %v2493_v34 = vadd.s32 127, %v2492_v60  ;;  %9083 = vpow2.f32 %v1639_v41  ;;  %v3009_v41 = vsel %vm3007_vm13, %v10644_v14, %v2100_v20 }
 0x4d0   : > { %9085 = vpow2.f32 %v1663_v59  ;;  %vm2411_vm0 = vcmp.eq.s32.totalorder %v2406_v57, 2  ;;  %v3013_v22 = vsel %vm3006_vm12, %v3009_v41, %v3012_v37  ;;  %v3316_v7 = vadd.s32 3, %v2402_v26 }
 0x4d1   : > { %v2491_v31 = vor.u32 %v2490_v54, %v2489_v12  ;;  %v2494_v10 = vshll.u32 %v2493_v34, 23  ;;  %9087 = vpow2.f32 %v1641_v50  ;;  %v2503_v20 = vsel %vm2418_vm15, %v2502_v40, %v10824_v42  ;;  %v10911_v40 = vpop.permute.xlu1 %1551 }
 0x4d2   : > { %9089 = vpow2.f32 %v1665_v19  ;;  %v10887_v60 = vsel %vm2096_vm8, nan, %v3013_v22  ;;  %v3109_v14 = vand.u32 3, %v3108_v44  ;;  %v3317_v6 = vand.u32 3, %v3316_v7 }
 0x4d3   : > { %v2495_v49 = vor.u32 4788187, %v2494_v10  ;;  %v2498_v3 = vcvt.s32.f32 %v2491_v31  ;;  %vm3215_vm8 = vcmp.eq.s32.totalorder %v3213_v43, 0  ;;  %v1643_v7 = vmul.f32 1.442695, %v8401_v46 }
 0x4d4   : > { %vm3110_vm13 = vcmp.lt.s32.totalorder %v3109_v14, 2  ;;  %vm3111_vm6 = vcmp.eq.s32.totalorder %v3109_v14, 0  ;;  %vm3114_vm12 = vcmp.eq.s32.totalorder %v3109_v14, 2 }
 0x4d5   : > { %v2496_v27 = vand.u32 2147483647, %v2495_v49  ;;  %v3113_v42 = vsel %vm3111_vm6, %v10772_v51, %v2203_v9  ;;  %v3116_v54 = vsel %vm3114_vm12, %v2206_v13, %v10778_v52  ;;  %v2505_v52 = vsel %vm10869_vm10, 0, %v2503_v20 }
 0x4d6   : > { %v3117_v10 = vsel %vm3110_vm13, %v3113_v42, %v3116_v54  ;;  %v3217_v13 = vsel %vm3215_vm8, %v10834_v5, %v2306_v25  ;;  %vm3318_vm13 = vcmp.lt.s32.totalorder %v3317_v6, 2  ;;  %v3420_v44 = vadd.s32 3, %v2505_v52 }
 0x4d7   : > { %v9080_v33 = vpop.eup %9079  ;;  %v2499_v59 = vmul.f32 %v2498_v3, %v2496_v27  ;;  %v10917_v51 = vsel %vm2199_vm3, nan, %v3117_v10  ;;  %vm3322_vm3 = vcmp.eq.s32.totalorder %v3317_v6, 2  ;;  %v2509_v39 = vand.u32 3, %v2505_v52 }
 0x4d8   : > { %v9082_v62 = vpop.eup %9081  ;;  %v2412_v24 = vxor.u32 2147483648, %v9080_v33 }
 0x4d9   : > { %v2409_v58 = vxor.u32 2147483648, %v9082_v62  ;;  %v2500_v45 = vxor.u32 2147483648, %v2499_v59  ;;  %v10889_v50 = vpop.eup %9083 }
 0x4da   : > { %v2413_v19 = vsel %vm2411_vm0, %v2412_v24, %v9082_v62  ;;  %v10891_v26 = vpop.eup %9085  ;;  %vm2405_vm0 = vweird.f32 %v13361_v53  ;;  %v3324_v41 = vsel %vm3322_vm3, %v2412_v24, %v9082_v62 }
 0x4db   : > { %v2410_v12 = vsel %vm2408_vm14, %v9080_v33, %v2409_v58  ;;  %v2501_v35 = vsel %vm2418_vm15, %v2500_v45, %v2499_v59  ;;  %v10902_v34 = vpop.eup %9087  ;;  %vm3218_vm15 = vcmp.eq.s32.totalorder %v3213_v43, 2  ;;  %vm3319_vm14 = vcmp.eq.s32.totalorder %v3317_v6, 0  ;;  %v10941_v59 = vpop.permute.xlu0 %1553 }
 0x4dc   : > { %v2414_v63 = vsel %vm2407_vm4, %v2410_v12, %v2413_v19  ;;  %v2504_v31 = vsel %vm10869_vm10, %v13368_v2, %v2501_v35  ;;  %v10909_v49 = vpop.eup %9089  ;;  %vm3214_vm4 = vcmp.lt.s32.totalorder %v3213_v43, 2  ;;  %v3220_v57 = vsel %vm3218_vm15, %v2309_v15, %v10836_v38  ;;  %v10938_v38 = vpop.permute.xlu1 %1555  ;;  %v13376_v12 = vld [vmem:[#allocation32_spill] sm:$0xff] }
 0x4dd   : > { %v2415_v9 = vsel %vm2405_vm0, nan, %v2414_v63  ;;  %9091 = vcosq.f32 %v2504_v31  ;;  %v3221_v27 = vsel %vm3214_vm4, %v3217_v13, %v3220_v57  ;;  %v3321_v3 = vsel %vm3319_vm14, %v9080_v33, %v2409_v58 }
 0x4de   : > { %2539 = vrot.lane.b32.xlu1 %v2415_v9, %s9421_s29  ;;  %9093 = vsinq.f32 %v2504_v31  ;;  %v10930_v21 = vsel %vm2302_vm5, nan, %v3221_v27  ;;  %v3325_v37 = vsel %vm3318_vm13, %v3321_v3, %v3324_v41  ;;  %v1679_v25 = vadd.f32 %v10891_v26, %v10889_v50 }
 0x4df   : > { %v10936_v5 = vsel %vm2405_vm0, nan, %v3325_v37  ;;  %v1667_v15 = vmul.f32 1.442695, %v10865_v36  ;;  %v3421_v33 = vand.u32 3, %v3420_v44  ;;  %v1680_v14 = vadd.f32 %v10909_v49, %v10902_v34  ;;  %v10947_v46 = vpop.permute.xlu0 %1557  ;;  %v13377_v37 = vld [vmem:[#allocation21_spill] sm:$0xff] }
 0x4e0   : > { %v1687_v16 = vmul.f32 0.5, %v1679_v25  ;;  %vm2511_vm5 = vcmp.eq.s32.totalorder %v2509_v39, 0  ;;  %vm2514_vm10 = vcmp.eq.s32.totalorder %v2509_v39, 2  ;;  %vm2510_vm0 = vcmp.lt.s32.totalorder %v2509_v39, 2 }
 0x4e1   : > { %9095 = vpow2.f32 %v1667_v15  ;;  %vm3426_vm6 = vcmp.eq.s32.totalorder %v3421_v33, 2  ;;  %vm3423_vm12 = vcmp.eq.s32.totalorder %v3421_v33, 0  ;;  %vm3422_vm8 = vcmp.lt.s32.totalorder %v3421_v33, 2 }
 0x4e2   : > { %vm2508_vm15 = vweird.f32 %v13368_v2  ;;  %v1570_v35 = vsub.f32 %v13376_v12, %v1550_v32  ;;  %v1688_v63 = vmul.f32 0.5, %v1680_v14  ;;  %v2575_v31 = vsub.f32 %v10889_v50, %v10891_v26 }
 0x4e3   : > { %v2528_v62 = vpop.permute.xlu1 %2527  ;;  %v2576_v50 = vsub.f32 %v10902_v34, %v10909_v49  ;;  %v13378_v49 = vld [vmem:[#allocation22_spill] sm:$0xff] }
 0x4e4   : > { %v2551_v53 = vadd.f32 %v2528_v62, %v1687_v16  ;;  %v1610_v9 = vmul.f32 2.0, %v1570_v35  ;;  %v2583_v2 = vmul.f32 0.5, %v2575_v31 }
 0x4e5   : > { %v2584_v25 = vmul.f32 0.5, %v2576_v50 }
 0x4e6   : > { %9097 = vrcp.f32 %v2551_v53  ;;  %v8402_v27 = vclamps-f32 %v1610_v9, 30.0 }
 0x4e7   : > { %v9092_v22 = vpop.eup %9091  ;;  %9099 = vpow2.f32 %v1643_v7  ;;  %v13379_v7 = vld [vmem:[#allocation33_spill] sm:$0xff] }
 0x4e8   : > { %v9094_v24 = vpop.eup %9093  ;;  %v2515_v20 = vxor.u32 2147483648, %v9092_v22  ;;  %v1658_v26 = vsub.f32 0.0, %v8402_v27  ;;  %v1645_v34 = vmul.f32 1.442695, %v8402_v27  ;;  %v1571_v62 = vsub.f32 %v13379_v7, %v10911_v40 }
 0x4e9   : > { %v2512_v58 = vxor.u32 2147483648, %v9094_v24 }
 0x4ea   : > { %v2516_v36 = vsel %vm2514_vm10, %v2515_v20, %v9094_v24  ;;  %v3428_v45 = vsel %vm3426_vm6, %v2515_v20, %v9094_v24  ;;  %v1669_v39 = vmul.f32 1.442695, %v1658_v26  ;;  %v1611_v20 = vmul.f32 2.0, %v1571_v62 }
 0x4eb   : > { %v2513_v43 = vsel %vm2511_vm5, %v9092_v22, %v2512_v58  ;;  %v3425_v30 = vsel %vm3423_vm12, %v9092_v22, %v2512_v58  ;;  %v9096_v13 = vpop.eup %9095 }
 0x4ec   : > { %v2517_v6 = vsel %vm2510_vm0, %v2513_v43, %v2516_v36  ;;  %v3429_v19 = vsel %vm3422_vm8, %v3425_v30, %v3428_v45  ;;  %v8403_v45 = vclamps-f32 %v1611_v20, 30.0 }
 0x4ed   : > { %v2518_v42 = vsel %vm2508_vm15, nan, %v2517_v6  ;;  %v10951_v54 = vsel %vm2508_vm15, nan, %v3429_v19  ;;  %v2530_v10 = vpop.permute.xlu0 %2529  ;;  %v13380_v6 = vld [vmem:[#allocation23_spill] sm:$0xff] }
 0x4ee   : > { %2541 = vrot.lane.b32.xlu0 %v2518_v42, %s9421_s29  ;;  %v2552_v52 = vadd.f32 %v2530_v10, %v1688_v63  ;;  %v1659_v40 = vsub.f32 0.0, %v8403_v45  ;;  %v13381_v63 = vld [vmem:[#allocation34_spill] sm:$0xff]  ;;  %v1647_v10 = vmul.f32 1.442695, %v8403_v45 }
 0x4ef   : > { %v1572_v31 = vsub.f32 %v13381_v63, %v10941_v59 }
 0x4f0   : > { %9101 = vrcp.f32 %v2552_v52  ;;  %v9098_v57 = vpop.eup %9097  ;;  %v1671_v35 = vmul.f32 1.442695, %v1659_v40  ;;  %v13384_v40 = vld [vmem:[#allocation36_spill] sm:$0xff] }
 0x4f1   : > { %3439 = vrot.lane.b32.xlu1 %v9098_v57, %s9420_s30  ;;  %v10957_v32 = vmul.f32 %v9098_v57, %v2583_v2  ;;  %v9100_v3 = vpop.eup %9099  ;;  %v1612_v9 = vmul.f32 2.0, %v1572_v31  ;;  %v13385_v31 = vld [vmem:[#allocation25_spill] sm:$0xff] }
 0x4f2   : > { %v1681_v41 = vadd.f32 %v9100_v3, %v9096_v13  ;;  %v2577_v24 = vsub.f32 %v9100_v3, %v9096_v13 }
 0x4f3   : > { %8712 = vmatpush3.xpose.msk.msra.mxu0 %vm886_vm1, %v10957_v32  ;;  %v8404_v13 = vclamps-f32 %v1612_v9, 30.0 }
 0x4f4   : > { %8721 = vmatprep.subr.mxu0 %v9428_v55  ;;  %v1689_v44 = vmul.f32 0.5, %v1681_v41  ;;  %v2585_v53 = vmul.f32 0.5, %v2577_v24 }
 0x4f5   : > { %v1660_v27 = vsub.f32 0.0, %v8404_v13 }
 0x4f6   : > { %8714 = vmatmul.mubr.msk.f32.vlgmr.msra.gmra.mrb[10].mxu0 %vm886_vm1, %v13377_v37 }
 0x4f7   : > { %8723 = vmatprep.mubr.msk.f32.mxu0 %vm9429_vm7, %v9428_v55  ;;  %v1673_v59 = vmul.f32 1.442695, %v1660_v27 }
 0x4fa   : > { %v9102_v15 = vpop.eup %9101 }
 0x4fb   : > { %v2532_v33 = vpop.permute.xlu1 %2531  ;;  %3441 = vrot.lane.b32.xlu0 %v9102_v15, %s9420_s30  ;;  %v10969_v22 = vmul.f32 %v9102_v15, %v2584_v25  ;;  %v1649_v25 = vmul.f32 1.442695, %v8404_v13  ;;  %v13383_v15 = vld [vmem:[#allocation35_spill] sm:$0xff] }
 0x4fc   : > { %v2553_v16 = vadd.f32 %v2532_v33, %v1689_v44  ;;  %v13382_v44 = vld [vmem:[#allocation24_spill] sm:$0xff] }
 0x4fd   : > { %8717 = vmatpush3.xpose.msk.msra.mxu1 %vm886_vm1, %v10969_v22 }
 0x4fe   : > { %9103 = vrcp.f32 %v2553_v16  ;;  %8726 = vmatprep.subr.mxu1 %v9428_v55 }
 0x4ff   : > { %9105 = vpow2.f32 %v1669_v39  ;;  %v1573_v39 = vsub.f32 %v13383_v15, %v10938_v38 }
 0x500   : > { %9107 = vpow2.f32 %v1645_v34  ;;  %8719 = vmatmul.mubr.msk.f32.vlgmr.msra.gmra.mrb[10].mxu1 %vm886_vm1, %v13378_v49 }
 0x501   : > { %8728 = vmatprep.mubr.msk.f32.mxu1 %vm9429_vm7, %v9428_v55  ;;  %v1613_v7 = vmul.f32 2.0, %v1573_v39 }
 0x503   : > { %v8405_v62 = vclamps-f32 %v1613_v7, 30.0 }
 0x508   : > { %v9104_v14 = vpop.eup %9103 }
 0x509   : > { %v9106_v58 = vpop.eup %9105  ;;  %3443 = vrot.lane.b32.xlu1 %v9104_v14, %s9420_s30  ;;  %v10981_v36 = vmul.f32 %v9104_v14, %v2585_v53  ;;  %v1661_v14 = vsub.f32 0.0, %v8405_v62 }
 0x50a   : > { %v9108_v43 = vpop.eup %9107 }
 0x50b   : > { %8722 = vmatpush3.xpose.msk.msra.mxu0 %vm886_vm1, %v10981_v36  ;;  %v1682_v30 = vadd.f32 %v9108_v43, %v9106_v58  ;;  %v2578_v52 = vsub.f32 %v9108_v43, %v9106_v58  ;;  %v1675_v38 = vmul.f32 1.442695, %v1661_v14 }
 0x50c   : > { %8731 = vmatprep.subr.mxu0 %v9428_v55 }
 0x50d   : > { %v1690_v19 = vmul.f32 0.5, %v1682_v30  ;;  %v2586_v2 = vmul.f32 0.5, %v2578_v52 }
 0x50e   : > { %8724 = vmatmul.mubr.msk.f32.vlgmr.msra.gmra.mrb[12].mxu0 %vm886_vm1, %v13380_v6 }
 0x50f   : > { %8733 = vmatprep.mubr.msk.f32.mxu0 %vm9429_vm7, %v9428_v55 }
 0x512   : > { %v2534_v12 = vpop.permute.xlu0 %2533 }
 0x513   : > { %v2554_v42 = vadd.f32 %v2534_v12, %v1690_v19  ;;  %v1574_v19 = vsub.f32 %v13384_v40, %v10947_v46 }
 0x515   : > { %9109 = vrcp.f32 %v2554_v42  ;;  %v1651_v42 = vmul.f32 1.442695, %v8405_v62  ;;  %v13387_v62 = vld [vmem:[#allocation49_spill] sm:$0xff] }
 0x516   : > { %9111 = vpow2.f32 %v1671_v35 }
 0x517   : > { %9113 = vpow2.f32 %v1647_v10  ;;  %v1614_v10 = vmul.f32 2.0, %v1574_v19  ;;  %v13388_v19 = vld [vmem:[#allocation27_spill] sm:$0xff] }
 0x518   : > { %9115 = vpow2.f32 %v1673_v59 }
 0x519   : > { %9117 = vpow2.f32 %v1649_v25  ;;  %v8406_v46 = vclamps-f32 %v1614_v10, 30.0  ;;  %v13386_v25 = vld [vmem:[#allocation26_spill] sm:$0xff] }
 0x51b   : > { %v1662_v52 = vsub.f32 0.0, %v8406_v46 }
 0x51f   : > { %v9110_v57 = vpop.eup %9109 }
 0x520   : > { %3445 = vrot.lane.b32.xlu0 %v9110_v57, %s9420_s30  ;;  %v10993_v3 = vmul.f32 %v9110_v57, %v2586_v2  ;;  %v9112_v41 = vpop.eup %9111 }
 0x521   : > { %v9114_v50 = vpop.eup %9113 }
 0x522   : > { %8727 = vmatpush3.xpose.msk.msra.mxu1 %vm886_vm1, %v10993_v3  ;;  %v1683_v26 = vadd.f32 %v9114_v50, %v9112_v41  ;;  %v2579_v24 = vsub.f32 %v9114_v50, %v9112_v41  ;;  %v9116_v20 = vpop.eup %9115  ;;  %v1677_v50 = vmul.f32 1.442695, %v1662_v52 }
 0x523   : > { %8736 = vmatprep.subr.mxu1 %v9428_v55  ;;  %v9118_v53 = vpop.eup %9117 }
 0x524   : > { %v1691_v33 = vmul.f32 0.5, %v1683_v26  ;;  %v1684_v58 = vadd.f32 %v9118_v53, %v9116_v20  ;;  %v2587_v45 = vmul.f32 0.5, %v2579_v24  ;;  %v2580_v9 = vsub.f32 %v9118_v53, %v9116_v20 }
 0x525   : > { %8729 = vmatmul.mubr.msk.f32.vlgmr.msra.gmra.mrb[12].mxu1 %vm886_vm1, %v13382_v44  ;;  %v1653_v26 = vmul.f32 1.442695, %v8406_v46  ;;  %v2692_v24 = vadd.s32 3, %v13387_v62 }
 0x526   : > { %8738 = vmatprep.mubr.msk.f32.mxu1 %vm9429_vm7, %v9428_v55  ;;  %v1692_v12 = vmul.f32 0.5, %v1684_v58  ;;  %v2588_v2 = vmul.f32 0.5, %v2580_v9 }
 0x52a   : > { %v2536_v16 = vpop.permute.xlu1 %2535 }
 0x52b   : > { %v2555_v34 = vadd.f32 %v2536_v16, %v1691_v33 }
 0x52d   : > { %9119 = vrcp.f32 %v2555_v34 }
 0x52e   : > { %9121 = vpow2.f32 %v1675_v38 }
 0x537   : > { %v9120_v43 = vpop.eup %9119 }
 0x538   : > { %3447 = vrot.lane.b32.xlu1 %v9120_v43, %s9420_s30  ;;  %v11005_v30 = vmul.f32 %v9120_v43, %v2587_v45  ;;  %v9122_v13 = vpop.eup %9121  ;;  %v2693_v45 = vand.u32 3, %v2692_v24 }
 0x53a   : > { %8732 = vmatpush3.xpose.msk.msra.mxu0 %vm886_vm1, %v11005_v30  ;;  %vm2695_vm4 = vcmp.eq.s32.totalorder %v2693_v45, 0  ;;  %vm2698_vm14 = vcmp.eq.s32.totalorder %v2693_v45, 2  ;;  %vm2694_vm3 = vcmp.lt.s32.totalorder %v2693_v45, 2 }
 0x53b   : > { %v2538_v35 = vpop.permute.xlu0 %2537  ;;  %8741 = vmatprep.subr.mxu0 %v9428_v55 }
 0x53c   : > { %v2556_v63 = vadd.f32 %v2538_v35, %v1692_v12  ;;  %v2697_v12 = vsel %vm2695_vm4, %v10391_v47, %v1791_v48  ;;  %v2700_v35 = vsel %vm2698_vm14, %v1794_v61, %v10393_v28  ;;  %v2796_v47 = vadd.s32 3, %v10286_v4  ;;  %v13389_v4 = vld [vmem:[#allocation28_spill] sm:$0xff] }
 0x53d   : > { %8734 = vmatmul.mubr.msk.f32.vlgmr.msra.gmra.mrb[14].mxu0 %vm886_vm1, %v13385_v31 }
 0x53e   : > { %9123 = vrcp.f32 %v2556_v63  ;;  %8743 = vmatprep.mubr.msk.f32.mxu0 %vm9429_vm7, %v9428_v55  ;;  %v2797_v52 = vand.u32 3, %v2796_v47 }
 0x53f   : > { %9125 = vpow2.f32 %v1651_v42  ;;  %v2701_v42 = vsel %vm2694_vm3, %v2697_v12, %v2700_v35 }
 0x540   : > { %9127 = vpow2.f32 %v1677_v50  ;;  %v2702_v46 = vsel %vm1787_vm9, nan, %v2701_v42  ;;  %vm2799_vm9 = vcmp.eq.s32.totalorder %v2797_v52, 0  ;;  %vm2802_vm13 = vcmp.eq.s32.totalorder %v2797_v52, 2 }
 0x541   : > { %9129 = vpow2.f32 %v1653_v26  ;;  %vm2798_vm5 = vcmp.lt.s32.totalorder %v2797_v52, 2 }
 0x548   : > { %v9124_v57 = vpop.eup %9123 }
 0x549   : > { %3449 = vrot.lane.b32.xlu0 %v9124_v57, %s9420_s30  ;;  %v11017_v27 = vmul.f32 %v9124_v57, %v2588_v2  ;;  %v9126_v41 = vpop.eup %9125  ;;  %v2801_v2 = vsel %vm2799_vm9, %v10442_v17, %v1894_v23  ;;  %v13392_v23 = vxor.u32 2147483648, %v10524_v29 }
 0x54a   : > { %v1685_v59 = vadd.f32 %v9126_v41, %v9122_v13  ;;  %v9128_v16 = vpop.eup %9127  ;;  %v2581_v34 = vsub.f32 %v9126_v41, %v9122_v13  ;;  %v2900_v13 = vadd.s32 3, %v10422_v56  ;;  %v13390_v56 = vxor.u32 2147483648, %v10442_v17 }
 0x54b   : > { %8737 = vmatpush3.xpose.msk.msra.mxu1 %vm886_vm1, %v11017_v27  ;;  %v9130_v7 = vpop.eup %9129 }
 0x54c   : > { %8746 = vmatprep.subr.mxu1 %v9428_v55  ;;  %v1693_v15 = vmul.f32 0.5, %v1685_v59  ;;  %v1686_v20 = vadd.f32 %v9130_v7, %v9128_v16  ;;  %v2589_v53 = vmul.f32 0.5, %v2581_v34  ;;  %v2582_v10 = vsub.f32 %v9130_v7, %v9128_v16 }
 0x54d   : > { %v2901_v8 = vand.u32 3, %v2900_v13  ;;  %v2804_v57 = vsel %vm2802_vm13, %v13390_v56, %v10451_v1  ;;  %v13391_v59 = vxor.u32 2147483648, %v10528_v0 }
 0x54e   : > { %8739 = vmatmul.mubr.msk.f32.vlgmr.msra.gmra.mrb[14].mxu1 %vm886_vm1, %v13386_v25  ;;  %v1694_v43 = vmul.f32 0.5, %v1686_v20  ;;  %v2590_v28 = vmul.f32 0.5, %v2582_v10  ;;  %v2805_v41 = vsel %vm2798_vm5, %v2801_v2, %v2804_v57 }
 0x54f   : > { %8748 = vmatprep.mubr.msk.f32.mxu1 %vm9429_vm7, %v9428_v55  ;;  %vm2903_vm10 = vcmp.eq.s32.totalorder %v2901_v8, 0  ;;  %vm2906_vm6 = vcmp.eq.s32.totalorder %v2901_v8, 2  ;;  %v2806_v1 = vsel %vm1890_vm11, nan, %v2805_v41  ;;  %vm2902_vm12 = vcmp.lt.s32.totalorder %v2901_v8, 2 }
 0x550   : > { %v2540_v39 = vpop.permute.xlu1 %2539  ;;  %v2905_v26 = vsel %vm2903_vm10, %v10524_v29, %v13391_v59  ;;  %v2908_v17 = vsel %vm2906_vm6, %v13392_v23, %v10528_v0  ;;  %vm13924_vm11 = vcmask 130048  }
 0x551   : > { %v2557_v33 = vadd.f32 %v2540_v39, %v1693_v15  ;;  %v2909_v39 = vsel %vm2902_vm12, %v2905_v26, %v2908_v17 }
 0x553   : > { %9131 = vrcp.f32 %v2557_v33  ;;  %v2910_v33 = vsel %vm1993_vm2, nan, %v2909_v39  ;;  %vm13925_vm2 = vmmov %vm13924_vm11 }
 0x554   : > { %vm13927_vm0 = vmmov %vm13925_vm2 }
 0x555   : > { %vm13928_vm8 = vmmov %vm13927_vm0 }
 0x556   : > { %vm13929_vm15 = vmmov %vm13927_vm0 }
 0x557   : > { %vm13930_vm4 = vmmov %vm13927_vm0 }
 0x558   : > { %vm13931_vm14 = vmmov %vm13927_vm0 }
 0x55d   : > { %v9132_v14 = vpop.eup %9131 }
 0x55e   : > { %3451 = vrot.lane.b32.xlu1 %v9132_v14, %s9420_s30  ;;  %v11028_v58 = vmul.f32 %v9132_v14, %v2589_v53 }
 0x560   : > { %v2542_v38 = vpop.permute.xlu0 %2541  ;;  %8742 = vmatpush3.xpose.msk.msra.mxu0 %vm886_vm1, %v11028_v58 }
 0x561   : > { %v2558_v40 = vadd.f32 %v2542_v38, %v1694_v43  ;;  %8751 = vmatprep.subr.mxu0 %v9428_v55 }
 0x562   : > { %4079 = vrot.lane.b32.xlu1 %v13377_v37, %s9421_s29 }
 0x563   : > { %9133 = vrcp.f32 %v2558_v40  ;;  %8744 = vmatmul.mubr.msk.f32.vlgmr.msra.gmra.mrb[16].mxu0 %vm886_vm1, %v13388_v19  ;;  %v3440_v63 = vpop.permute.xlu1 %3439 }
 0x564   : > { %8753 = vmatprep.mubr.msk.f32.mxu0 %vm9429_vm7, %v9428_v55  ;;  %v3463_v48 = vmul.f32 %v3440_v63, %v2702_v46 }
 0x566   : > { %4237 = vrot.lane.b32.xlu1 %v13380_v6, %s9421_s29 }
 0x56a   : > { %4395 = vrot.lane.b32.xlu1 %v13385_v31, %s9421_s29 }
 0x56d   : > { %v9134_v61 = vpop.eup %9133  ;;  %v3442_v50 = vpop.permute.xlu0 %3441 }
 0x56e   : > { %3453 = vrot.lane.b32.xlu0 %v9134_v61, %s9420_s30  ;;  %v11053_v9 = vmul.f32 %v9134_v61, %v2590_v28  ;;  %4082 = vrot.lane.b32.xlu1 %v3463_v48, %s9421_s29  ;;  %v3464_v15 = vmul.f32 %v3442_v50, %v2806_v1 }
 0x570   : > { %8747 = vmatpush3.xpose.msk.msra.mxu1 %vm886_vm1, %v11053_v9 }
 0x571   : > { %8756 = vmatprep.subr.mxu1 %v9428_v55 }
 0x572   : > { %4158 = vrot.lane.b32.xlu0 %v13378_v49, %s9421_s29 }
 0x573   : > { %8749 = vmatmul.mubr.msk.f32.vlgmr.msra.gmra.mrb[16].mxu1 %vm886_vm1, %v13389_v4 }
 0x574   : > { %8758 = vmatprep.mubr.msk.f32.mxu1 %vm9429_vm7, %v9428_v55 }
 0x576   : > { %4316 = vrot.lane.b32.xlu0 %v13382_v44, %s9421_s29 }
 0x57a   : > { %4474 = vrot.lane.b32.xlu0 %v13386_v25, %s9421_s29 }
 0x57b   : > { %v3444_v16 = vpop.permute.xlu1 %3443 }
 0x57c   : > { %v3465_v34 = vmul.f32 %v3444_v16, %v2910_v33 }
 0x57e   : > { %4161 = vrot.lane.b32.xlu0 %v3464_v15, %s9421_s29  ;;  %4240 = vrot.lane.b32.xlu1 %v3465_v34, %s9421_s29 }
 0x592   : > { %v3446_v29 = vpop.permute.xlu0 %3445 }
 0x593   : > { %v3466_v0 = vmul.f32 %v3446_v29, %v10887_v60 }
 0x595   : > { %4319 = vrot.lane.b32.xlu0 %v3466_v0, %s9421_s29 }
 0x5aa   : > { %v3448_v11 = vpop.permute.xlu1 %3447 }
 0x5ab   : > { %v3467_v7 = vmul.f32 %v3448_v11, %v10917_v51 }
 0x5ad   : > { %4398 = vrot.lane.b32.xlu1 %v3467_v7, %s9421_s29 }
 0x5bb   : > { %v3450_v62 = vpop.permute.xlu0 %3449 }
 0x5bc   : > { %v3468_v18 = vmul.f32 %v3450_v62, %v10930_v21 }
 0x5be   : > { %4477 = vrot.lane.b32.xlu0 %v3468_v18, %s9421_s29 }
 0x5c9   : > { %v11094_v24 = vpop.f32.mrb[10].mxu0 }
 0x5ca   : > { %v8715_v20 = vpop.f32.mrb[11].mxu0 }
 0x5d0   : > { %v3452_v53 = vpop.permute.xlu1 %3451 }
 0x5d1   : > { %v3469_v14 = vmul.f32 %v3452_v53, %v10936_v5 }
 0x5d3   : > { %4556 = vrot.lane.b32.xlu1 %v3469_v14, %s9421_s29  ;;  %v11100_v45 = vpop.f32.mrb[10].mxu1 }
 0x5d4   : > { %v11098_v60 = vpop.permute.xlu1 %4079  ;;  %v8720_v51 = vpop.f32.mrb[11].mxu1 }
 0x5d5   : > { %v11314_v51 = vld [vmem:[#allocation10] sm:$0xff] }
 0x5d7   : > { %4553 = vrot.lane.b32.xlu1 %v13388_v19, %s9421_s29 }
 0x5d8   : > { %v11104_v43 = vpop.permute.xlu1 %4237 }
 0x5dc   : > { %v11106_v21 = vpop.permute.xlu1 %4395 }
 0x5e0   : > { %v3454_v38 = vpop.permute.xlu0 %3453  ;;  %v11108_v40 = vpop.permute.xlu1 %4082 }
 0x5e1   : > { %v3470_v12 = vmul.f32 %v3454_v38, %v10951_v54  ;;  %8752 = vmatpush3.xpose.msk.msra.mxu0 %vm886_vm1, %v11108_v40  ;;  %v11115_v5 = vpop.f32.mrb[12].mxu0  ;;  %v11317_v38 = vld [vmem:[#allocation11] sm:$0xff] }
 0x5e2   : > { %8761 = vmatprep.subr.mxu0 %v9428_v55  ;;  %v8725_v42 = vpop.f32.mrb[13].mxu0 }
 0x5e3   : > { %4635 = vrot.lane.b32.xlu0 %v3470_v12, %s9421_s29  ;;  %v11323_v42 = vld [vmem:[#allocation10 + $0x10] sm:$0xff] }
 0x5e4   : > { %v11117_v35 = vpop.permute.xlu0 %4158  ;;  %8754 = vmatmul.mubr.msk.f32.vlgmr.msra.gmra.mrb[18].mxu0 %vm886_vm1, %v11098_v60 }
 0x5e5   : > { %8763 = vmatprep.mubr.msk.f32.mxu0 %vm9429_vm7, %v9428_v55 }
 0x5e7   : > { %4632 = vrot.lane.b32.xlu0 %v13389_v4, %s9421_s29 }
 0x5e8   : > { %v11125_v54 = vpop.permute.xlu0 %4316 }
 0x5ec   : > { %v11127_v63 = vpop.permute.xlu0 %4474 }
 0x5f0   : > { %v11129_v10 = vpop.permute.xlu0 %4161  ;;  %v11133_v46 = vpop.permute.xlu1 %4240 }
 0x5f1   : > { %8757 = vmatpush3.xpose.msk.msra.mxu1 %vm886_vm1, %v11129_v10  ;;  %8762 = vmatpush3.xpose.msk.msra.mxu0 %vm886_vm1, %v11133_v46 }
 0x5f2   : > { %8766 = vmatprep.subr.mxu1 %v9428_v55  ;;  %8771 = vmatprep.subr.mxu0 %v9428_v55 }
 0x5f4   : > { %8759 = vmatmul.mubr.msk.f32.vlgmr.msra.gmra.mrb[18].mxu1 %vm886_vm1, %v11117_v35  ;;  %8764 = vmatmul.mubr.msk.f32.vlgmr.msra.gmra.mrb[20].mxu0 %vm886_vm1, %v11104_v43 }
 0x5f5   : > { %8768 = vmatprep.mubr.msk.f32.mxu1 %vm9429_vm7, %v9428_v55  ;;  %8773 = vmatprep.mubr.msk.f32.mxu0 %vm9429_vm7, %v9428_v55 }
 0x5f8   : > { %v11147_v48 = vpop.f32.mrb[12].mxu1 }
 0x5f9   : > { %v8730_v47 = vpop.f32.mrb[13].mxu1 }
 0x5fa   : > { %v11331_v47 = vld [vmem:[#allocation10 + $0x18] sm:$0xff] }
 0x607   : > { %v11149_v28 = vpop.permute.xlu0 %4319 }
 0x608   : > { %8767 = vmatpush3.xpose.msk.msra.mxu1 %vm886_vm1, %v11149_v28 }
 0x609   : > { %8776 = vmatprep.subr.mxu1 %v9428_v55 }
 0x60b   : > { %8769 = vmatmul.mubr.msk.f32.vlgmr.msra.gmra.mrb[20].mxu1 %vm886_vm1, %v11125_v54 }
 0x60c   : > { %8778 = vmatprep.mubr.msk.f32.mxu1 %vm9429_vm7, %v9428_v55 }
 0x610   : > { %v11158_v61 = vpop.f32.mrb[14].mxu0 }
 0x611   : > { %v8735_v52 = vpop.f32.mrb[15].mxu0 }
 0x612   : > { %v11335_v52 = vld [vmem:[#allocation11 + $0x8] sm:$0xff] }
 0x61f   : > { %v4399_v13 = vpop.permute.xlu1 %4398 }
 0x620   : > { %8772 = vmatpush3.xpose.msk.msra.mxu0 %vm886_vm1, %v4399_v13 }
 0x621   : > { %v11161_v8 = vpop.f32.mrb[14].mxu1  ;;  %8781 = vmatprep.subr.mxu0 %v9428_v55 }
 0x622   : > { %v8740_v2 = vpop.f32.mrb[15].mxu1 }
 0x623   : > { %8774 = vmatmul.mubr.msk.f32.vlgmr.msra.gmra.mrb[22].mxu0 %vm886_vm1, %v11106_v21 }
 0x624   : > { %8783 = vmatprep.mubr.msk.f32.mxu0 %vm9429_vm7, %v9428_v55 }
 0x630   : > { %v11168_v56 = vpop.permute.xlu0 %4477 }
 0x631   : > { %8777 = vmatpush3.xpose.msk.msra.mxu1 %vm886_vm1, %v11168_v56 }
 0x632   : > { %8786 = vmatprep.subr.mxu1 %v9428_v55 }
 0x634   : > { %8779 = vmatmul.mubr.msk.f32.vlgmr.msra.gmra.mrb[22].mxu1 %vm886_vm1, %v11127_v63 }
 0x635   : > { %8788 = vmatprep.mubr.msk.f32.mxu1 %vm9429_vm7, %v9428_v55 }
 0x636   : > { %v11177_v57 = vpop.f32.mrb[16].mxu0 }
 0x637   : > { %v8745_v41 = vpop.f32.mrb[17].mxu0 }
 0x645   : > { %v4557_v50 = vpop.permute.xlu1 %4556 }
 0x646   : > { %v11179_v59 = vpop.f32.mrb[16].mxu1  ;;  %8782 = vmatpush3.xpose.msk.msra.mxu0 %vm886_vm1, %v4557_v50 }
 0x647   : > { %v8750_v26 = vpop.f32.mrb[17].mxu1  ;;  %8791 = vmatprep.subr.mxu0 %v9428_v55 }
 0x649   : > { %v4554_v23 = vpop.permute.xlu1 %4553 }
 0x64a   : > { %8784 = vmatmul.mubr.msk.f32.vlgmr.msra.gmra.mrb[24].mxu0 %vm886_vm1, %v4554_v23 }
 0x64b   : > { %8792 = vmatpush3.xpose.msk.msra.mxu0 %vm886_vm1, %v10957_v32  ;;  %8793 = vmatprep.mubr.msk.f32.mxu0 %vm9429_vm7, %v9428_v55 }
 0x64c   : > { %8801 = vmatprep.subr.mxu0 %v9428_v55 }
 0x64e   : > { %8794 = vmatmul.mubr.msk.f32.vlgmr.msra.gmra.mrb[26].mxu0 %vm886_vm1, %v11098_v60 }
 0x64f   : > { %8802 = vmatpush3.xpose.msk.msra.mxu0 %vm886_vm1, %v10981_v36  ;;  %8803 = vmatprep.mubr.msk.f32.mxu0 %vm9429_vm7, %v9428_v55 }
 0x650   : > { %8811 = vmatprep.subr.mxu0 %v9428_v55 }
 0x652   : > { %8804 = vmatmul.mubr.msk.f32.vlgmr.msra.gmra.mrb[28].mxu0 %vm886_vm1, %v11104_v43 }
 0x653   : > { %8812 = vmatpush3.xpose.msk.msra.mxu0 %vm886_vm1, %v11005_v30  ;;  %8813 = vmatprep.mubr.msk.f32.mxu0 %vm9429_vm7, %v9428_v55 }
 0x654   : > { %8821 = vmatprep.subr.mxu0 %v9428_v55 }
 0x655   : > { %v4636_v32 = vpop.permute.xlu0 %4635 }
 0x656   : > { %8787 = vmatpush3.xpose.msk.msra.mxu1 %vm886_vm1, %v4636_v32  ;;  %8814 = vmatmul.mubr.msk.f32.vlgmr.msra.gmra.mrb[30].mxu0 %vm886_vm1, %v11106_v21 }
 0x657   : > { %8796 = vmatprep.subr.mxu1 %v9428_v55  ;;  %8822 = vmatpush3.xpose.msk.msra.mxu0 %vm886_vm1, %v11028_v58 }
 0x658   : > { %8823 = vmatprep.mubr.msk.f32.mxu0 %vm9429_vm7, %v9428_v55  ;;  %8831 = vmatprep.subr.mxu0 %v9428_v55 }
 0x659   : > { %v4633_v36 = vpop.permute.xlu0 %4632 }
 0x65a   : > { %8789 = vmatmul.mubr.msk.f32.vlgmr.msra.gmra.mrb[24].mxu1 %vm886_vm1, %v4633_v36  ;;  %8824 = vmatmul.mubr.msk.f32.vlgmr.msra.gmra.mrb[32].mxu0 %vm886_vm1, %v4554_v23 }
 0x65b   : > { %8797 = vmatpush3.xpose.msk.msra.mxu1 %vm886_vm1, %v10969_v22  ;;  %8798 = vmatprep.mubr.msk.f32.mxu1 %vm9429_vm7, %v9428_v55 }
 0x65c   : > { %8806 = vmatprep.subr.mxu1 %v9428_v55  ;;  %8832 = vmatpush3.xpose.msk.msra.mxu0 %vm886_vm1, %v11108_v40 }
 0x65d   : > { %8833 = vmatprep.mubr.msk.f32.mxu0 %vm9429_vm7, %v9428_v55  ;;  %8841 = vmatprep.subr.mxu0 %v9428_v55 }
 0x65e   : > { %8799 = vmatmul.mubr.msk.f32.vlgmr.msra.gmra.mrb[26].mxu1 %vm886_vm1, %v11117_v35  ;;  %v11321_v35 = vld [vmem:[#allocation10 + $0x8] sm:$0xff] }
 0x65f   : > { %8807 = vmatpush3.xpose.msk.msra.mxu1 %vm886_vm1, %v10993_v3  ;;  %8808 = vmatprep.mubr.msk.f32.mxu1 %vm9429_vm7, %v9428_v55 }
 0x660   : > { %8816 = vmatprep.subr.mxu1 %v9428_v55  ;;  %8834 = vmatmul.mubr.msk.f32.vlgmr.msra.gmra.mrb[26].mxu0 %vm886_vm1, %v13377_v37 }
 0x661   : > { %8842 = vmatpush3.xpose.msk.msra.mxu0 %vm886_vm1, %v11133_v46  ;;  %8843 = vmatprep.mubr.msk.f32.mxu0 %vm9429_vm7, %v9428_v55 }
 0x662   : > { %8809 = vmatmul.mubr.msk.f32.vlgmr.msra.gmra.mrb[28].mxu1 %vm886_vm1, %v11125_v54  ;;  %8851 = vmatprep.subr.mxu0 %v9428_v55 }
 0x663   : > { %8817 = vmatpush3.xpose.msk.msra.mxu1 %vm886_vm1, %v11017_v27  ;;  %8818 = vmatprep.mubr.msk.f32.mxu1 %vm9429_vm7, %v9428_v55 }
 0x664   : > { %8826 = vmatprep.subr.mxu1 %v9428_v55  ;;  %8844 = vmatmul.mubr.msk.f32.vlgmr.msra.gmra.mrb[28].mxu0 %vm886_vm1, %v13380_v6 }
 0x665   : > { %8852 = vmatpush3.xpose.msk.msra.mxu0 %vm886_vm1, %v4399_v13  ;;  %8853 = vmatprep.mubr.msk.f32.mxu0 %vm9429_vm7, %v9428_v55 }
 0x666   : > { %8819 = vmatmul.mubr.msk.f32.vlgmr.msra.gmra.mrb[30].mxu1 %vm886_vm1, %v11127_v63  ;;  %8861 = vmatprep.subr.mxu0 %v9428_v55 }
 0x667   : > { %8827 = vmatpush3.xpose.msk.msra.mxu1 %vm886_vm1, %v11053_v9  ;;  %8828 = vmatprep.mubr.msk.f32.mxu1 %vm9429_vm7, %v9428_v55 }
 0x668   : > { %8836 = vmatprep.subr.mxu1 %v9428_v55  ;;  %8854 = vmatmul.mubr.msk.f32.vlgmr.msra.gmra.mrb[30].mxu0 %vm886_vm1, %v13385_v31 }
 0x669   : > { %8862 = vmatpush3.xpose.msk.msra.mxu0 %vm886_vm1, %v4557_v50  ;;  %8863 = vmatprep.mubr.msk.f32.mxu0 %vm9429_vm7, %v9428_v55 }
 0x66a   : > { %8829 = vmatmul.mubr.msk.f32.vlgmr.msra.gmra.mrb[32].mxu1 %vm886_vm1, %v4633_v36  ;;  %v11355_v36 = vld [vmem:[#allocation11 + $0x10] sm:$0xff] }
 0x66b   : > { %8837 = vmatpush3.xpose.msk.msra.mxu1 %vm886_vm1, %v11129_v10  ;;  %8838 = vmatprep.mubr.msk.f32.mxu1 %vm9429_vm7, %v9428_v55 }
 0x66c   : > { %8846 = vmatprep.subr.mxu1 %v9428_v55  ;;  %8864 = vmatmul.mubr.msk.f32.vlgmr.msra.gmra.mrb[32].mxu0 %vm886_vm1, %v13388_v19  ;;  %v5979_v19 = vlaneseq }
 0x66e   : > { %8839 = vmatmul.mubr.msk.f32.vlgmr.msra.gmra.mrb[26].mxu1 %vm886_vm1, %v13378_v49  ;;  %v5980_v9 = vshrl.u32 %v5979_v19, 7  ;;  %v11379_v19 = vld [vmem:[#allocation11 + $0x28] sm:$0xff] }
 0x66f   : > { %8847 = vmatpush3.xpose.msk.msra.mxu1 %vm886_vm1, %v11149_v28  ;;  %8848 = vmatprep.mubr.msk.f32.mxu1 %vm9429_vm7, %v9428_v55  ;;  %v11333_v28 = vld [vmem:[#allocation10 + $0x20] sm:$0xff] }
 0x670   : > { %8856 = vmatprep.subr.mxu1 %v9428_v55  ;;  %v11306_v7 = vsub.s32 0, %v5980_v9 }
 0x672   : > { %8849 = vmatmul.mubr.msk.f32.vlgmr.msra.gmra.mrb[28].mxu1 %vm886_vm1, %v13382_v44 }
 0x673   : > { %8857 = vmatpush3.xpose.msk.msra.mxu1 %vm886_vm1, %v11168_v56  ;;  %8858 = vmatprep.mubr.msk.f32.mxu1 %vm9429_vm7, %v9428_v55 }
 0x674   : > { %8866 = vmatprep.subr.mxu1 %v9428_v55 }
 0x676   : > { %8859 = vmatmul.mubr.msk.f32.vlgmr.msra.gmra.mrb[30].mxu1 %vm886_vm1, %v13386_v25  ;;  %v9430_v25 = vmov 1966171168  }
 0x677   : > { %8867 = vmatpush3.xpose.msk.msra.mxu1 %vm886_vm1, %v4636_v32  ;;  %8868 = vmatprep.mubr.msk.f32.mxu1 %vm9429_vm7, %v9428_v55  ;;  %v5977_v58 = vunpack.c.l.s4 %v9430_v25  ;;  %vm13926_vm7 = vmmov %vm13925_vm2 }
 0x679   : > { %v5978_v55 = vunpack.c.0.s8 %v5977_v58 }
 0x67a   : > { %8869 = vmatmul.mubr.msk.f32.vlgmr.msra.gmra.mrb[32].mxu1 %vm886_vm1, %v13389_v4 }
 0x67b   : > { %v11300_v15 = vsub.s32 %v5978_v55, %v5980_v9 }
 0x6b7   : > { %v4154_v37 = vpop.f32.mrb[18].mxu0 }
 0x6b8   : > { %v4711_v22 = vsub.f32 %v11094_v24, %v4154_v37  ;;  %v8755_v49 = vpop.f32.mrb[19].mxu0  ;;  %v11357_v37 = vld [vmem:[#allocation11 + $0x18] sm:$0xff] }
 0x6ba   : > { %v5982_v39 = vrot.slane %v4711_v22, %v11300_v15  ;;  %v5975_v33 = vcombine.high %v4711_v22, %v4711_v22  ;;  %v11359_v22 = vld [vmem:[#allocation11 + $0x20] sm:$0xff] }
 0x6bc   : > { %v5990_v16 = vcombine.high %v5982_v39, %v5982_v39  ;;  %v5989_v34 = vrot.slane %v5975_v33, %v11300_v15  ;;  %v5998_v29 = vrot.slane %v5982_v39, %v11300_v15 }
 0x6be   : > { %v6012_v0 = vrot.slane %v5990_v16, %v11300_v15  ;;  %v5991_v11 = vcombine.high %v5989_v34, %v5989_v34  ;;  %v6005_v18 = vrot.slane %v5989_v34, %v11300_v15  ;;  %v6020_v20 = vcombine.high %v5998_v29, %v5998_v29  ;;  %v11395_v16 = vld [vmem:[#allocation10 + $0x40] sm:$0xff] }
 0x6bf   : > { %v6370_v60 = vrot.slane %v5998_v29, %v11306_v7  ;;  %13396 = vst [vmem:[#allocation42_spill] sm:$0xff] %v11395_v16  ;;  %v11400_v29 = vld [vmem:[#allocation11 + $0x40] sm:$0xff] }
 0x6c0   : > { %v6022_v53 = vcombine.high %v6012_v0, %v6012_v0  ;;  %v11311_v14 = vrot.slane %v5991_v11, %v11300_v15  ;;  %v6021_v43 = vcombine.high %v6005_v18, %v6005_v18  ;;  %v6374_v40 = vrot.slane %v6012_v0, %v11306_v7 }
 0x6c1   : > { %v6378_v54 = vrot.slane %v6020_v20, %v11306_v7  ;;  %v6386_v10 = vrot.slane %v6005_v18, %v11306_v7  ;;  %v11340_v2 = vmul.f32 %v6370_v60, %v11314_v51  ;;  %v11353_v23 = vmul.f32 %v6370_v60, %v11317_v38  ;;  %v11407_v20 = vld [vmem:[#allocation10 + $0x48] sm:$0xff] }
 0x6c2   : > { %v6382_v63 = vrot.slane %v6022_v53, %v11306_v7  ;;  %v6390_v13 = vrot.slane %v11311_v14, %v11306_v7  ;;  %v11350_v26 = vrot.slane %v6021_v43, %v11306_v7  ;;  %v11362_v49 = vmul.f32 %v6374_v40, %v11321_v35  ;;  %13398 = vst [vmem:[#allocation46_spill] sm:$0xff] %v11407_v20  ;;  %v11409_v53 = vld [vmem:[#allocation10 + $0x50] sm:$0xff] }
 0x6c3   : > { %v11374_v25 = vmul.f32 %v6386_v10, %v11333_v28  ;;  %v11377_v58 = vmul.f32 %v6374_v40, %v11335_v52  ;;  %v11393_v33 = vmul.f32 %v6386_v10, %v11359_v22  ;;  %13399 = vst [vmem:[#allocation45_spill] sm:$0xff] %v11409_v53  ;;  %v11417_v40 = vld [vmem:[#allocation11 + $0x48] sm:$0xff]  ;;  %v11425_v10 = vld [vmem:[#allocation10 + $0x58] sm:$0xff] }
 0x6c4   : > { %v11390_v39 = vmul.f32 %v6382_v63, %v11357_v37  ;;  %13401 = vst [vmem:[#allocation41_spill] sm:$0xff] %v11417_v40  ;;  %13403 = vst [vmem:[#allocation47_spill] sm:$0xff] %v11425_v10 }
 0x6c5   : > { %13394 = vst [vmem:[#allocation38_spill] sm:$0xff] %v11374_v25 }
 0x6c7   : > { %v4233_v6 = vpop.f32.mrb[18].mxu1  ;;  %v4312_v30 = vpop.f32.mrb[20].mxu0 }
 0x6c8   : > { %v4712_v3 = vsub.f32 %v11100_v45, %v4233_v6  ;;  %v8760_v44 = vpop.f32.mrb[19].mxu1  ;;  %v11295_v31 = vsub.f32 %v11115_v5, %v4312_v30  ;;  %v8765_v27 = vpop.f32.mrb[21].mxu0  ;;  %v11368_v30 = vmul.f32 %v6378_v54, %v11323_v42 }
 0x6c9   : > { %v11371_v27 = vmul.f32 %v6382_v63, %v11331_v47 }
 0x6ca   : > { %v6031_v62 = vrot.slane %v4712_v3, %v11300_v15  ;;  %v6024_v24 = vcombine.high %v4712_v3, %v4712_v3  ;;  %v6073_v41 = vcombine.high %v11295_v31, %v11295_v31  ;;  %v6080_v44 = vrot.slane %v11295_v31, %v11300_v15 }
 0x6cb   : > { %13393 = vst [vmem:[#allocation37_spill] sm:$0xff] %v11371_v27 }
 0x6cc   : > { %v6039_v45 = vcombine.high %v6031_v62, %v6031_v62  ;;  %v6038_v21 = vrot.slane %v6024_v24, %v11300_v15  ;;  %v6047_v12 = vrot.slane %v6031_v62, %v11300_v15  ;;  %v6088_v18 = vcombine.high %v6080_v44, %v6080_v44 }
 0x6cd   : > { %v11405_v24 = vmul.f32 %v6390_v13, %v11379_v19 }
 0x6ce   : > { %v6061_v56 = vrot.slane %v6039_v45, %v11300_v15  ;;  %v6040_v32 = vcombine.high %v6038_v21, %v6038_v21  ;;  %v6054_v6 = vrot.slane %v6038_v21, %v11300_v15  ;;  %v6069_v3 = vcombine.high %v6047_v12, %v6047_v12  ;;  %v11415_v21 = vld [vmem:[#allocation10 + $0x60] sm:$0xff] }
 0x6cf   : > { %v6402_v31 = vrot.slane %v6047_v12, %v11306_v7  ;;  %13397 = vst [vmem:[#allocation44_spill] sm:$0xff] %v11405_v24  ;;  %v6096_v45 = vrot.slane %v6080_v44, %v11300_v15  ;;  %13400 = vst [vmem:[#allocation39_spill] sm:$0xff] %v11415_v21 }
 0x6d0   : > { %v6071_v9 = vcombine.high %v6061_v56, %v6061_v56  ;;  %v11398_v34 = vrot.slane %v6040_v32, %v11300_v15  ;;  %v6070_v0 = vcombine.high %v6054_v6, %v6054_v6  ;;  %v6406_v11 = vrot.slane %v6061_v56, %v11306_v7  ;;  %v11435_v32 = vld [vmem:[#allocation10 + $0x68] sm:$0xff] }
 0x6d1   : > { %v6410_v62 = vrot.slane %v6069_v3, %v11306_v7  ;;  %v6418_v60 = vrot.slane %v6054_v6, %v11306_v7  ;;  %v11432_v56 = vmul.f32 %v6402_v31, %v11400_v29  ;;  %13405 = vst [vmem:[#allocation29_spill] sm:$0xff] %v11435_v32  ;;  %v11437_v6 = vld [vmem:[#allocation11 + $0x50] sm:$0xff]  ;;  %v11439_v3 = vld [vmem:[#allocation11 + $0x58] sm:$0xff] }
 0x6d2   : > { %v6414_v12 = vrot.slane %v6071_v9, %v11306_v7  ;;  %13406 = vst [vmem:[#allocation30_spill] sm:$0xff] %v11437_v6  ;;  %13407 = vst [vmem:[#allocation31_spill] sm:$0xff] %v11439_v3  ;;  %v11445_v44 = vmul.f32 %v6406_v11, %v11407_v20  ;;  %v11457_v50 = vmul.f32 %v6406_v11, %v11417_v40  ;;  %v11529_v20 = vld [vmem:[#allocation10 + $0x98] sm:$0xff] }
 0x6d3   : > { %13404 = vst [vmem:[#allocation40_spill] sm:$0xff] %v11432_v56  ;;  %v11448_v9 = vmul.f32 %v6410_v62, %v11409_v53  ;;  %v11473_v11 = vmul.f32 %v6410_v62, %v11437_v6  ;;  %13430 = vst [vmem:[#allocation58_spill] sm:$0xff] %v11529_v20 }
 0x6d4   : > { %13408 = vst [vmem:[#allocation32_spill] sm:$0xff] %v11445_v44  ;;  %13412 = vst [vmem:[#allocation23_spill] sm:$0xff] %v11457_v50  ;;  %v11462_v56 = vmul.f32 %v6414_v12, %v11425_v10  ;;  %v11476_v50 = vmul.f32 %v6414_v12, %v11439_v3  ;;  %v11493_v44 = vld [vmem:[#allocation10 + $0x88] sm:$0xff] }
 0x6d5   : > { %13409 = vst [vmem:[#allocation21_spill] sm:$0xff] %v11448_v9  ;;  %13416 = vst [vmem:[#allocation36_spill] sm:$0xff] %v11473_v11 }
 0x6d6   : > { %13414 = vst [vmem:[#allocation24_spill] sm:$0xff] %v11462_v56  ;;  %13417 = vst [vmem:[#allocation25_spill] sm:$0xff] %v11476_v50 }
 0x6d7   : > { %13422 = vst [vmem:[#allocation50_spill] sm:$0xff] %v11493_v44 }
 0x6de   : > { %v4391_v17 = vpop.f32.mrb[20].mxu1 }
 0x6df   : > { %v11298_v4 = vsub.f32 %v11147_v48, %v4391_v17  ;;  %v8770_v1 = vpop.f32.mrb[21].mxu1  ;;  %v6087_v17 = vrot.slane %v6073_v41, %v11300_v15 }
 0x6e0   : > { %v11387_v1 = vmul.f32 %v6378_v54, %v11355_v36 }
 0x6e1   : > { %v6129_v43 = vrot.slane %v11298_v4, %v11300_v15  ;;  %v6089_v54 = vcombine.high %v6087_v17, %v6087_v17  ;;  %v6122_v63 = vcombine.high %v11298_v4, %v11298_v4  ;;  %v6103_v41 = vrot.slane %v6087_v17, %v11300_v15 }
 0x6e2   : > { %v11442_v4 = vrot.slane %v6070_v0, %v11306_v7  ;;  %v11454_v17 = vmul.f32 %v6418_v60, %v11415_v21  ;;  %v11459_v0 = vld [vmem:[#allocation11 + $0x68] sm:$0xff] }
 0x6e3   : > { %v6137_v24 = vcombine.high %v6129_v43, %v6129_v43  ;;  %13413 = vst [vmem:[#allocation34_spill] sm:$0xff] %v11459_v0  ;;  %v11465_v53 = vrot.slane %v6089_v54, %v11300_v15  ;;  %v6136_v9 = vrot.slane %v6122_v63, %v11300_v15  ;;  %v6119_v10 = vcombine.high %v6103_v41, %v6103_v41 }
 0x6e4   : > { %13411 = vst [vmem:[#allocation33_spill] sm:$0xff] %v11454_v17  ;;  %v11478_v17 = vld [vmem:[#allocation10 + $0x80] sm:$0xff]  ;;  %v6145_v63 = vrot.slane %v6129_v43, %v11300_v15 }
 0x6e5   : > { %13418 = vst [vmem:[#allocation26_spill] sm:$0xff] %v11478_v17  ;;  %v6159_v50 = vrot.slane %v6137_v24, %v11300_v15  ;;  %v6454_v43 = vrot.slane %v11465_v53, %v11306_v7  ;;  %v11509_v24 = vld [vmem:[#allocation11 + $0x88] sm:$0xff]  ;;  %v11516_v3 = vrot.slane %v6119_v10, %v11306_v7 }
 0x6e6   : > { %13426 = vst [vmem:[#allocation54_spill] sm:$0xff] %v11509_v24 }
 0x6e7   : > { %v6169_v40 = vcombine.high %v6159_v50, %v6159_v50 }
 0x6f6   : > { %v4470_v5 = vpop.f32.mrb[22].mxu0 }
 0x6f7   : > { %v11329_v46 = vsub.f32 %v11158_v61, %v4470_v5  ;;  %v8775_v48 = vpop.f32.mrb[23].mxu0  ;;  %v11345_v61 = vld [vmem:[#allocation10 + $0x28] sm:$0xff]  ;;  %v11421_v5 = vmul.f32 %v6402_v31, %v11395_v16  ;;  %v6110_v31 = vrot.slane %v6088_v18, %v11300_v15  ;;  %v6434_v18 = vrot.slane %v6096_v45, %v11306_v7  ;;  %v11540_v16 = vld [vmem:[#allocation11 + $0x98] sm:$0xff] }
 0x6f8   : > { %v11382_v55 = vmul.f32 %v6390_v13, %v11345_v61  ;;  %v6422_v13 = vrot.slane %v11398_v34, %v11306_v7  ;;  %v11451_v48 = vld [vmem:[#allocation11 + $0x60] sm:$0xff]  ;;  %13434 = vst [vmem:[#allocation62_spill] sm:$0xff] %v11540_v16 }
 0x6f9   : > { %13402 = vst [vmem:[#allocation48_spill] sm:$0xff] %v11421_v5  ;;  %13410 = vst [vmem:[#allocation22_spill] sm:$0xff] %v11451_v48  ;;  %v11481_v56 = vmul.f32 %v6418_v60, %v11451_v48  ;;  %v6120_v54 = vcombine.high %v6110_v31, %v6110_v31  ;;  %v6438_v62 = vrot.slane %v6110_v31, %v11306_v7  ;;  %v11495_v60 = vld [vmem:[#allocation10 + $0x90] sm:$0xff] }
 0x6fa   : > { %13395 = vst [vmem:[#allocation43_spill] sm:$0xff] %v11382_v55  ;;  %v6118_v55 = vcombine.high %v6096_v45, %v6096_v45  ;;  %v11470_v21 = vmul.f32 %v6422_v13, %v11435_v32  ;;  %v6450_v45 = vrot.slane %v6103_v41, %v11306_v7  ;;  %v11486_v32 = vmul.f32 %v6422_v13, %v11459_v0  ;;  %v11511_v0 = vld [vmem:[#allocation11 + $0x90] sm:$0xff] }
 0x6fb   : > { %13419 = vst [vmem:[#allocation49_spill] sm:$0xff] %v11481_v56  ;;  %13423 = vst [vmem:[#allocation51_spill] sm:$0xff] %v11495_v60  ;;  %v11497_v56 = vld [vmem:[#allocation11 + $0x80] sm:$0xff]  ;;  %v11502_v13 = vmul.f32 %v6434_v18, %v11478_v17  ;;  %v6138_v41 = vcombine.high %v6136_v9, %v6136_v9  ;;  %v6171_v17 = vcombine.high %v11329_v46, %v11329_v46 }
 0x6fc   : > { %13415 = vst [vmem:[#allocation35_spill] sm:$0xff] %v11470_v21  ;;  %13420 = vst [vmem:[#allocation27_spill] sm:$0xff] %v11486_v32  ;;  %v11488_v21 = vld [vmem:[#allocation10 + $0xa0] sm:$0xff]  ;;  %v6442_v12 = vrot.slane %v6118_v55, %v11306_v7  ;;  %v11507_v32 = vld [vmem:[#allocation10 + $0xa8] sm:$0xff]  ;;  %v6152_v5 = vrot.slane %v6136_v9, %v11300_v15  ;;  %v6167_v48 = vcombine.high %v6145_v63, %v6145_v63 }
 0x6fd   : > { %13421 = vst [vmem:[#allocation28_spill] sm:$0xff] %v11488_v21  ;;  %13424 = vst [vmem:[#allocation52_spill] sm:$0xff] %v11502_v13  ;;  %v11526_v13 = vmul.f32 %v6450_v45, %v11488_v21  ;;  %v11532_v10 = vmul.f32 %v6438_v62, %v11493_v44  ;;  %v11545_v21 = vmul.f32 %v6454_v43, %v11507_v32 }
 0x6fe   : > { %13425 = vst [vmem:[#allocation53_spill] sm:$0xff] %v11507_v32  ;;  %13427 = vst [vmem:[#allocation55_spill] sm:$0xff] %v11511_v0  ;;  %v11535_v6 = vmul.f32 %v6442_v12, %v11495_v60  ;;  %v11548_v9 = vmul.f32 %v6438_v62, %v11509_v24  ;;  %v11551_v44 = vmul.f32 %v6442_v12, %v11511_v0  ;;  %v11564_v62 = vld [vmem:[#allocation10 + $0xc0] sm:$0xff] }
 0x6ff   : > { %13429 = vst [vmem:[#allocation57_spill] sm:$0xff] %v11526_v13  ;;  %13431 = vst [vmem:[#allocation59_spill] sm:$0xff] %v11532_v10  ;;  %v11554_v60 = vrot.slane %v6138_v41, %v11300_v15  ;;  %v6185_v13 = vrot.slane %v6171_v17, %v11300_v15  ;;  %v5845_v10 = vld [vmem:[#allocation10 + $0x30] sm:$0xff]  ;;  %v11566_v32 = vld [vmem:[#allocation11 + $0xc0] sm:$0xff]  ;;  %v6168_v12 = vcombine.high %v6152_v5, %v6152_v5 }
 0x700   : > { %13432 = vst [vmem:[#allocation60_spill] sm:$0xff] %v11535_v6  ;;  %13436 = vst [vmem:[#allocation64_spill] sm:$0xff] %v11545_v21  ;;  %v6470_v41 = vrot.slane %v6159_v50, %v11306_v7  ;;  %v11576_v17 = vld [vmem:[#allocation10 + $0xc8] sm:$0xff] }
 0x701   : > { %13437 = vst [vmem:[#allocation65_spill] sm:$0xff] %v11548_v9  ;;  %13438 = vst [vmem:[#allocation66_spill] sm:$0xff] %v11551_v44  ;;  %v6474_v44 = vrot.slane %v6167_v48, %v11306_v7  ;;  %v6478_v9 = vrot.slane %v6169_v40, %v11306_v7  ;;  %v11586_v50 = vld [vmem:[#allocation11 + $0xc8] sm:$0xff]  ;;  %v6486_v48 = vrot.slane %v11554_v60, %v11306_v7 }
 0x702   : > { %13441 = vst [vmem:[#allocation69_spill] sm:$0xff] %v11564_v62  ;;  %13442 = vst [vmem:[#allocation70_spill] sm:$0xff] %v11566_v32  ;;  %v11596_v40 = vmul.f32 %v11350_v26, %v5845_v10 }
 0x703   : > { %13445 = vst [vmem:[#allocation73_spill] sm:$0xff] %v11576_v17  ;;  %13449 = vst [vmem:[#allocation77_spill] sm:$0xff] %v11586_v50 }
 0x704   : > { %13451 = vst [vmem:[#allocation78_spill] sm:$0xff] %v11596_v40  ;;  %v11619_v40 = vmul.f32 %v6470_v41, %v11576_v17 }
 0x706   : > { %13458 = vst [vmem:[#allocation85_spill] sm:$0xff] %v11619_v40 }
 0x707   : > { %v4549_v11 = vpop.f32.mrb[22].mxu1 }
 0x708   : > { %v11505_v31 = vsub.f32 %v11161_v8, %v4549_v11  ;;  %v8780_v55 = vpop.f32.mrb[23].mxu1  ;;  %v6178_v8 = vrot.slane %v11329_v46, %v11300_v15  ;;  %v11522_v11 = vld [vmem:[#allocation11 + $0xa0] sm:$0xff]  ;;  %v11538_v46 = vmul.f32 %v6434_v18, %v11497_v56 }
 0x709   : > { %13428 = vst [vmem:[#allocation56_spill] sm:$0xff] %v11522_v11  ;;  %v6446_v55 = vrot.slane %v6120_v54, %v11306_v7  ;;  %v11542_v54 = vld [vmem:[#allocation11 + $0xa8] sm:$0xff]  ;;  %v11557_v18 = vmul.f32 %v6450_v45, %v11522_v11  ;;  %v11584_v11 = vld [vmem:[#allocation10 + $0xe0] sm:$0xff] }
 0x70a   : > { %13433 = vst [vmem:[#allocation61_spill] sm:$0xff] %v11538_v46  ;;  %13435 = vst [vmem:[#allocation63_spill] sm:$0xff] %v11542_v54  ;;  %v6466_v46 = vrot.slane %v6145_v63, %v11306_v7  ;;  %v6186_v6 = vcombine.high %v6178_v8, %v6178_v8  ;;  %v11574_v63 = vmul.f32 %v6454_v43, %v11542_v54  ;;  %v11600_v54 = vld [vmem:[#allocation11 + $0xd0] sm:$0xff] }
 0x70b   : > { %13439 = vst [vmem:[#allocation67_spill] sm:$0xff] %v11557_v18  ;;  %v11562_v21 = vmul.f32 %v6446_v55, %v11529_v20  ;;  %v11571_v45 = vmul.f32 %v6446_v55, %v11540_v16  ;;  %v11578_v18 = vld [vmem:[#allocation10 + $0xd0] sm:$0xff]  ;;  %v6482_v20 = vrot.slane %v6152_v5, %v11306_v7  ;;  %13448 = vst [vmem:[#allocation76_spill] sm:$0xff] %v11584_v11  ;;  %v11598_v5 = vld [vmem:[#allocation10 + $0xe8] sm:$0xff] }
 0x70c   : > { %13444 = vst [vmem:[#allocation72_spill] sm:$0xff] %v11574_v63  ;;  %13446 = vst [vmem:[#allocation74_spill] sm:$0xff] %v11578_v18  ;;  %v6194_v43 = vrot.slane %v6178_v8, %v11300_v15  ;;  %v13450_v55 = vcombine.high %v11311_v14, %v11311_v14  ;;  %v11605_v16 = vmul.f32 %v6466_v46, %v11564_v62  ;;  %v11611_v14 = vld [vmem:[#allocation11 + $0xe0] sm:$0xff] }
 0x70d   : > { %13440 = vst [vmem:[#allocation68_spill] sm:$0xff] %v11562_v21  ;;  %13443 = vst [vmem:[#allocation71_spill] sm:$0xff] %v11571_v45  ;;  %v11582_v21 = vld [vmem:[#allocation10 + $0xd8] sm:$0xff]  ;;  %v11608_v0 = vmul.f32 %v6466_v46, %v11566_v32  ;;  %v6187_v8 = vcombine.high %v6185_v13, %v6185_v13  ;;  %v6208_v24 = vrot.slane %v6186_v6, %v11300_v15 }
 0x70e   : > { %13447 = vst [vmem:[#allocation75_spill] sm:$0xff] %v11582_v21  ;;  %v6398_v63 = vrot.slane %v13450_v55, %v11306_v7  ;;  %13452 = vst [vmem:[#allocation79_spill] sm:$0xff] %v11598_v5  ;;  %v11602_v45 = vld [vmem:[#allocation11 + $0xd8] sm:$0xff]  ;;  %v11616_v55 = vrot.slane %v6168_v12, %v11306_v7  ;;  %v11622_v62 = vmul.f32 %v6474_v44, %v11578_v18 }
 0x70f   : > { %13453 = vst [vmem:[#allocation80_spill] sm:$0xff] %v11600_v54  ;;  %13454 = vst [vmem:[#allocation81_spill] sm:$0xff] %v11602_v45  ;;  %v11627_v46 = vmul.f32 %v6478_v9, %v11582_v21  ;;  %v11630_v6 = vmul.f32 %v6482_v20, %v11584_v11  ;;  %v6201_v12 = vrot.slane %v6185_v13, %v11300_v15  ;;  %v11645_v21 = vld [vmem:[#allocation11 + $0x30] sm:$0xff] }
 0x710   : > { %13455 = vst [vmem:[#allocation82_spill] sm:$0xff] %v11605_v16  ;;  %13456 = vst [vmem:[#allocation83_spill] sm:$0xff] %v11608_v0  ;;  %v11624_v16 = vld [vmem:[#allocation11 + $0xe8] sm:$0xff]  ;;  %v11633_v0 = vmul.f32 %v6470_v41, %v11586_v50  ;;  %v11637_v10 = vmul.f32 %v6486_v48, %v11598_v5  ;;  %v11640_v40 = vmul.f32 %v6474_v44, %v11600_v54  ;;  %v5853_v5 = vld [vmem:[#allocation10 + $0x70] sm:$0xff] }
 0x711   : > { %13457 = vst [vmem:[#allocation84_spill] sm:$0xff] %v11611_v14  ;;  %13459 = vst [vmem:[#allocation86_spill] sm:$0xff] %v11622_v62  ;;  %v11643_v18 = vmul.f32 %v6478_v9, %v11602_v45  ;;  %v6216_v62 = vcombine.high %v6194_v43, %v6194_v43  ;;  %v11648_v11 = vmul.f32 %v6482_v20, %v11611_v14 }
 0x712   : > { %13460 = vst [vmem:[#allocation87_spill] sm:$0xff] %v11624_v16  ;;  %13461 = vst [vmem:[#allocation88_spill] sm:$0xff] %v11627_v46  ;;  %v5846_v46 = vld [vmem:[#allocation10 + $0x38] sm:$0xff]  ;;  %v11651_v41 = vrot.slane %v6187_v8, %v11300_v15  ;;  %v6218_v13 = vcombine.high %v6208_v24, %v6208_v24  ;;  %v13468_v44 = vcombine.high %v11398_v34, %v11398_v34 }
 0x713   : > { %13462 = vst [vmem:[#allocation89_spill] sm:$0xff] %v11630_v6  ;;  %13463 = vst [vmem:[#allocation90_spill] sm:$0xff] %v11633_v0  ;;  %v5910_v0 = vld [vmem:[#allocation11 + $0x38] sm:$0xff]  ;;  %v11658_v9 = vmul.f32 %v6486_v48, %v11624_v16  ;;  %v6220_v20 = vcombine.high %v11505_v31, %v11505_v31  ;;  %v6227_v8 = vrot.slane %v11505_v31, %v11300_v15  ;;  %v11667_v6 = vld [vmem:[#allocation10 + $0x100] sm:$0xff] }
 0x714   : > { %13464 = vst [vmem:[#allocation91_spill] sm:$0xff] %v11637_v10  ;;  %13465 = vst [vmem:[#allocation92_spill] sm:$0xff] %v11640_v40  ;;  %v6430_v10 = vrot.slane %v13468_v44, %v11306_v7  ;;  %v5854_v40 = vld [vmem:[#allocation10 + $0x78] sm:$0xff]  ;;  %v6217_v17 = vcombine.high %v6201_v12, %v6201_v12  ;;  %v6502_v34 = vrot.slane %v6208_v24, %v11306_v7  ;;  %v11678_v16 = vld [vmem:[#allocation11 + $0x100] sm:$0xff] }
 0x715   : > { %13466 = vst [vmem:[#allocation93_spill] sm:$0xff] %v11643_v18  ;;  %13467 = vst [vmem:[#allocation94_spill] sm:$0xff] %v11648_v11  ;;  %v6498_v18 = vrot.slane %v6194_v43, %v11306_v7  ;;  %v11665_v11 = vld [vmem:[#allocation11 + $0x70] sm:$0xff]  ;;  %v11670_v44 = vmul.f32 %v6398_v63, %v5846_v46  ;;  %v11674_v48 = vmul.f32 %v11350_v26, %v11645_v21  ;;  %v5918_v43 = vld [vmem:[#allocation11 + $0x78] sm:$0xff] }
 0x716   : > { %13469 = vst [vmem:[#allocation95_spill] sm:$0xff] %v11658_v9  ;;  %13470 = vst [vmem:[#allocation96_spill] sm:$0xff] %v11667_v6  ;;  %v11676_v9 = vld [vmem:[#allocation10 + $0x108] sm:$0xff]  ;;  %v6506_v31 = vrot.slane %v6216_v62, %v11306_v7  ;;  %v6514_v45 = vrot.slane %v6201_v12, %v11306_v7  ;;  %v11682_v14 = vmul.f32 %v6398_v63, %v5910_v0  ;;  %v11687_v24 = vld [vmem:[#allocation10 + $0x110] sm:$0xff] }
 0x717   : > { %13471 = vst [vmem:[#allocation97_spill] sm:$0xff] %v11670_v44  ;;  %13472 = vst [vmem:[#allocation98_spill] sm:$0xff] %v11674_v48  ;;  %v11685_v54 = vmul.f32 %v11442_v4, %v5853_v5  ;;  %v11689_v46 = vld [vmem:[#allocation10 + $0x120] sm:$0xff]  ;;  %v11691_v26 = vld [vmem:[#allocation11 + $0x108] sm:$0xff]  ;;  %v6510_v44 = vrot.slane %v6218_v13, %v11306_v7  ;;  %v6518_v48 = vrot.slane %v11651_v41, %v11306_v7 }
 0x718   : > { %13473 = vst [vmem:[#allocation99_spill] sm:$0xff] %v11676_v9  ;;  %13474 = vst [vmem:[#allocation100_spill] sm:$0xff] %v11682_v14  ;;  %v11696_v50 = vmul.f32 %v6430_v10, %v5854_v40  ;;  %v11700_v0 = vmul.f32 %v11442_v4, %v11665_v11  ;;  %v11702_v62 = vld [vmem:[#allocation10 + $0x118] sm:$0xff]  ;;  %v11704_v63 = vld [vmem:[#allocation10 + $0x128] sm:$0xff]  ;;  %v11709_v12 = vmul.f32 %v6498_v18, %v11667_v6 }
 0x719   : > { %13475 = vst [vmem:[#allocation101_spill] sm:$0xff] %v11685_v54  ;;  %13476 = vst [vmem:[#allocation102_spill] sm:$0xff] %v11687_v24  ;;  %v11706_v5 = vld [vmem:[#allocation11 + $0x110] sm:$0xff]  ;;  %v6234_v13 = vrot.slane %v6220_v20, %v11300_v15  ;;  %v6235_v54 = vcombine.high %v6227_v8, %v6227_v8  ;;  %v11712_v14 = vmul.f32 %v6430_v10, %v5918_v43  ;;  %v11714_v40 = vld [vmem:[#allocation11 + $0x118] sm:$0xff] }
 0x71a   : > { %13477 = vst [vmem:[#allocation103_spill] sm:$0xff] %v11689_v46  ;;  %13478 = vst [vmem:[#allocation104_spill] sm:$0xff] %v11696_v50  ;;  %v6219_v4 = vcombine.high %v11651_v41, %v11651_v41  ;;  %v6522_v50 = vrot.slane %v6217_v17, %v11306_v7  ;;  %v11723_v32 = vmul.f32 %v6498_v18, %v11678_v16  ;;  %v11725_v6 = vld [vmem:[#allocation11 + $0x120] sm:$0xff]  ;;  %v5861_v17 = vld [vmem:[#allocation10 + $0xb0] sm:$0xff] }
 0x71b   : > { %13479 = vst [vmem:[#allocation105_spill] sm:$0xff] %v11700_v0  ;;  %13480 = vst [vmem:[#allocation106_spill] sm:$0xff] %v11702_v62  ;;  %v11720_v0 = vmul.f32 %v6502_v34, %v11676_v9  ;;  %v11730_v10 = vmul.f32 %v6506_v31, %v11687_v24  ;;  %v11733_v20 = vmul.f32 %v6514_v45, %v11689_v46 }
 0x71c   : > { %13481 = vst [vmem:[#allocation107_spill] sm:$0xff] %v11704_v63  ;;  %13482 = vst [vmem:[#allocation108_spill] sm:$0xff] %v11706_v5  ;;  %v11736_v41 = vmul.f32 %v6502_v34, %v11691_v26  ;;  %v13493_v43 = vcombine.high %v11465_v53, %v11465_v53  ;;  %v11749_v24 = vmul.f32 %v6506_v31, %v11706_v5  ;;  %v5862_v34 = vld [vmem:[#allocation10 + $0xb8] sm:$0xff] }
 0x71d   : > { %13483 = vst [vmem:[#allocation109_spill] sm:$0xff] %v11709_v12  ;;  %13484 = vst [vmem:[#allocation110_spill] sm:$0xff] %v11712_v14  ;;  %v11727_v12 = vld [vmem:[#allocation11 + $0x128] sm:$0xff]  ;;  %v11743_v14 = vmul.f32 %v6510_v44, %v11702_v62  ;;  %v6243_v46 = vrot.slane %v6227_v8, %v11300_v15  ;;  %v6236_v9 = vcombine.high %v6234_v13, %v6234_v13  ;;  %v11838_v5 = vld [vmem:[#allocation11 + $0x158] sm:$0xff] }
 0x71e   : > { %13485 = vst [vmem:[#allocation111_spill] sm:$0xff] %v11714_v40  ;;  %13486 = vst [vmem:[#allocation112_spill] sm:$0xff] %v11720_v0  ;;  %v6462_v18 = vrot.slane %v13493_v43, %v11306_v7  ;;  %v6257_v53 = vrot.slane %v6235_v54, %v11300_v15  ;;  %v11762_v31 = vmul.f32 %v6514_v45, %v11725_v6  ;;  %v5942_v45 = vld [vmem:[#allocation11 + $0x138] sm:$0xff] }
 0x71f   : > { %13487 = vst [vmem:[#allocation113_spill] sm:$0xff] %v11723_v32  ;;  %13488 = vst [vmem:[#allocation114_spill] sm:$0xff] %v11725_v6  ;;  %v11746_v32 = vmul.f32 %v6518_v48, %v11704_v63  ;;  %v11759_v63 = vld [vmem:[#allocation11 + $0x130] sm:$0xff]  ;;  %v11765_v8 = vmul.f32 %v6518_v48, %v11727_v12  ;;  %v6250_v54 = vrot.slane %v6234_v13, %v11300_v15 }
 0x720   : > { %13489 = vst [vmem:[#allocation115_spill] sm:$0xff] %v11727_v12  ;;  %13490 = vst [vmem:[#allocation116_spill] sm:$0xff] %v11730_v10  ;;  %v11773_v10 = vmul.f32 %v6462_v18, %v5862_v34  ;;  %v6265_v0 = vcombine.high %v6243_v46, %v6243_v46  ;;  %v11778_v48 = vmul.f32 %v6522_v50, %v11759_v63 }
 0x721   : > { %13491 = vst [vmem:[#allocation117_spill] sm:$0xff] %v11733_v20  ;;  %13492 = vst [vmem:[#allocation118_spill] sm:$0xff] %v11736_v41  ;;  %v4628_v20 = vpop.f32.mrb[24].mxu0  ;;  %v11753_v41 = vmul.f32 %v6510_v44, %v11714_v40  ;;  %v6526_v44 = vrot.slane %v6219_v4, %v11306_v7  ;;  %v6264_v13 = vrot.slane %v6236_v9, %v11300_v15  ;;  %v11834_v40 = vld [vmem:[#allocation10 + $0x168] sm:$0xff] }
 0x722   : > { %13494 = vst [vmem:[#allocation119_spill] sm:$0xff] %v11743_v14  ;;  %13495 = vst [vmem:[#allocation120_spill] sm:$0xff] %v11746_v32  ;;  %v4717_v43 = vsub.f32 %v11177_v57, %v4628_v20  ;;  %v8785_v62 = vpop.f32.mrb[25].mxu0  ;;  %v11757_v14 = vld [vmem:[#allocation11 + $0xb0] sm:$0xff]  ;;  %v5878_v20 = vld [vmem:[#allocation10 + $0x138] sm:$0xff]  ;;  %v6530_v34 = vrot.slane %v6243_v46, %v11306_v7  ;;  %v6266_v9 = vcombine.high %v6250_v54, %v6250_v54 }
 0x723   : > { %13496 = vst [vmem:[#allocation121_spill] sm:$0xff] %v11749_v24  ;;  %13497 = vst [vmem:[#allocation122_spill] sm:$0xff] %v11753_v41  ;;  %v5877_v32 = vld [vmem:[#allocation10 + $0x130] sm:$0xff]  ;;  %v11769_v41 = vmul.f32 %v11516_v3, %v5861_v17  ;;  %v5926_v24 = vld [vmem:[#allocation11 + $0xb8] sm:$0xff]  ;;  %v11782_v4 = vmul.f32 %v11516_v3, %v11757_v14  ;;  %v13508_v3 = vcombine.high %v11554_v60, %v11554_v60 }
 0x724   : > { %13498 = vst [vmem:[#allocation123_spill] sm:$0xff] %v11759_v63  ;;  %13499 = vst [vmem:[#allocation124_spill] sm:$0xff] %v11762_v31  ;;  %v6269_v57 = vcombine.high %v4717_v43, %v4717_v43  ;;  %v6276_v62 = vrot.slane %v4717_v43, %v11300_v15  ;;  %v11775_v31 = vmul.f32 %v6522_v50, %v5877_v32  ;;  %v5869_v17 = vld [vmem:[#allocation10 + $0xf0] sm:$0xff]  ;;  %v5870_v63 = vld [vmem:[#allocation10 + $0xf8] sm:$0xff] }
 0x725   : > { %13500 = vst [vmem:[#allocation125_spill] sm:$0xff] %v11765_v8  ;;  %13501 = vst [vmem:[#allocation126_spill] sm:$0xff] %v11769_v41  ;;  %v6267_v41 = vcombine.high %v6257_v53, %v6257_v53  ;;  %v11789_v32 = vmul.f32 %v6526_v44, %v5878_v20  ;;  %v6494_v50 = vrot.slane %v13508_v3, %v11306_v7  ;;  %v5934_v46 = vld [vmem:[#allocation11 + $0xf8] sm:$0xff]  ;;  %v11805_v20 = vld [vmem:[#allocation10 + $0x148] sm:$0xff] }
 0x726   : > { %13502 = vst [vmem:[#allocation127_spill] sm:$0xff] %v11773_v10  ;;  %13503 = vst [vmem:[#allocation128_spill] sm:$0xff] %v11775_v31  ;;  %v6283_v43 = vrot.slane %v6269_v57, %v11300_v15  ;;  %v6284_v8 = vcombine.high %v6276_v62, %v6276_v62  ;;  %v11787_v10 = vld [vmem:[#allocation11 + $0xf0] sm:$0xff]  ;;  %v11791_v31 = vmul.f32 %v6462_v18, %v5926_v24  ;;  %v11807_v24 = vld [vmem:[#allocation11 + $0x140] sm:$0xff] }
 0x727   : > { %13504 = vst [vmem:[#allocation129_spill] sm:$0xff] %v11778_v48  ;;  %13505 = vst [vmem:[#allocation130_spill] sm:$0xff] %v11782_v4  ;;  %v11797_v4 = vld [vmem:[#allocation10 + $0x140] sm:$0xff]  ;;  %v6534_v48 = vrot.slane %v6257_v53, %v11306_v7  ;;  %v11800_v57 = vmul.f32 %v6526_v44, %v5942_v45  ;;  %v11803_v12 = vmul.f32 %v11616_v55, %v5869_v17  ;;  %v11813_v53 = vld [vmem:[#allocation10 + $0x150] sm:$0xff] }
 0x728   : > { %13506 = vst [vmem:[#allocation131_spill] sm:$0xff] %v11789_v32  ;;  %13507 = vst [vmem:[#allocation132_spill] sm:$0xff] %v11791_v31  ;;  %v6538_v18 = vrot.slane %v6265_v0, %v11306_v7  ;;  %v6546_v60 = vrot.slane %v6250_v54, %v11306_v7  ;;  %v6292_v3 = vrot.slane %v6276_v62, %v11300_v15  ;;  %v11815_v44 = vld [vmem:[#allocation10 + $0x160] sm:$0xff]  ;;  %v11824_v0 = vld [vmem:[#allocation11 + $0x148] sm:$0xff] }
 0x729   : > { %13509 = vst [vmem:[#allocation133_spill] sm:$0xff] %v11797_v4  ;;  %13510 = vst [vmem:[#allocation134_spill] sm:$0xff] %v11800_v57  ;;  %v6306_v32 = vrot.slane %v6284_v8, %v11300_v15  ;;  %v6268_v45 = vcombine.high %v6264_v13, %v6264_v13  ;;  %v6542_v17 = vrot.slane %v6267_v41, %v11306_v7  ;;  %v11822_v57 = vld [vmem:[#allocation10 + $0x158] sm:$0xff]  ;;  %v11836_v41 = vld [vmem:[#allocation11 + $0x150] sm:$0xff] }
 0x72a   : > { %13511 = vst [vmem:[#allocation135_spill] sm:$0xff] %v11803_v12  ;;  %13512 = vst [vmem:[#allocation136_spill] sm:$0xff] %v11805_v20  ;;  %v6285_v12 = vcombine.high %v6283_v43, %v6283_v43  ;;  %v11820_v31 = vmul.f32 %v11616_v55, %v11787_v10  ;;  %v6550_v54 = vrot.slane %v6264_v13, %v11306_v7 }
 0x72b   : > { %13513 = vst [vmem:[#allocation137_spill] sm:$0xff] %v11807_v24  ;;  %13514 = vst [vmem:[#allocation138_spill] sm:$0xff] %v11813_v53  ;;  %v11828_v8 = vmul.f32 %v6530_v34, %v11797_v4  ;;  %v11830_v62 = vmul.f32 %v6494_v50, %v5870_v63  ;;  %v11832_v6 = vmul.f32 %v6494_v50, %v5934_v46  ;;  %v11848_v63 = vld [vmem:[#allocation11 + $0x160] sm:$0xff]  ;;  %v11850_v50 = vld [vmem:[#allocation11 + $0x168] sm:$0xff] }
 0x72c   : > { %13515 = vst [vmem:[#allocation139_spill] sm:$0xff] %v11815_v44  ;;  %13516 = vst [vmem:[#allocation140_spill] sm:$0xff] %v11820_v31  ;;  %v6554_v55 = vrot.slane %v6266_v9, %v11306_v7  ;;  %v11842_v31 = vmul.f32 %v6534_v48, %v11805_v20  ;;  %v11845_v13 = vmul.f32 %v6530_v34, %v11807_v24  ;;  %v11921_v24 = vld [vmem:[#allocation11 + $0x190] sm:$0xff] }
 0x72d   : > { %13517 = vst [vmem:[#allocation141_spill] sm:$0xff] %v11822_v57  ;;  %13518 = vst [vmem:[#allocation142_spill] sm:$0xff] %v11824_v0  ;;  %v6299_v4 = vrot.slane %v6283_v43, %v11300_v15  ;;  %v11853_v46 = vmul.f32 %v6538_v18, %v11813_v53  ;;  %v6316_v9 = vcombine.high %v6306_v32, %v6306_v32 }
 0x72e   : > { %13519 = vst [vmem:[#allocation143_spill] sm:$0xff] %v11828_v8  ;;  %13520 = vst [vmem:[#allocation144_spill] sm:$0xff] %v11830_v62  ;;  %v11856_v62 = vmul.f32 %v6546_v60, %v11815_v44  ;;  %v11859_v20 = vmul.f32 %v6542_v17, %v11822_v57  ;;  %v11862_v34 = vmul.f32 %v6534_v48, %v11824_v0  ;;  %v5886_v48 = vld [vmem:[#allocation10 + $0x178] sm:$0xff] }
 0x72f   : > { %13521 = vst [vmem:[#allocation145_spill] sm:$0xff] %v11832_v6  ;;  %13522 = vst [vmem:[#allocation146_spill] sm:$0xff] %v11834_v40  ;;  %v6314_v6 = vcombine.high %v6292_v3, %v6292_v3  ;;  %v6313_v43 = vrot.slane %v6285_v12, %v11300_v15  ;;  %v11867_v8 = vmul.f32 %v6550_v54, %v11834_v40 }
 0x730   : > { %13523 = vst [vmem:[#allocation147_spill] sm:$0xff] %v11836_v41  ;;  %13524 = vst [vmem:[#allocation148_spill] sm:$0xff] %v11838_v5  ;;  %v11870_v53 = vmul.f32 %v6538_v18, %v11836_v41  ;;  %v11873_v44 = vmul.f32 %v6542_v17, %v11838_v5  ;;  %v6562_v57 = vrot.slane %v6292_v3, %v11306_v7  ;;  %v5950_v17 = vld [vmem:[#allocation11 + $0x178] sm:$0xff]  ;;  %v11891_v3 = vld [vmem:[#allocation10 + $0x190] sm:$0xff] }
 0x731   : > { %13525 = vst [vmem:[#allocation149_spill] sm:$0xff] %v11842_v31  ;;  %13526 = vst [vmem:[#allocation150_spill] sm:$0xff] %v11845_v13  ;;  %v5885_v13 = vld [vmem:[#allocation10 + $0x170] sm:$0xff]  ;;  %v6558_v31 = vrot.slane %v6268_v45, %v11306_v7  ;;  %v11882_v12 = vmul.f32 %v6550_v54, %v11850_v50  ;;  %v11884_v45 = vld [vmem:[#allocation10 + $0x180] sm:$0xff]  ;;  %v6315_v18 = vcombine.high %v6299_v4, %v6299_v4  ;;  %v4707_v54 = vpop.f32.mrb[24].mxu1 }
 0x732   : > { %13527 = vst [vmem:[#allocation151_spill] sm:$0xff] %v11848_v63  ;;  %13528 = vst [vmem:[#allocation152_spill] sm:$0xff] %v11850_v50  ;;  %v6566_v40 = vrot.slane %v6306_v32, %v11306_v7  ;;  %v11898_v50 = vld [vmem:[#allocation10 + $0x198] sm:$0xff]  ;;  %v11902_v5 = vld [vmem:[#allocation11 + $0x188] sm:$0xff]  ;;  %v6582_v32 = vrot.slane %v6313_v43, %v11306_v7  ;;  %v8790_v41 = vpop.f32.mrb[25].mxu1 }
 0x733   : > { %13529 = vst [vmem:[#allocation153_spill] sm:$0xff] %v11853_v46  ;;  %13530 = vst [vmem:[#allocation154_spill] sm:$0xff] %v11856_v62  ;;  %v11900_v46 = vld [vmem:[#allocation10 + $0x1a0] sm:$0xff]  ;;  %v4718_v62 = vsub.f32 %v11179_v59, %v4707_v54  ;;  %v11906_v0 = vmul.f32 %v6558_v31, %v5886_v48  ;;  %v11923_v59 = vld [vmem:[#allocation11 + $0x198] sm:$0xff] }
 0x734   : > { %13531 = vst [vmem:[#allocation155_spill] sm:$0xff] %v11859_v20  ;;  %13532 = vst [vmem:[#allocation156_spill] sm:$0xff] %v11862_v34  ;;  %v11876_v20 = vld [vmem:[#allocation11 + $0x170] sm:$0xff]  ;;  %v11879_v34 = vmul.f32 %v6546_v60, %v11848_v63  ;;  %v6574_v60 = vrot.slane %v6316_v9, %v11306_v7  ;;  %v11914_v9 = vmul.f32 %v6562_v57, %v11884_v45  ;;  %v11925_v41 = vld [vmem:[#allocation11 + $0x1a0] sm:$0xff] }
 0x735   : > { %13533 = vst [vmem:[#allocation157_spill] sm:$0xff] %v11867_v8  ;;  %13534 = vst [vmem:[#allocation158_spill] sm:$0xff] %v11870_v53  ;;  %v11886_v8 = vld [vmem:[#allocation11 + $0x180] sm:$0xff]  ;;  %v6570_v53 = vrot.slane %v6314_v6, %v11306_v7  ;;  %v11909_v6 = vmul.f32 %v6554_v55, %v11876_v20  ;;  %v11919_v63 = vmul.f32 %v6558_v31, %v5950_v17 }
 0x736   : > { %13535 = vst [vmem:[#allocation159_spill] sm:$0xff] %v11873_v44  ;;  %13536 = vst [vmem:[#allocation160_spill] sm:$0xff] %v11879_v34  ;;  %v11889_v44 = vld [vmem:[#allocation10 + $0x188] sm:$0xff]  ;;  %v6578_v34 = vrot.slane %v6299_v4, %v11306_v7  ;;  %v6325_v54 = vrot.slane %v4718_v62, %v11300_v15  ;;  %v11936_v31 = vmul.f32 %v6574_v60, %v11898_v50 }
 0x737   : > { %13537 = vst [vmem:[#allocation161_spill] sm:$0xff] %v11882_v12  ;;  %13538 = vst [vmem:[#allocation162_spill] sm:$0xff] %v11884_v45  ;;  %v11896_v12 = vmul.f32 %v6554_v55, %v5885_v13  ;;  %v11911_v4 = vld [vmem:[#allocation10 + $0x1a8] sm:$0xff]  ;;  %v6317_v13 = vcombine.high %v6313_v43, %v6313_v43  ;;  %v6586_v55 = vrot.slane %v6315_v18, %v11306_v7 }
 0x738   : > { %13539 = vst [vmem:[#allocation163_spill] sm:$0xff] %v11886_v8  ;;  %13540 = vst [vmem:[#allocation164_spill] sm:$0xff] %v11889_v44  ;;  %v11929_v48 = vmul.f32 %v6566_v40, %v11889_v44  ;;  %v6318_v43 = vcombine.high %v4718_v62, %v4718_v62  ;;  %v11942_v17 = vmul.f32 %v6566_v40, %v11902_v5  ;;  %v11995_v45 = vld [vmem:[#allocation10 + $0x1e8] sm:$0xff] }
 0x739   : > { %13541 = vst [vmem:[#allocation165_spill] sm:$0xff] %v11891_v3  ;;  %13542 = vst [vmem:[#allocation166_spill] sm:$0xff] %v11896_v12  ;;  %v11917_v12 = vmul.f32 %v6562_v57, %v11886_v8  ;;  %v11939_v57 = vmul.f32 %v6578_v34, %v11900_v46  ;;  %v11947_v18 = vmul.f32 %v6582_v32, %v11911_v4 }
 0x73a   : > { %13543 = vst [vmem:[#allocation167_spill] sm:$0xff] %v11898_v50  ;;  %13544 = vst [vmem:[#allocation168_spill] sm:$0xff] %v11900_v46  ;;  %v6333_v62 = vcombine.high %v6325_v54, %v6325_v54  ;;  %v5893_v50 = vld [vmem:[#allocation10 + $0x1b0] sm:$0xff]  ;;  %v11957_v46 = vmul.f32 %v6574_v60, %v11923_v59  ;;  %v11960_v40 = vmul.f32 %v6578_v34, %v11925_v41  ;;  %v5894_v60 = vld [vmem:[#allocation10 + $0x1b8] sm:$0xff] }
 0x73b   : > { %13545 = vst [vmem:[#allocation169_spill] sm:$0xff] %v11902_v5  ;;  %13546 = vst [vmem:[#allocation170_spill] sm:$0xff] %v11906_v0  ;;  %v11933_v0 = vmul.f32 %v6570_v53, %v11891_v3  ;;  %v11951_v3 = vld [vmem:[#allocation11 + $0x1b0] sm:$0xff] }
 0x73c   : > { %13547 = vst [vmem:[#allocation171_spill] sm:$0xff] %v11909_v6  ;;  %13548 = vst [vmem:[#allocation172_spill] sm:$0xff] %v11911_v4  ;;  %v6332_v6 = vrot.slane %v6318_v43, %v11300_v15  ;;  %v11972_v34 = vmul.f32 %v6586_v55, %v11951_v3 }
 0x73d   : > { %13549 = vst [vmem:[#allocation173_spill] sm:$0xff] %v11914_v9  ;;  %13550 = vst [vmem:[#allocation174_spill] sm:$0xff] %v11917_v12  ;;  %v6341_v12 = vrot.slane %v6325_v54, %v11300_v15  ;;  %v6355_v54 = vrot.slane %v6333_v62, %v11300_v15 }
 0x73e   : > { %13551 = vst [vmem:[#allocation175_spill] sm:$0xff] %v11919_v63  ;;  %13552 = vst [vmem:[#allocation176_spill] sm:$0xff] %v11921_v24  ;;  %v11944_v63 = vld [vmem:[#allocation11 + $0x1a8] sm:$0xff]  ;;  %v6334_v4 = vcombine.high %v6332_v6, %v6332_v6  ;;  %v6348_v43 = vrot.slane %v6332_v6, %v11300_v15  ;;  %v11978_v6 = vld [vmem:[#allocation11 + $0x1c0] sm:$0xff] }
 0x73f   : > { %13553 = vst [vmem:[#allocation177_spill] sm:$0xff] %v11923_v59  ;;  %13554 = vst [vmem:[#allocation178_spill] sm:$0xff] %v11925_v41  ;;  %v6363_v44 = vcombine.high %v6341_v12, %v6341_v12  ;;  %v6365_v62 = vcombine.high %v6355_v54, %v6355_v54 }
 0x740   : > { %13555 = vst [vmem:[#allocation179_spill] sm:$0xff] %v11929_v48  ;;  %13556 = vst [vmem:[#allocation180_spill] sm:$0xff] %v11933_v0  ;;  %v11966_v48 = vmul.f32 %v6582_v32, %v11944_v63  ;;  %v6364_v32 = vcombine.high %v6348_v43, %v6348_v43 }
 0x741   : > { %13557 = vst [vmem:[#allocation181_spill] sm:$0xff] %v11936_v31  ;;  %13558 = vst [vmem:[#allocation182_spill] sm:$0xff] %v11939_v57  ;;  %v11954_v31 = vmul.f32 %v6570_v53, %v11921_v24  ;;  %v6594_v53 = vrot.slane %v6341_v12, %v11306_v7  ;;  %v6598_v12 = vrot.slane %v6355_v54, %v11306_v7 }
 0x742   : > { %13559 = vst [vmem:[#allocation183_spill] sm:$0xff] %v11942_v17  ;;  %13560 = vst [vmem:[#allocation184_spill] sm:$0xff] %v11944_v63  ;;  %v5345_v17 = vpop.f32.mrb[26].mxu0  ;;  %v6606_v54 = vrot.slane %v6365_v62, %v11306_v7  ;;  %v12013_v8 = vrot.slane %v6364_v32, %v11306_v7  ;;  %v12033_v32 = vld [vmem:[#allocation11 + $0x1e8] sm:$0xff] }
 0x743   : > { %13561 = vst [vmem:[#allocation185_spill] sm:$0xff] %v11947_v18  ;;  %13562 = vst [vmem:[#allocation186_spill] sm:$0xff] %v11951_v3  ;;  %v6590_v18 = vrot.slane %v6317_v13, %v11306_v7  ;;  %v8835_v0 = vpop.f32.mrb[27].mxu0  ;;  %v11974_v13 = vld [vmem:[#allocation10 + $0x1c0] sm:$0xff]  ;;  %v6759_v3 = vcombine.high %v5345_v17, %v5345_v17  ;;  %v6766_v63 = vrot.slane %v5345_v17, %v11300_v15 }
 0x744   : > { %13563 = vst [vmem:[#allocation187_spill] sm:$0xff] %v11954_v31  ;;  %13564 = vst [vmem:[#allocation188_spill] sm:$0xff] %v11957_v46  ;;  %v5958_v46 = vld [vmem:[#allocation11 + $0x1b8] sm:$0xff]  ;;  %v11969_v31 = vmul.f32 %v6586_v55, %v5893_v50  ;;  %v11981_v0 = vrot.slane %v6334_v4, %v11300_v15  ;;  %v11986_v50 = vld [vmem:[#allocation10 + $0x1e0] sm:$0xff]  ;;  %v6602_v55 = vrot.slane %v6363_v44, %v11306_v7  ;;  %v5485_v59 = vpop.f32.mrb[28].mxu0 }
 0x745   : > { %13565 = vst [vmem:[#allocation189_spill] sm:$0xff] %v11960_v40  ;;  %13566 = vst [vmem:[#allocation190_spill] sm:$0xff] %v11966_v48  ;;  %v11976_v40 = vld [vmem:[#allocation10 + $0x1c8] sm:$0xff]  ;;  %v11984_v48 = vld [vmem:[#allocation10 + $0x1d0] sm:$0xff]  ;;  %v8845_v9 = vpop.f32.mrb[29].mxu0  ;;  %v12000_v24 = vmul.f32 %v6590_v18, %v5894_v60  ;;  %v12002_v5 = vmul.f32 %v6590_v18, %v5958_v46  ;;  %v12016_v62 = vmul.f32 %v6594_v53, %v11974_v13 }
 0x746   : > { %13567 = vst [vmem:[#allocation191_spill] sm:$0xff] %v11969_v31  ;;  %13568 = vst [vmem:[#allocation192_spill] sm:$0xff] %v11972_v34  ;;  %v11988_v31 = vld [vmem:[#allocation11 + $0x1c8] sm:$0xff]  ;;  %v6610_v34 = vrot.slane %v6348_v43, %v11306_v7  ;;  %v11993_v4 = vld [vmem:[#allocation10 + $0x1d8] sm:$0xff]  ;;  %v6614_v57 = vrot.slane %v11981_v0, %v11306_v7  ;;  %v12019_v9 = vmul.f32 %v6594_v53, %v11978_v6 }
 0x747   : > { %13569 = vst [vmem:[#allocation193_spill] sm:$0xff] %v11976_v40  ;;  %13570 = vst [vmem:[#allocation194_spill] sm:$0xff] %v11981_v0  ;;  %v12004_v44 = vld [vmem:[#allocation11 + $0x1d0] sm:$0xff]  ;;  %v12006_v43 = vld [vmem:[#allocation11 + $0x1d8] sm:$0xff]  ;;  %v12022_v46 = vmul.f32 %v6598_v12, %v11976_v40  ;;  %v12025_v18 = vmul.f32 %v6602_v55, %v11984_v48  ;;  %v12031_v41 = vmul.f32 %v6598_v12, %v11988_v31 }
 0x748   : > { %13571 = vst [vmem:[#allocation195_spill] sm:$0xff] %v11984_v48  ;;  %13572 = vst [vmem:[#allocation196_spill] sm:$0xff] %v11986_v50  ;;  %v12008_v17 = vld [vmem:[#allocation11 + $0x1e0] sm:$0xff]  ;;  %v12028_v60 = vmul.f32 %v6610_v34, %v11986_v50  ;;  %v12039_v53 = vmul.f32 %v6614_v57, %v11995_v45  ;;  %v6774_v0 = vcombine.high %v6766_v63, %v6766_v63 }
 0x749   : > { %13573 = vst [vmem:[#allocation197_spill] sm:$0xff] %v11993_v4  ;;  %13574 = vst [vmem:[#allocation198_spill] sm:$0xff] %v11995_v45  ;;  %v12048_v50 = vmul.f32 %v6606_v54, %v12006_v43  ;;  %v12051_v12 = vmul.f32 %v6610_v34, %v12008_v17  ;;  %v6857_v45 = vcombine.high %v5485_v59, %v5485_v59 }
 0x74a   : > { %13575 = vst [vmem:[#allocation199_spill] sm:$0xff] %v12000_v24  ;;  %13576 = vst [vmem:[#allocation200_spill] sm:$0xff] %v12002_v5  ;;  %v12036_v24 = vmul.f32 %v6606_v54, %v11993_v4  ;;  %v12042_v5 = vpop.f32.mrb[30].mxu0  ;;  %v12061_v54 = vrot.slane %v5485_v59, %v11300_v15 }
 0x74b   : > { %13577 = vst [vmem:[#allocation201_spill] sm:$0xff] %v12013_v8  ;;  %13578 = vst [vmem:[#allocation202_spill] sm:$0xff] %v12019_v9  ;;  %v6773_v8 = vrot.slane %v6759_v3, %v11300_v15  ;;  %v12045_v9 = vmul.f32 %v6602_v55, %v12004_v44  ;;  %v8855_v4 = vpop.f32.mrb[31].mxu0  ;;  %v6796_v3 = vrot.slane %v6774_v0, %v11300_v15 }
 0x74c   : > { %13579 = vst [vmem:[#allocation203_spill] sm:$0xff] %v12025_v18  ;;  %13580 = vst [vmem:[#allocation204_spill] sm:$0xff] %v12028_v60  ;;  %v12057_v18 = vmul.f32 %v6614_v57, %v12033_v32  ;;  %v12069_v0 = vpop.f32.mrb[32].mxu0  ;;  %v12076_v59 = vrot.slane %v12042_v5, %v11300_v15 }
 0x74d   : > { %13581 = vst [vmem:[#allocation205_spill] sm:$0xff] %v12031_v41  ;;  %13582 = vst [vmem:[#allocation206_spill] sm:$0xff] %v12033_v32  ;;  %v6782_v41 = vrot.slane %v6766_v63, %v11300_v15  ;;  %v6806_v63 = vcombine.high %v6796_v3, %v6796_v3  ;;  %v7158_v4 = vrot.slane %v6796_v3, %v11306_v7 }
 0x74e   : > { %13583 = vst [vmem:[#allocation207_spill] sm:$0xff] %v12036_v24  ;;  %13584 = vst [vmem:[#allocation208_spill] sm:$0xff] %v12039_v53  ;;  %v6775_v24 = vcombine.high %v6773_v8, %v6773_v8  ;;  %v6789_v53 = vrot.slane %v6773_v8, %v11300_v15  ;;  %v6871_v8 = vrot.slane %v6857_v45, %v11300_v15 }
 0x74f   : > { %13585 = vst [vmem:[#allocation209_spill] sm:$0xff] %v12045_v9  ;;  %13586 = vst [vmem:[#allocation210_spill] sm:$0xff] %v12048_v50  ;;  %v6804_v55 = vcombine.high %v6782_v41, %v6782_v41  ;;  %v7154_v9 = vrot.slane %v6782_v41, %v11306_v7  ;;  %v5415_v50 = vpop.f32.mrb[26].mxu1  ;;  %v7472_v48 = vmul.f32 %v7158_v4, %v11335_v52 }
 0x750   : > { %13587 = vst [vmem:[#allocation211_spill] sm:$0xff] %v12051_v12  ;;  %13588 = vst [vmem:[#allocation212_spill] sm:$0xff] %v12057_v18  ;;  %v12064_v34 = vrot.slane %v6775_v24, %v11300_v15  ;;  %v7170_v18 = vrot.slane %v6789_v53, %v11306_v7  ;;  %v8865_v24 = vpop.f32.mrb[33].mxu0  ;;  %v6805_v32 = vcombine.high %v6789_v53, %v6789_v53  ;;  %v8840_v60 = vpop.f32.mrb[27].mxu1 }
 0x751   : > { %v7162_v57 = vrot.slane %v6804_v55, %v11306_v7  ;;  %v7471_v41 = vmul.f32 %v7154_v9, %v11317_v38  ;;  %v7166_v12 = vrot.slane %v6806_v63, %v11306_v7  ;;  %v7783_v3 = vmul.f32 %v7154_v9, %v11314_v51 }
 0x752   : > { %v12084_v40 = vmul.f32 %v7170_v18, %v11359_v22  ;;  %v7784_v51 = vmul.f32 %v7158_v4, %v11321_v35  ;;  %v6872_v45 = vcombine.high %v12061_v54, %v12061_v54  ;;  %v7174_v52 = vrot.slane %v12064_v34, %v11306_v7  ;;  %v12106_v4 = vpop.f32.mrb[28].mxu1 }
 0x753   : > { %v7473_v55 = vmul.f32 %v7162_v57, %v11355_v36  ;;  %v7535_v38 = vsub.f32 %v11340_v2, %v7471_v41  ;;  %v12090_v63 = vmul.f32 %v7166_v12, %v11357_v37  ;;  %v7536_v36 = vsub.f32 %v11362_v49, %v7472_v48  ;;  %v8850_v24 = vpop.f32.mrb[29].mxu1 }
 0x754   : > { %13589 = vst [vmem:[#allocation213_spill] sm:$0xff] %v12084_v40  ;;  %v7785_v37 = vmul.f32 %v7162_v57, %v11323_v42  ;;  %v7786_v35 = vmul.f32 %v7166_v12, %v11331_v47  ;;  %v7787_v60 = vmul.f32 %v7170_v18, %v11333_v28  ;;  %v12109_v41 = vrot.slane %v6805_v32, %v11306_v7 }
 0x755   : > { %13590 = vst [vmem:[#allocation214_spill] sm:$0xff] %v12090_v63  ;;  %v7537_v22 = vsub.f32 %v11368_v30, %v7473_v55  ;;  %v7599_v49 = vsel %vm886_vm1, %v7535_v38, 0.0  ;;  %v7600_v30 = vsel %vm886_vm1, %v7536_v36, 0.0  ;;  %v7847_v48 = vadd.f32 %v7783_v3, %v11353_v23  ;;  %v12128_v38 = vpop.f32.mrb[30].mxu1  ;;  %v13614_v63 = vld [vmem:[#allocation23_spill] sm:$0xff] }
 0x756   : > { %v7601_v55 = vadd.f32 %v7600_v30, %v7599_v49  ;;  %v7848_v2 = vadd.f32 %v7784_v51, %v11377_v58  ;;  %v7849_v42 = vadd.f32 %v7785_v37, %v11387_v1  ;;  %v12117_v47 = vadd.f32 %v7786_v35, %v11390_v39  ;;  %v8860_v36 = vpop.f32.mrb[31].mxu1 }
 0x757   : > { %v7602_v28 = vsel %vm886_vm1, %v7537_v22, 0.0  ;;  %v12121_v18 = vadd.f32 %v7787_v60, %v11393_v33  ;;  %v6808_v32 = vcombine.high %v5415_v50, %v5415_v50  ;;  %v6815_v12 = vrot.slane %v5415_v50, %v11300_v15  ;;  %v13598_v36 = vld [vmem:[#allocation41_spill] sm:$0xff] }
 0x758   : > { %v12124_v57 = vadd.f32 %v7602_v28, %v7601_v55  ;;  %v7911_v23 = vsel %vm886_vm1, %v7847_v48, 0.0  ;;  %v7912_v3 = vsel %vm886_vm1, %v7848_v2, 0.0  ;;  %v6873_v58 = vcombine.high %v6871_v8, %v6871_v8 }
 0x759   : > { %13591 = vst [vmem:[#allocation215_spill] sm:$0xff] %v12121_v18  ;;  %v12130_v1 = vadd.f32 %v7912_v3, %v7911_v23  ;;  %v6822_v39 = vrot.slane %v6808_v32, %v11300_v15  ;;  %v6823_v51 = vcombine.high %v6815_v12, %v6815_v12  ;;  %v6831_v33 = vrot.slane %v6815_v12, %v11300_v15  ;;  %v13612_v18 = vld [vmem:[#allocation39_spill] sm:$0xff] }
 0x75a   : > { %13592 = vst [vmem:[#allocation216_spill] sm:$0xff] %v12124_v57  ;;  %v12135_v22 = vmul.f32 %v7174_v52, %v11379_v19  ;;  %v12139_v50 = vmul.f32 %v12109_v41, %v11645_v21  ;;  %v6880_v2 = vrot.slane %v12061_v54, %v11300_v15  ;;  %v12144_v37 = vrot.slane %v6871_v8, %v11300_v15  ;;  %v12156_v54 = vpop.f32.mrb[32].mxu1 }
 0x75b   : > { %v6824_v35 = vcombine.high %v6822_v39, %v6822_v39  ;;  %v6838_v60 = vrot.slane %v6822_v39, %v11300_v15  ;;  %v6845_v49 = vrot.slane %v6823_v51, %v11300_v15  ;;  %v6853_v30 = vcombine.high %v6831_v33, %v6831_v33  ;;  %v13597_v39 = vld [vmem:[#allocation42_spill] sm:$0xff] }
 0x75c   : > { %13593 = vst [vmem:[#allocation217_spill] sm:$0xff] %v12135_v22  ;;  %13594 = vst [vmem:[#allocation218_spill] sm:$0xff] %v12139_v50  ;;  %v12149_v48 = vmul.f32 %v7174_v52, %v11345_v61  ;;  %v12152_v19 = vsel %vm886_vm1, %v7849_v42, 0.0  ;;  %v7186_v21 = vrot.slane %v6831_v33, %v11306_v7  ;;  %v6894_v24 = vrot.slane %v6872_v45, %v11300_v15  ;;  %v8870_v61 = vpop.f32.mrb[33].mxu1 }
 0x75d   : > { %v12159_v8 = vrot.slane %v6824_v35, %v11300_v15  ;;  %v6855_v55 = vcombine.high %v6845_v49, %v6845_v49  ;;  %v7190_v28 = vrot.slane %v6845_v49, %v11306_v7  ;;  %v12163_v32 = vrot.slane %v6873_v58, %v11300_v15  ;;  %v13599_v58 = vld [vmem:[#allocation30_spill] sm:$0xff] }
 0x75e   : > { %v7194_v52 = vrot.slane %v6853_v30, %v11306_v7  ;;  %v7202_v42 = vrot.slane %v6838_v60, %v11306_v7  ;;  %v7479_v12 = vmul.f32 %v7186_v21, %v11400_v29  ;;  %v6902_v23 = vcombine.high %v6880_v2, %v6880_v2  ;;  %v13600_v61 = vld [vmem:[#allocation22_spill] sm:$0xff]  ;;  %v13602_v30 = vld [vmem:[#allocation48_spill] sm:$0xff]  ;;  %v13610_v29 = vld [vmem:[#allocation45_spill] sm:$0xff] }
 0x75f   : > { %13595 = vst [vmem:[#allocation219_spill] sm:$0xff] %v12159_v8  ;;  %13596 = vst [vmem:[#allocation220_spill] sm:$0xff] %v12163_v32  ;;  %v6854_v45 = vcombine.high %v6838_v60, %v6838_v60  ;;  %v7198_v3 = vrot.slane %v6855_v55, %v11306_v7  ;;  %v7791_v51 = vmul.f32 %v7186_v21, %v13597_v39  ;;  %v13603_v60 = vld [vmem:[#allocation31_spill] sm:$0xff]  ;;  %v13605_v55 = vld [vmem:[#allocation46_spill] sm:$0xff] }
 0x760   : > { %v6903_v33 = vcombine.high %v12144_v37, %v12144_v37  ;;  %v7480_v35 = vmul.f32 %v7190_v28, %v13598_v36  ;;  %v7481_v49 = vmul.f32 %v7194_v52, %v13599_v58  ;;  %v12175_v9 = vmul.f32 %v7202_v42, %v13600_v61  ;;  %v13606_v36 = vld [vmem:[#allocation32_spill] sm:$0xff]  ;;  %v13607_v58 = vld [vmem:[#allocation21_spill] sm:$0xff] }
 0x761   : > { %v7543_v53 = vsub.f32 %v13602_v30, %v7479_v12  ;;  %v12181_v40 = vmul.f32 %v7198_v3, %v13603_v60  ;;  %v7792_v21 = vmul.f32 %v7190_v28, %v13605_v55  ;;  %v6904_v39 = vcombine.high %v6894_v24, %v6894_v24  ;;  %v13611_v60 = vld [vmem:[#allocation47_spill] sm:$0xff]  ;;  %v13615_v61 = vld [vmem:[#allocation36_spill] sm:$0xff] }
 0x762   : > { %13601 = vst [vmem:[#allocation42_spill] sm:$0xff] %v12175_v9  ;;  %v7206_v25 = vrot.slane %v12159_v8, %v11306_v7  ;;  %v7544_v57 = vsub.f32 %v13606_v36, %v7480_v35  ;;  %v7545_v50 = vsub.f32 %v13607_v58, %v7481_v49  ;;  %v7793_v27 = vmul.f32 %v7194_v52, %v13610_v29  ;;  %v13613_v49 = vld [vmem:[#allocation40_spill] sm:$0xff]  ;;  %v13636_v12 = vld [vmem:[#allocation51_spill] sm:$0xff] }
 0x763   : > { %13604 = vst [vmem:[#allocation41_spill] sm:$0xff] %v12181_v40  ;;  %v7794_v22 = vmul.f32 %v7198_v3, %v13611_v60  ;;  %v7795_v28 = vmul.f32 %v7202_v42, %v13612_v18  ;;  %v12196_v55 = vrot.slane %v6854_v45, %v11306_v7  ;;  %v7614_v8 = vsel %vm886_vm1, %v7543_v53, 0.0  ;;  %v13616_v40 = vld [vmem:[#allocation25_spill] sm:$0xff]  ;;  %v13617_v3 = vld [vmem:[#allocation34_spill] sm:$0xff] }
 0x764   : > { %v7615_v35 = vsel %vm886_vm1, %v7544_v57, 0.0  ;;  %v7855_v36 = vadd.f32 %v7791_v51, %v13613_v49  ;;  %v7856_v9 = vadd.f32 %v7792_v21, %v13614_v63  ;;  %v7857_v30 = vadd.f32 %v7793_v27, %v13615_v61  ;;  %v13619_v42 = vld [vmem:[#allocation49_spill] sm:$0xff]  ;;  %v13623_v60 = vld [vmem:[#allocation54_spill] sm:$0xff] }
 0x765   : > { %v7616_v58 = vadd.f32 %v7615_v35, %v7614_v8  ;;  %v12204_v52 = vadd.f32 %v7794_v22, %v13616_v40  ;;  %v12207_v29 = vmul.f32 %v7206_v25, %v13617_v3  ;;  %v7617_v18 = vsel %vm886_vm1, %v7545_v50, 0.0  ;;  %v13622_v21 = vld [vmem:[#allocation29_spill] sm:$0xff]  ;;  %v13630_v3 = vld [vmem:[#allocation59_spill] sm:$0xff] }
 0x766   : > { %v12211_v45 = vadd.f32 %v7795_v28, %v13619_v42  ;;  %v7218_v53 = vrot.slane %v6880_v2, %v11306_v7  ;;  %v7926_v8 = vsel %vm886_vm1, %v7855_v36, 0.0  ;;  %v7927_v63 = vsel %vm886_vm1, %v7856_v9, 0.0  ;;  %v13635_v28 = vld [vmem:[#allocation50_spill] sm:$0xff] }
 0x767   : > { %13618 = vst [vmem:[#allocation30_spill] sm:$0xff] %v12207_v29  ;;  %v12214_v57 = vadd.f32 %v7617_v18, %v7616_v58  ;;  %v7222_v27 = vrot.slane %v6894_v24, %v11306_v7  ;;  %v12219_v40 = vadd.f32 %v7927_v63, %v7926_v8  ;;  %v7226_v22 = vrot.slane %v6902_v23, %v11306_v7  ;;  %v13624_v23 = vld [vmem:[#allocation55_spill] sm:$0xff]  ;;  %v13631_v18 = vld [vmem:[#allocation26_spill] sm:$0xff]  ;;  %v13632_v8 = vld [vmem:[#allocation60_spill] sm:$0xff] }
 0x768   : > { %v7230_v51 = vrot.slane %v6904_v39, %v11306_v7  ;;  %v7234_v50 = vrot.slane %v12144_v37, %v11306_v7  ;;  %v12227_v2 = vmul.f32 %v12196_v55, %v11665_v11  ;;  %v12230_v61 = vmul.f32 %v7206_v25, %v13622_v21  ;;  %v13625_v39 = vld [vmem:[#allocation62_spill] sm:$0xff]  ;;  %v13627_v37 = vld [vmem:[#allocation56_spill] sm:$0xff] }
 0x769   : > { %13620 = vst [vmem:[#allocation22_spill] sm:$0xff] %v12214_v57  ;;  %v7487_v9 = vmul.f32 %v7218_v53, %v11497_v56  ;;  %v7488_v24 = vmul.f32 %v7222_v27, %v13623_v60  ;;  %v7489_v35 = vmul.f32 %v7226_v22, %v13624_v23  ;;  %v7238_v11 = vrot.slane %v12163_v32, %v11306_v7  ;;  %v13629_v25 = vld [vmem:[#allocation52_spill] sm:$0xff]  ;;  %v13640_v60 = vld [vmem:[#allocation61_spill] sm:$0xff]  ;;  %v13643_v23 = vld [vmem:[#allocation71_spill] sm:$0xff] }
 0x76a   : > { %13621 = vst [vmem:[#allocation48_spill] sm:$0xff] %v12227_v2  ;;  %v12238_v49 = vmul.f32 %v7230_v51, %v13625_v39  ;;  %v12241_v36 = vmul.f32 %v7234_v50, %v13627_v37  ;;  %v7799_v42 = vmul.f32 %v7218_v53, %v13631_v18  ;;  %v7800_v37 = vmul.f32 %v7222_v27, %v13635_v28  ;;  %v13639_v18 = vld [vmem:[#allocation28_spill] sm:$0xff]  ;;  %v13642_v28 = vld [vmem:[#allocation66_spill] sm:$0xff] }
 0x76b   : > { %v7551_v58 = vsub.f32 %v13629_v25, %v7487_v9  ;;  %v7552_v56 = vsub.f32 %v13630_v3, %v7488_v24  ;;  %v7553_v63 = vsub.f32 %v13632_v8, %v7489_v35  ;;  %v7801_v9 = vmul.f32 %v7226_v22, %v13636_v12  ;;  %v13637_v25 = vld [vmem:[#allocation58_spill] sm:$0xff]  ;;  %v13646_v22 = vld [vmem:[#allocation67_spill] sm:$0xff] }
 0x76c   : > { %13626 = vst [vmem:[#allocation31_spill] sm:$0xff] %v12238_v49  ;;  %13628 = vst [vmem:[#allocation46_spill] sm:$0xff] %v12241_v36  ;;  %v7802_v24 = vmul.f32 %v7230_v51, %v13637_v25  ;;  %v12259_v53 = vrot.slane %v6903_v33, %v11306_v7  ;;  %v7803_v8 = vmul.f32 %v7234_v50, %v13639_v18  ;;  %v13641_v36 = vld [vmem:[#allocation65_spill] sm:$0xff]  ;;  %v12279_v50 = vsel %vm886_vm1, %v7857_v30, 0.0  ;;  %v13661_v49 = vld [vmem:[#allocation84_spill] sm:$0xff] }
 0x76d   : > { %v7629_v57 = vsel %vm886_vm1, %v7551_v58, 0.0  ;;  %v7630_v2 = vsel %vm886_vm1, %v7552_v56, 0.0  ;;  %v7632_v3 = vsel %vm886_vm1, %v7553_v63, 0.0  ;;  %v7863_v39 = vadd.f32 %v7799_v42, %v13640_v60 }
 0x76e   : > { %13638 = vst [vmem:[#allocation32_spill] sm:$0xff] %v12259_v53  ;;  %v7631_v35 = vadd.f32 %v7630_v2, %v7629_v57  ;;  %v7864_v27 = vadd.f32 %v7800_v37, %v13641_v36  ;;  %v7865_v58 = vadd.f32 %v7801_v9, %v13642_v28  ;;  %v12267_v56 = vadd.f32 %v7802_v24, %v13643_v23 }
 0x76f   : > { %v12272_v51 = vadd.f32 %v7803_v8, %v13646_v22  ;;  %v6906_v33 = vcombine.high %v12106_v4, %v12106_v4  ;;  %v6913_v57 = vrot.slane %v12106_v4, %v11300_v15  ;;  %v7941_v2 = vsel %vm886_vm1, %v7863_v39, 0.0  ;;  %v13650_v4 = vld [vmem:[#allocation63_spill] sm:$0xff]  ;;  %v13653_v8 = vld [vmem:[#allocation53_spill] sm:$0xff] }
 0x770   : > { %13644 = vst [vmem:[#allocation21_spill] sm:$0xff] %v12267_v56  ;;  %v12269_v12 = vadd.f32 %v7632_v3, %v7631_v35  ;;  %v7942_v36 = vsel %vm886_vm1, %v7864_v27, 0.0  ;;  %v13648_v42 = vcombine.high %v12042_v5, %v12042_v5  ;;  %v12292_v25 = vmul.f32 %v7238_v11, %v13650_v4  ;;  %v13658_v4 = vld [vmem:[#allocation69_spill] sm:$0xff]  ;;  %v13676_v56 = vld [vmem:[#allocation90_spill] sm:$0xff] }
 0x771   : > { %13647 = vst [vmem:[#allocation47_spill] sm:$0xff] %v12272_v51  ;;  %v12287_v60 = vadd.f32 %v7942_v36, %v7941_v2  ;;  %v6920_v23 = vrot.slane %v6906_v33, %v11300_v15  ;;  %v6921_v37 = vcombine.high %v6913_v57, %v6913_v57  ;;  %v6929_v9 = vrot.slane %v6913_v57, %v11300_v15 }
 0x772   : > { %13645 = vst [vmem:[#allocation45_spill] sm:$0xff] %v12269_v12  ;;  %v6969_v63 = vrot.slane %v13648_v42, %v11300_v15  ;;  %13651 = vst [vmem:[#allocation40_spill] sm:$0xff] %v12292_v25  ;;  %v12296_v30 = vmul.f32 %v12259_v53, %v11757_v14  ;;  %v6970_v39 = vcombine.high %v12076_v59, %v12076_v59  ;;  %v12306_v28 = vsel %vm886_vm1, %v7865_v58, 0.0  ;;  %v13674_v53 = vld [vmem:[#allocation76_spill] sm:$0xff] }
 0x773   : > { %13649 = vst [vmem:[#allocation39_spill] sm:$0xff] %v12287_v60  ;;  %v6922_v5 = vcombine.high %v6920_v23, %v6920_v23  ;;  %v6936_v35 = vrot.slane %v6920_v23, %v11300_v15  ;;  %v6943_v3 = vrot.slane %v6921_v37, %v11300_v15  ;;  %v6951_v18 = vcombine.high %v6929_v9, %v6929_v9  ;;  %v13657_v23 = vld [vmem:[#allocation70_spill] sm:$0xff] }
 0x774   : > { %13652 = vst [vmem:[#allocation23_spill] sm:$0xff] %v12296_v30  ;;  %v6971_v24 = vcombine.high %v6969_v63, %v6969_v63  ;;  %v12303_v27 = vmul.f32 %v7238_v11, %v13653_v8  ;;  %13655 = vst [vmem:[#allocation25_spill] sm:$0xff] %v12306_v28  ;;  %v7250_v22 = vrot.slane %v6929_v9, %v11306_v7  ;;  %v13672_v28 = vld [vmem:[#allocation74_spill] sm:$0xff] }
 0x775   : > { %v6978_v14 = vrot.slane %v12076_v59, %v11300_v15  ;;  %v12312_v33 = vrot.slane %v6922_v5, %v11300_v15  ;;  %v6953_v57 = vcombine.high %v6943_v3, %v6943_v3  ;;  %v7254_v2 = vrot.slane %v6943_v3, %v11306_v7  ;;  %v13659_v3 = vld [vmem:[#allocation77_spill] sm:$0xff] }
 0x776   : > { %13654 = vst [vmem:[#allocation36_spill] sm:$0xff] %v12303_v27  ;;  %v12316_v36 = vrot.slane %v6969_v63, %v11300_v15  ;;  %v6952_v42 = vcombine.high %v6936_v35, %v6936_v35  ;;  %v7258_v11 = vrot.slane %v6951_v18, %v11306_v7  ;;  %v7266_v58 = vrot.slane %v6936_v35, %v11306_v7  ;;  %v13660_v63 = vld [vmem:[#allocation80_spill] sm:$0xff]  ;;  %v13663_v18 = vld [vmem:[#allocation82_spill] sm:$0xff] }
 0x777   : > { %13656 = vst [vmem:[#allocation34_spill] sm:$0xff] %v12312_v33  ;;  %v7495_v37 = vmul.f32 %v7250_v22, %v13657_v23  ;;  %v7262_v9 = vrot.slane %v6953_v57, %v11306_v7  ;;  %v7807_v59 = vmul.f32 %v7250_v22, %v13658_v4  ;;  %v6992_v5 = vrot.slane %v6970_v39, %v11300_v15  ;;  %v13664_v57 = vld [vmem:[#allocation81_spill] sm:$0xff] }
 0x778   : > { %v12325_v8 = vrot.slane %v6971_v24, %v11300_v15  ;;  %v7496_v12 = vmul.f32 %v7254_v2, %v13659_v3  ;;  %v7497_v30 = vmul.f32 %v7258_v11, %v13660_v63  ;;  %v12330_v21 = vmul.f32 %v7266_v58, %v13661_v49  ;;  %v13666_v22 = vld [vmem:[#allocation73_spill] sm:$0xff]  ;;  %v13669_v63 = vld [vmem:[#allocation86_spill] sm:$0xff]  ;;  %v13677_v49 = vld [vmem:[#allocation92_spill] sm:$0xff] }
 0x779   : > { %v7559_v35 = vsub.f32 %v13663_v18, %v7495_v37  ;;  %v7270_v23 = vrot.slane %v12312_v33, %v11306_v7  ;;  %v12336_v25 = vmul.f32 %v7262_v9, %v13664_v57  ;;  %v7808_v39 = vmul.f32 %v7254_v2, %v13666_v22  ;;  %v13668_v3 = vld [vmem:[#allocation85_spill] sm:$0xff]  ;;  %v13673_v57 = vld [vmem:[#allocation75_spill] sm:$0xff]  ;;  %v13702_v37 = vld [vmem:[#allocation102_spill] sm:$0xff] }
 0x77a   : > { %13662 = vst [vmem:[#allocation49_spill] sm:$0xff] %v12330_v21  ;;  %v7000_v4 = vcombine.high %v6978_v14, %v6978_v14  ;;  %v12340_v24 = vrot.slane %v6952_v42, %v11306_v7  ;;  %v7560_v29 = vsub.f32 %v13668_v3, %v7496_v12  ;;  %v7561_v51 = vsub.f32 %v13669_v63, %v7497_v30  ;;  %v13675_v30 = vld [vmem:[#allocation83_spill] sm:$0xff] }
 0x77b   : > { %13665 = vst [vmem:[#allocation29_spill] sm:$0xff] %v12336_v25  ;;  %v7809_v60 = vmul.f32 %v7258_v11, %v13672_v28  ;;  %v7810_v27 = vmul.f32 %v7262_v9, %v13673_v57  ;;  %v7811_v2 = vmul.f32 %v7266_v58, %v13674_v53  ;;  %v7644_v22 = vsel %vm886_vm1, %v7559_v35, 0.0  ;;  %v13678_v25 = vld [vmem:[#allocation93_spill] sm:$0xff]  ;;  %v13680_v11 = vld [vmem:[#allocation87_spill] sm:$0xff]  ;;  %v13682_v58 = vld [vmem:[#allocation94_spill] sm:$0xff] }
 0x77c   : > { %13667 = vst [vmem:[#allocation54_spill] sm:$0xff] %v12340_v24  ;;  %v7645_v12 = vsel %vm886_vm1, %v7560_v29, 0.0  ;;  %v7871_v3 = vadd.f32 %v7807_v59, %v13675_v30  ;;  %v7872_v21 = vadd.f32 %v7808_v39, %v13676_v56  ;;  %v12362_v9 = vmul.f32 %v7270_v23, %v13680_v11  ;;  %v13690_v30 = vld [vmem:[#allocation108_spill] sm:$0xff]  ;;  %v13693_v11 = vld [vmem:[#allocation114_spill] sm:$0xff] }
 0x77d   : > { %v7646_v63 = vadd.f32 %v7645_v12, %v7644_v22  ;;  %v7873_v18 = vadd.f32 %v7809_v60, %v13677_v49  ;;  %v12359_v28 = vadd.f32 %v7810_v27, %v13678_v25  ;;  %v7647_v53 = vsel %vm886_vm1, %v7561_v51, 0.0  ;;  %v13687_v49 = vld [vmem:[#allocation79_spill] sm:$0xff] }
 0x77e   : > { %13681 = vst [vmem:[#allocation62_spill] sm:$0xff] %v12362_v9  ;;  %v12366_v57 = vadd.f32 %v7811_v2, %v13682_v58  ;;  %v7002_v35 = vcombine.high %v6992_v5, %v6992_v5  ;;  %v12370_v29 = vmul.f32 %v12340_v24, %v11787_v10  ;;  %v7956_v56 = vsel %vm886_vm1, %v7871_v3, 0.0  ;;  %v13691_v3 = vld [vmem:[#allocation111_spill] sm:$0xff]  ;;  %v13695_v58 = vld [vmem:[#allocation96_spill] sm:$0xff]  ;;  %v13730_v24 = vld [vmem:[#allocation138_spill] sm:$0xff] }
 0x77f   : > { %13679 = vst [vmem:[#allocation55_spill] sm:$0xff] %v12359_v28  ;;  %v12372_v59 = vadd.f32 %v7647_v53, %v7646_v63  ;;  %v7957_v60 = vsel %vm886_vm1, %v7872_v21, 0.0  ;;  %v7282_v27 = vrot.slane %v6978_v14, %v11306_v7  ;;  %v7286_v51 = vrot.slane %v6992_v5, %v11306_v7 }
 0x780   : > { %13683 = vst [vmem:[#allocation56_spill] sm:$0xff] %v12366_v57  ;;  %13684 = vst [vmem:[#allocation52_spill] sm:$0xff] %v12370_v29  ;;  %v12376_v25 = vadd.f32 %v7957_v60, %v7956_v56  ;;  %v7290_v39 = vrot.slane %v7000_v4, %v11306_v7  ;;  %v12382_v2 = vmul.f32 %v7270_v23, %v13687_v49  ;;  %v12390_v21 = vsel %vm886_vm1, %v7873_v18, 0.0  ;;  %v13697_v56 = vld [vmem:[#allocation112_spill] sm:$0xff] }
 0x781   : > { %13685 = vst [vmem:[#allocation59_spill] sm:$0xff] %v12372_v59  ;;  %v7001_v10 = vcombine.high %v12316_v36, %v12316_v36  ;;  %v7294_v22 = vrot.slane %v7002_v35, %v11306_v7  ;;  %v7298_v12 = vrot.slane %v12316_v36, %v11306_v7  ;;  %13689 = vst [vmem:[#allocation50_spill] sm:$0xff] %v12390_v21  ;;  %v13696_v35 = vld [vmem:[#allocation109_spill] sm:$0xff]  ;;  %v13725_v21 = vld [vmem:[#allocation148_spill] sm:$0xff] }
 0x782   : > { %13686 = vst [vmem:[#allocation26_spill] sm:$0xff] %v12376_v25  ;;  %13688 = vst [vmem:[#allocation60_spill] sm:$0xff] %v12382_v2  ;;  %v7503_v14 = vmul.f32 %v7282_v27, %v11678_v16  ;;  %v7504_v5 = vmul.f32 %v7286_v51, %v11691_v26  ;;  %v7505_v4 = vmul.f32 %v7290_v39, %v13690_v30  ;;  %v13698_v16 = vld [vmem:[#allocation116_spill] sm:$0xff]  ;;  %v13699_v26 = vld [vmem:[#allocation99_spill] sm:$0xff] }
 0x783   : > { %v7302_v23 = vrot.slane %v12325_v8, %v11306_v7  ;;  %v12398_v63 = vmul.f32 %v7294_v22, %v13691_v3  ;;  %v12401_v53 = vmul.f32 %v7298_v12, %v13693_v11  ;;  %v7815_v36 = vmul.f32 %v7282_v27, %v13695_v58  ;;  %v13703_v11 = vld [vmem:[#allocation106_spill] sm:$0xff]  ;;  %v13707_v59 = vld [vmem:[#allocation121_spill] sm:$0xff]  ;;  %v13732_v30 = vld [vmem:[#allocation139_spill] sm:$0xff] }
 0x784   : > { %v7567_v18 = vsub.f32 %v13696_v35, %v7503_v14  ;;  %v7568_v60 = vsub.f32 %v13697_v56, %v7504_v5  ;;  %v7569_v49 = vsub.f32 %v13698_v16, %v7505_v4  ;;  %v7816_v42 = vmul.f32 %v7286_v51, %v13699_v26  ;;  %v13704_v4 = vld [vmem:[#allocation103_spill] sm:$0xff]  ;;  %v13705_v56 = vld [vmem:[#allocation113_spill] sm:$0xff]  ;;  %v13706_v26 = vld [vmem:[#allocation118_spill] sm:$0xff] }
 0x785   : > { %13692 = vst [vmem:[#allocation51_spill] sm:$0xff] %v12398_v63  ;;  %13694 = vst [vmem:[#allocation58_spill] sm:$0xff] %v12401_v53  ;;  %v7817_v9 = vmul.f32 %v7290_v39, %v13702_v37  ;;  %v7818_v57 = vmul.f32 %v7294_v22, %v13703_v11  ;;  %v12415_v27 = vrot.slane %v7001_v10, %v11306_v7  ;;  %v13708_v39 = vld [vmem:[#allocation122_spill] sm:$0xff]  ;;  %v13709_v10 = vld [vmem:[#allocation124_spill] sm:$0xff] }
 0x786   : > { %v7659_v14 = vsel %vm886_vm1, %v7567_v18, 0.0  ;;  %v7660_v5 = vsel %vm886_vm1, %v7568_v60, 0.0  ;;  %v7819_v58 = vmul.f32 %v7298_v12, %v13704_v4  ;;  %v7662_v35 = vsel %vm886_vm1, %v7569_v49, 0.0  ;;  %v13714_v4 = vld [vmem:[#allocation123_spill] sm:$0xff] }
 0x787   : > { %v7661_v51 = vadd.f32 %v7660_v5, %v7659_v14  ;;  %v7879_v16 = vadd.f32 %v7815_v36, %v13705_v56  ;;  %v7880_v3 = vadd.f32 %v7816_v42, %v13706_v26  ;;  %v7881_v37 = vadd.f32 %v7817_v9, %v13707_v59  ;;  %v13712_v14 = vld [vmem:[#allocation115_spill] sm:$0xff] }
 0x788   : > { %v12425_v22 = vadd.f32 %v7818_v57, %v13708_v39  ;;  %v12428_v11 = vadd.f32 %v7819_v58, %v13709_v10  ;;  %v7004_v18 = vcombine.high %v12128_v38, %v12128_v38  ;;  %v7011_v42 = vrot.slane %v12128_v38, %v11300_v15  ;;  %v13718_v9 = vld [vmem:[#allocation151_spill] sm:$0xff] }
 0x789   : > { %v12432_v60 = vadd.f32 %v7662_v35, %v7661_v51  ;;  %v7971_v12 = vsel %vm886_vm1, %v7879_v16, 0.0  ;;  %v7972_v49 = vsel %vm886_vm1, %v7880_v3, 0.0  ;;  %v7053_v36 = vcombine.high %v12069_v0, %v12069_v0  ;;  %v13716_v51 = vld [vmem:[#allocation107_spill] sm:$0xff] }
 0x78a   : > { %13710 = vst [vmem:[#allocation28_spill] sm:$0xff] %v12428_v11  ;;  %v12440_v57 = vadd.f32 %v7972_v49, %v7971_v12  ;;  %v7018_v59 = vrot.slane %v7004_v18, %v11300_v15  ;;  %v12446_v5 = vmul.f32 %v7302_v23, %v13712_v14  ;;  %v12450_v58 = vmul.f32 %v12415_v27, %v13714_v4  ;;  %v13731_v11 = vld [vmem:[#allocation141_spill] sm:$0xff] }
 0x78b   : > { %13711 = vst [vmem:[#allocation61_spill] sm:$0xff] %v12432_v60  ;;  %v7019_v3 = vcombine.high %v7011_v42, %v7011_v42  ;;  %v7027_v38 = vrot.slane %v7011_v42, %v11300_v15  ;;  %v12454_v35 = vmul.f32 %v7302_v23, %v13716_v51  ;;  %v7060_v26 = vrot.slane %v12069_v0, %v11300_v15 }
 0x78c   : > { %13713 = vst [vmem:[#allocation65_spill] sm:$0xff] %v12446_v5  ;;  %13715 = vst [vmem:[#allocation66_spill] sm:$0xff] %v12450_v58  ;;  %v7020_v56 = vcombine.high %v7018_v59, %v7018_v59  ;;  %v7034_v16 = vrot.slane %v7018_v59, %v11300_v15  ;;  %v12460_v39 = vsel %vm886_vm1, %v7881_v37, 0.0  ;;  %v7067_v14 = vrot.slane %v7053_v36, %v11300_v15  ;;  %v13717_v37 = vld [vmem:[#allocation137_spill] sm:$0xff] }
 0x78d   : > { %v7041_v10 = vrot.slane %v7019_v3, %v11300_v15  ;;  %v7049_v18 = vcombine.high %v7027_v38, %v7027_v38  ;;  %v7314_v12 = vrot.slane %v7027_v38, %v11306_v7  ;;  %v7068_v53 = vcombine.high %v7060_v26, %v7060_v26  ;;  %v13724_v58 = vld [vmem:[#allocation133_spill] sm:$0xff] }
 0x78e   : > { %v12465_v49 = vrot.slane %v7020_v56, %v11300_v15  ;;  %v7050_v42 = vcombine.high %v7034_v16, %v7034_v16  ;;  %v7330_v23 = vrot.slane %v7034_v16, %v11306_v7  ;;  %v7102_v38 = vcombine.high %v12156_v54, %v12156_v54  ;;  %v13720_v16 = vld [vmem:[#allocation142_spill] sm:$0xff] }
 0x78f   : > { %v7051_v59 = vcombine.high %v7041_v10, %v7041_v10  ;;  %v7318_v4 = vrot.slane %v7041_v10, %v11306_v7  ;;  %v7322_v0 = vrot.slane %v7049_v18, %v11306_v7  ;;  %v7511_v51 = vmul.f32 %v7314_v12, %v13717_v37  ;;  %v13721_v10 = vld [vmem:[#allocation147_spill] sm:$0xff] }
 0x790   : > { %v12473_v3 = vmul.f32 %v7330_v23, %v13718_v9  ;;  %v12479_v56 = vrot.slane %v12156_v54, %v11300_v15  ;;  %v13722_v18 = vld [vmem:[#allocation143_spill] sm:$0xff]  ;;  %v7334_v9 = vrot.slane %v12465_v49, %v11306_v7  ;;  %v7823_v5 = vmul.f32 %v7314_v12, %v13724_v58 }
 0x791   : > { %v7326_v36 = vrot.slane %v7051_v59, %v11306_v7  ;;  %v7512_v29 = vmul.f32 %v7318_v4, %v13720_v16  ;;  %v7513_v60 = vmul.f32 %v7322_v0, %v13721_v10  ;;  %v7575_v63 = vsub.f32 %v13722_v18, %v7511_v51  ;;  %v13727_v16 = vld [vmem:[#allocation149_spill] sm:$0xff]  ;;  %v13729_v51 = vld [vmem:[#allocation136_spill] sm:$0xff] }
 0x792   : > { %13719 = vst [vmem:[#allocation71_spill] sm:$0xff] %v12473_v3  ;;  %v7069_v28 = vcombine.high %v7067_v14, %v7067_v14  ;;  %v12491_v54 = vrot.slane %v7050_v42, %v11306_v7  ;;  %v13728_v10 = vld [vmem:[#allocation153_spill] sm:$0xff]  ;;  %v7824_v18 = vmul.f32 %v7318_v4, %v13729_v51  ;;  %v7825_v33 = vmul.f32 %v7322_v0, %v13730_v24  ;;  %v13736_v51 = vld [vmem:[#allocation158_spill] sm:$0xff]  ;;  %v13737_v0 = vld [vmem:[#allocation159_spill] sm:$0xff] }
 0x793   : > { %v12494_v59 = vmul.f32 %v7326_v36, %v13725_v21  ;;  %v7576_v25 = vsub.f32 %v13727_v16, %v7512_v29  ;;  %v7577_v2 = vsub.f32 %v13728_v10, %v7513_v60  ;;  %v7826_v32 = vmul.f32 %v7326_v36, %v13731_v11  ;;  %v13734_v16 = vld [vmem:[#allocation150_spill] sm:$0xff]  ;;  %v13735_v10 = vld [vmem:[#allocation156_spill] sm:$0xff] }
 0x794   : > { %v7827_v3 = vmul.f32 %v7330_v23, %v13732_v30  ;;  %v7674_v42 = vsel %vm886_vm1, %v7575_v63, 0.0  ;;  %v7887_v60 = vadd.f32 %v7823_v5, %v13734_v16  ;;  %v7888_v4 = vadd.f32 %v7824_v18, %v13735_v10  ;;  %v13739_v30 = vld [vmem:[#allocation160_spill] sm:$0xff]  ;;  %v13745_v16 = vld [vmem:[#allocation146_spill] sm:$0xff] }
 0x795   : > { %13726 = vst [vmem:[#allocation67_spill] sm:$0xff] %v12494_v59  ;;  %v7675_v21 = vsel %vm886_vm1, %v7576_v25, 0.0  ;;  %v7677_v37 = vsel %vm886_vm1, %v7577_v2, 0.0  ;;  %v7889_v24 = vadd.f32 %v7825_v33, %v13736_v51  ;;  %v12511_v11 = vadd.f32 %v7826_v32, %v13737_v0  ;;  %v13742_v33 = vld [vmem:[#allocation152_spill] sm:$0xff]  ;;  %v13746_v0 = vld [vmem:[#allocation163_spill] sm:$0xff] }
 0x796   : > { %v7676_v29 = vadd.f32 %v7675_v21, %v7674_v42  ;;  %v12514_v23 = vadd.f32 %v7827_v3, %v13739_v30  ;;  %v7076_v36 = vrot.slane %v7060_v26, %v11300_v15  ;;  %v7083_v63 = vrot.slane %v7067_v14, %v11300_v15 }
 0x797   : > { %13738 = vst [vmem:[#allocation63_spill] sm:$0xff] %v12511_v11  ;;  %v7986_v5 = vsel %vm886_vm1, %v7887_v60, 0.0  ;;  %v7987_v18 = vsel %vm886_vm1, %v7888_v4, 0.0  ;;  %v12525_v42 = vmul.f32 %v7334_v9, %v13742_v33  ;;  %v7090_v3 = vrot.slane %v7068_v53, %v11300_v15  ;;  %v13761_v11 = vld [vmem:[#allocation168_spill] sm:$0xff] }
 0x798   : > { %13740 = vst [vmem:[#allocation53_spill] sm:$0xff] %v12514_v23  ;;  %v12520_v2 = vadd.f32 %v7677_v37, %v7676_v29  ;;  %v12527_v32 = vadd.f32 %v7987_v18, %v7986_v5  ;;  %v7098_v21 = vcombine.high %v7076_v36, %v7076_v36  ;;  %v12532_v26 = vmul.f32 %v12491_v54, %v11876_v20  ;;  %v13749_v18 = vld [vmem:[#allocation169_spill] sm:$0xff] }
 0x799   : > { %13743 = vst [vmem:[#allocation69_spill] sm:$0xff] %v12525_v42  ;;  %v12535_v14 = vrot.slane %v7069_v28, %v11300_v15  ;;  %v7346_v37 = vrot.slane %v7076_v36, %v11306_v7  ;;  %v7362_v29 = vrot.slane %v7083_v63, %v11306_v7  ;;  %v12540_v60 = vmul.f32 %v7334_v9, %v13745_v16  ;;  %v13747_v28 = vld [vmem:[#allocation178_spill] sm:$0xff]  ;;  %v13750_v9 = vld [vmem:[#allocation176_spill] sm:$0xff] }
 0x79a   : > { %13741 = vst [vmem:[#allocation70_spill] sm:$0xff] %v12520_v2  ;;  %13744 = vst [vmem:[#allocation77_spill] sm:$0xff] %v12532_v26  ;;  %v7100_v10 = vcombine.high %v7090_v3, %v7090_v3  ;;  %v7350_v4 = vrot.slane %v7090_v3, %v11306_v7  ;;  %v7354_v53 = vrot.slane %v7098_v21, %v11306_v7  ;;  %v12545_v51 = vsel %vm886_vm1, %v7889_v24, 0.0  ;;  %v13751_v21 = vld [vmem:[#allocation173_spill] sm:$0xff] }
 0x79b   : > { %v7099_v20 = vcombine.high %v7083_v63, %v7083_v63  ;;  %v7519_v30 = vmul.f32 %v7346_v37, %v13746_v0  ;;  %v12549_v5 = vmul.f32 %v7362_v29, %v13747_v28  ;;  %v7116_v12 = vrot.slane %v7102_v38, %v11300_v15  ;;  %v13753_v0 = vld [vmem:[#allocation162_spill] sm:$0xff]  ;;  %v13754_v28 = vld [vmem:[#allocation177_spill] sm:$0xff] }
 0x79c   : > { %v7358_v36 = vrot.slane %v7100_v10, %v11306_v7  ;;  %v7520_v33 = vmul.f32 %v7350_v4, %v13749_v18  ;;  %v7521_v16 = vmul.f32 %v7354_v53, %v13750_v9  ;;  %v7831_v2 = vmul.f32 %v7346_v37, %v13753_v0  ;;  %v13756_v10 = vld [vmem:[#allocation179_spill] sm:$0xff]  ;;  %v13757_v18 = vld [vmem:[#allocation180_spill] sm:$0xff]  ;;  %v13759_v3 = vld [vmem:[#allocation165_spill] sm:$0xff] }
 0x79d   : > { %13748 = vst [vmem:[#allocation80_spill] sm:$0xff] %v12549_v5  ;;  %v7583_v24 = vsub.f32 %v13751_v21, %v7519_v30  ;;  %v13758_v9 = vld [vmem:[#allocation164_spill] sm:$0xff]  ;;  %v7366_v38 = vrot.slane %v12535_v14, %v11306_v7  ;;  %v7833_v23 = vmul.f32 %v7354_v53, %v13759_v3  ;;  %v13760_v30 = vld [vmem:[#allocation167_spill] sm:$0xff]  ;;  %v7835_v25 = vmul.f32 %v7362_v29, %v13761_v11 }
 0x79e   : > { %v12562_v59 = vmul.f32 %v7358_v36, %v13754_v28  ;;  %v7584_v58 = vsub.f32 %v13756_v10, %v7520_v33  ;;  %v7585_v26 = vsub.f32 %v13757_v18, %v7521_v16  ;;  %v7832_v42 = vmul.f32 %v7350_v4, %v13758_v9  ;;  %v13763_v10 = vld [vmem:[#allocation174_spill] sm:$0xff]  ;;  %v13764_v9 = vld [vmem:[#allocation183_spill] sm:$0xff]  ;;  %v13766_v11 = vld [vmem:[#allocation188_spill] sm:$0xff] }
 0x79f   : > { %v7834_v21 = vmul.f32 %v7358_v36, %v13760_v30  ;;  %v12573_v37 = vrot.slane %v7099_v20, %v11306_v7  ;;  %v7689_v33 = vsel %vm886_vm1, %v7583_v24, 0.0  ;;  %v7895_v18 = vadd.f32 %v7831_v2, %v13763_v10  ;;  %v13765_v53 = vld [vmem:[#allocation187_spill] sm:$0xff]  ;;  %v13767_v20 = vld [vmem:[#allocation189_spill] sm:$0xff]  ;;  %v13770_v10 = vld [vmem:[#allocation186_spill] sm:$0xff] }
 0x7a0   : > { %13755 = vst [vmem:[#allocation84_spill] sm:$0xff] %v12562_v59  ;;  %v7690_v16 = vsel %vm886_vm1, %v7584_v58, 0.0  ;;  %v7896_v5 = vadd.f32 %v7832_v42, %v13764_v9  ;;  %v7897_v3 = vadd.f32 %v7833_v23, %v13765_v53  ;;  %v7692_v36 = vsel %vm886_vm1, %v7585_v26, 0.0  ;;  %v9135_v0 = vld [vmem:[#allocation10 + $0x30] sm:$0xff] }
 0x7a1   : > { %v7691_v4 = vadd.f32 %v7690_v16, %v7689_v33  ;;  %v12584_v29 = vadd.f32 %v7834_v21, %v13766_v11  ;;  %v12587_v30 = vadd.f32 %v7835_v25, %v13767_v20  ;;  %v7117_v24 = vcombine.high %v12479_v56, %v12479_v56  ;;  %v13769_v21 = vld [vmem:[#allocation184_spill] sm:$0xff] }
 0x7a2   : > { %v8001_v58 = vsel %vm886_vm1, %v7895_v18, 0.0  ;;  %v8002_v2 = vsel %vm886_vm1, %v7896_v5, 0.0  ;;  %v7118_v42 = vcombine.high %v7116_v12, %v7116_v12  ;;  %v7125_v23 = vrot.slane %v12479_v56, %v11300_v15  ;;  %v13771_v18 = vld [vmem:[#allocation172_spill] sm:$0xff] }
 0x7a3   : > { %v12591_v28 = vadd.f32 %v7692_v36, %v7691_v4  ;;  %v12595_v33 = vadd.f32 %v8002_v2, %v8001_v58  ;;  %v7132_v26 = vrot.slane %v7116_v12, %v11300_v15  ;;  %v7139_v25 = vrot.slane %v7117_v24, %v11300_v15  ;;  %v13772_v5 = vld [vmem:[#allocation44_spill] sm:$0xff] }
 0x7a4   : > { %v12602_v16 = vmul.f32 %v7366_v38, %v13769_v21  ;;  %v12606_v4 = vmul.f32 %v12573_v37, %v13770_v10  ;;  %v12609_v9 = vmul.f32 %v7366_v38, %v13771_v18  ;;  %v7852_v53 = vadd.f32 %v12149_v48, %v13772_v5 }
 0x7a5   : > { %13768 = vst [vmem:[#allocation82_spill] sm:$0xff] %v12591_v28  ;;  %v7147_v36 = vcombine.high %v7125_v23, %v7125_v23  ;;  %v7148_v11 = vcombine.high %v7132_v26, %v7132_v26  ;;  %v7149_v56 = vcombine.high %v7139_v25, %v7139_v25  ;;  %v7378_v12 = vrot.slane %v7125_v23, %v11306_v7  ;;  %v12628_v23 = vld [vmem:[#allocation11 + $0x1f0] sm:$0xff]  ;;  %v13780_v28 = vld [vmem:[#allocation197_spill] sm:$0xff] }
 0x7a6   : > { %v12615_v20 = vsel %vm886_vm1, %v7897_v3, 0.0  ;;  %v12618_v24 = vrot.slane %v7118_v42, %v11300_v15  ;;  %v7382_v58 = vrot.slane %v7139_v25, %v11306_v7  ;;  %v7394_v2 = vrot.slane %v7132_v26, %v11306_v7 }
 0x7a7   : > { %v7386_v38 = vrot.slane %v7147_v36, %v11306_v7  ;;  %v7390_v21 = vrot.slane %v7149_v56, %v11306_v7  ;;  %v12625_v48 = vrot.slane %v7148_v11, %v11306_v7  ;;  %v7527_v10 = vmul.f32 %v7378_v12, %v11978_v6  ;;  %v13776_v11 = vld [vmem:[#allocation193_spill] sm:$0xff]  ;;  %v13782_v36 = vld [vmem:[#allocation202_spill] sm:$0xff] }
 0x7a8   : > { %v7528_v3 = vmul.f32 %v7382_v58, %v11988_v31  ;;  %v12632_v15 = vmul.f32 %v7394_v2, %v12008_v17  ;;  %v7839_v42 = vmul.f32 %v7378_v12, %v11974_v13  ;;  %v13773_v26 = vcombine.high %v12064_v34, %v12064_v34  ;;  %v13775_v13 = vld [vmem:[#allocation204_spill] sm:$0xff]  ;;  %v13777_v34 = vld [vmem:[#allocation195_spill] sm:$0xff] }
 0x7a9   : > { %v7529_v18 = vmul.f32 %v7386_v38, %v12004_v44  ;;  %v12641_v5 = vmul.f32 %v7390_v21, %v12006_v43  ;;  %v12645_v6 = vmul.f32 %v12625_v48, %v12628_v23  ;;  %v7591_v31 = vsub.f32 %v12016_v62, %v7527_v10  ;;  %v13779_v43 = vld [vmem:[#allocation207_spill] sm:$0xff]  ;;  %v13781_v10 = vld [vmem:[#allocation196_spill] sm:$0xff] }
 0x7aa   : > { %v7182_v25 = vrot.slane %v13773_v26, %v11306_v7  ;;  %v7592_v17 = vsub.f32 %v12022_v46, %v7528_v3  ;;  %v7840_v56 = vmul.f32 %v7382_v58, %v13776_v11  ;;  %v7841_v12 = vmul.f32 %v7386_v38, %v13777_v34  ;;  %v13778_v26 = vld [vmem:[#allocation203_spill] sm:$0xff]  ;;  %v13783_v11 = vld [vmem:[#allocation205_spill] sm:$0xff] }
 0x7ab   : > { %13774 = vst [vmem:[#allocation81_spill] sm:$0xff] %v12645_v6  ;;  %v7593_v44 = vsub.f32 %v13778_v26, %v7529_v18  ;;  %v7842_v59 = vmul.f32 %v7390_v21, %v13780_v28  ;;  %v7789_v6 = vmul.f32 %v9135_v0, %v12109_v41  ;;  %v7704_v62 = vsel %vm886_vm1, %v7591_v31, 0.0  ;;  %v13784_v26 = vld [vmem:[#allocation209_spill] sm:$0xff]  ;;  %v13785_v21 = vld [vmem:[#allocation210_spill] sm:$0xff]  ;;  %v13786_v0 = vld [vmem:[#allocation211_spill] sm:$0xff] }
 0x7ac   : > { %v7705_v46 = vsel %vm886_vm1, %v7592_v17, 0.0  ;;  %v7843_v3 = vmul.f32 %v7394_v2, %v13781_v10  ;;  %v7903_v58 = vadd.f32 %v7839_v42, %v13782_v36  ;;  %v7398_v38 = vrot.slane %v12618_v24, %v11306_v7  ;;  %v9136_v17 = vld [vmem:[#allocation10 + $0x38] sm:$0xff] }
 0x7ad   : > { %v7706_v18 = vadd.f32 %v7705_v46, %v7704_v62  ;;  %v7904_v34 = vadd.f32 %v7840_v56, %v13783_v11  ;;  %v7905_v63 = vadd.f32 %v7841_v12, %v13784_v26  ;;  %v7707_v28 = vsel %vm886_vm1, %v7593_v44, 0.0  ;;  %v13787_v62 = vld [vmem:[#allocation98_spill] sm:$0xff] }
 0x7ae   : > { %v12668_v41 = vadd.f32 %v7842_v59, %v13785_v21  ;;  %v12671_v31 = vadd.f32 %v7843_v3, %v13786_v0  ;;  %v7790_v2 = vmul.f32 %v9136_v17, %v7182_v25  ;;  %v8016_v42 = vsel %vm886_vm1, %v7903_v58, 0.0  ;;  %v13788_v59 = vld [vmem:[#allocation100_spill] sm:$0xff]  ;;  %v13789_v11 = vld [vmem:[#allocation206_spill] sm:$0xff]  ;;  %v13791_v21 = vld [vmem:[#allocation215_spill] sm:$0xff] }
 0x7af   : > { %v12673_v10 = vadd.f32 %v7707_v28, %v7706_v18  ;;  %v8017_v36 = vsel %vm886_vm1, %v7904_v34, 0.0  ;;  %v7853_v56 = vadd.f32 %v7789_v6, %v13787_v62  ;;  %v7150_v12 = vcombine.high %v12618_v24, %v12618_v24  ;;  %v13790_v18 = vld [vmem:[#allocation198_spill] sm:$0xff]  ;;  %v13792_v17 = vld [vmem:[#allocation219_spill] sm:$0xff] }
 0x7b0   : > { %v12680_v44 = vadd.f32 %v8017_v36, %v8016_v42  ;;  %v7854_v46 = vadd.f32 %v7790_v2, %v13788_v59  ;;  %v7915_v3 = vadd.f32 %v12152_v19, %v12130_v1  ;;  %v12686_v26 = vmul.f32 %v7398_v38, %v13789_v11  ;;  %v9137_v2 = vld [vmem:[#allocation10 + $0x70] sm:$0xff] }
 0x7b1   : > { %v12689_v28 = vmul.f32 %v7398_v38, %v13790_v18  ;;  %v12692_v58 = vsel %vm886_vm1, %v7905_v63, 0.0  ;;  %v7916_v6 = vsel %vm886_vm1, %v12117_v47, 0.0  ;;  %v7918_v0 = vsel %vm886_vm1, %v13791_v21, 0.0  ;;  %v13794_v36 = vld [vmem:[#allocation27_spill] sm:$0xff]  ;;  %v9139_v18 = vld [vmem:[#allocation10 + $0x78] sm:$0xff] }
 0x7b2   : > { %v7917_v34 = vadd.f32 %v7916_v6, %v7915_v3  ;;  %v13793_v1 = vcombine.high %v13792_v17, %v13792_v17  ;;  %v7797_v42 = vmul.f32 %v9137_v2, %v12196_v55  ;;  %v7920_v38 = vsel %vm886_vm1, %v7852_v53, 0.0  ;;  %v9138_v3 = vld [vmem:[#allocation11 + $0x38] sm:$0xff]  ;;  %v13795_v55 = vld [vmem:[#allocation105_spill] sm:$0xff] }
 0x7b3   : > { %v7922_v63 = vsel %vm886_vm1, %v7853_v56, 0.0  ;;  %v7860_v62 = vadd.f32 %v12230_v61, %v13794_v36  ;;  %v7930_v47 = vadd.f32 %v12279_v50, %v12219_v40  ;;  %v12709_v11 = vmul.f32 %v9138_v3, %v7182_v25  ;;  %v13798_v2 = vld [vmem:[#allocation125_spill] sm:$0xff] }
 0x7b4   : > { %v7214_v19 = vrot.slane %v13793_v1, %v11306_v7  ;;  %v7919_v59 = vadd.f32 %v7918_v0, %v7917_v34  ;;  %v7931_v21 = vsel %vm886_vm1, %v12204_v52, 0.0  ;;  %v7861_v17 = vadd.f32 %v7797_v42, %v13795_v55  ;;  %v9140_v1 = vld [vmem:[#allocation10 + $0x130] sm:$0xff]  ;;  %v13797_v34 = vld [vmem:[#allocation110_spill] sm:$0xff] }
 0x7b5   : > { %v7932_v53 = vadd.f32 %v7931_v21, %v7930_v47  ;;  %v13796_v56 = vcombine.high %v12325_v8, %v12325_v8  ;;  %v7821_v40 = vmul.f32 %v9140_v1, %v12415_v27  ;;  %v7933_v0 = vsel %vm886_vm1, %v12211_v45, 0.0  ;;  %v9141_v47 = vld [vmem:[#allocation10 + $0x138] sm:$0xff] }
 0x7b6   : > { %v7798_v6 = vmul.f32 %v9139_v18, %v7214_v19  ;;  %v7921_v50 = vadd.f32 %v7920_v38, %v7919_v59  ;;  %v7884_v52 = vadd.f32 %v12454_v35, %v13798_v2  ;;  %v7924_v42 = vsel %vm886_vm1, %v7854_v46, 0.0  ;;  %v13799_v18 = vld [vmem:[#allocation129_spill] sm:$0xff]  ;;  %v9142_v27 = vld [vmem:[#allocation11 + $0x78] sm:$0xff]  ;;  %v13800_v35 = vld [vmem:[#allocation134_spill] sm:$0xff] }
 0x7b7   : > { %v7310_v61 = vrot.slane %v13796_v56, %v11306_v7  ;;  %v7934_v36 = vadd.f32 %v7933_v0, %v7932_v53  ;;  %v7885_v8 = vadd.f32 %v7821_v40, %v13799_v18  ;;  %v7935_v55 = vsel %vm886_vm1, %v7860_v62, 0.0  ;;  %v9143_v1 = vld [vmem:[#allocation11 + $0x138] sm:$0xff] }
 0x7b8   : > { %v7862_v25 = vadd.f32 %v7798_v6, %v13797_v34  ;;  %v7923_v21 = vadd.f32 %v7922_v63, %v7921_v50  ;;  %v12727_v38 = vmul.f32 %v9142_v27, %v7214_v19  ;;  %v7975_v59 = vadd.f32 %v12460_v39, %v12440_v57  ;;  %v13801_v62 = vld [vmem:[#allocation220_spill] sm:$0xff] }
 0x7b9   : > { %v7822_v3 = vmul.f32 %v9141_v47, %v7310_v61  ;;  %v7936_v45 = vadd.f32 %v7935_v55, %v7934_v36  ;;  %v7937_v6 = vsel %vm886_vm1, %v7861_v17, 0.0  ;;  %v7976_v46 = vsel %vm886_vm1, %v12425_v22, 0.0  ;;  %v13803_v57 = vld [vmem:[#allocation28_spill] sm:$0xff]  ;;  %v9144_v17 = vld [vmem:[#allocation10 + $0xb0] sm:$0xff]  ;;  %v13808_v55 = vld [vmem:[#allocation25_spill] sm:$0xff] }
 0x7ba   : > { %v7925_v53 = vadd.f32 %v7924_v42, %v7923_v21  ;;  %v12735_v40 = vmul.f32 %v9143_v1, %v7310_v61  ;;  %v7977_v63 = vadd.f32 %v7976_v46, %v7975_v59  ;;  %v13802_v19 = vcombine.high %v13801_v62, %v13801_v62  ;;  %v13804_v0 = vld [vmem:[#allocation32_spill] sm:$0xff]  ;;  %v13807_v21 = vld [vmem:[#allocation39_spill] sm:$0xff]  ;;  %v13810_v62 = vld [vmem:[#allocation130_spill] sm:$0xff] }
 0x7bb   : > { %v7886_v56 = vadd.f32 %v7822_v3, %v13800_v35  ;;  %v7938_v34 = vadd.f32 %v7937_v6, %v7936_v45  ;;  %v7978_v39 = vsel %vm886_vm1, %v13803_v57, 0.0  ;;  %v7805_v2 = vmul.f32 %v9144_v17, %v13804_v0  ;;  %v13805_v36 = vld [vmem:[#allocation72_spill] sm:$0xff]  ;;  %v13809_v35 = vld [vmem:[#allocation21_spill] sm:$0xff]  ;;  %v13813_v17 = vld [vmem:[#allocation34_spill] sm:$0xff] }
 0x7bc   : > { %v7246_v50 = vrot.slane %v13802_v19, %v11306_v7  ;;  %v13806_v47 = vld [vmem:[#allocation36_spill] sm:$0xff]  ;;  %8039 = vrot.lane.b32.xlu1 %v7925_v53, %s9420_s30  ;;  %v7939_v61 = vsel %vm886_vm1, %v7862_v25, 0.0  ;;  %v7979_v42 = vadd.f32 %v7978_v39, %v7977_v63  ;;  %v7945_v27 = vadd.f32 %v13808_v55, %v13807_v21  ;;  %v13812_v63 = vld [vmem:[#allocation47_spill] sm:$0xff]  ;;  %v13818_v21 = vld [vmem:[#allocation26_spill] sm:$0xff] }
 0x7bd   : > { %v7868_v22 = vadd.f32 %v13806_v47, %v13805_v36  ;;  %v9145_v3 = vld [vmem:[#allocation10 + $0xb8] sm:$0xff]  ;;  %v7940_v59 = vadd.f32 %v7939_v61, %v7938_v34  ;;  %v7980_v45 = vsel %vm886_vm1, %v7884_v52, 0.0  ;;  %v7982_v6 = vsel %vm886_vm1, %v7885_v8, 0.0  ;;  %v9146_v52 = vld [vmem:[#allocation10 + $0xf0] sm:$0xff]  ;;  %v13815_v36 = vld [vmem:[#allocation54_spill] sm:$0xff] }
 0x7be   : > { %v7806_v18 = vmul.f32 %v9145_v3, %v7246_v50  ;;  %v7946_v46 = vsel %vm886_vm1, %v13809_v35, 0.0  ;;  %v7981_v1 = vadd.f32 %v7980_v45, %v7979_v42  ;;  %v7869_v19 = vadd.f32 %v7805_v2, %v13810_v62  ;;  %v13811_v53 = vld [vmem:[#allocation132_spill] sm:$0xff]  ;;  %v13816_v47 = vld [vmem:[#allocation95_spill] sm:$0xff]  ;;  %v13819_v55 = vld [vmem:[#allocation50_spill] sm:$0xff] }
 0x7bf   : > { %v7947_v25 = vadd.f32 %v7946_v46, %v7945_v27  ;;  %v7948_v39 = vsel %vm886_vm1, %v13812_v63, 0.0  ;;  %v13814_v34 = vcombine.high %v13813_v17, %v13813_v17  ;;  %v7813_v8 = vmul.f32 %v9146_v52, %v13815_v36  ;;  %v13817_v61 = vld [vmem:[#allocation60_spill] sm:$0xff]  ;;  %v13820_v63 = vld [vmem:[#allocation55_spill] sm:$0xff] }
 0x7c0   : > { %v7870_v57 = vadd.f32 %v7806_v18, %v13811_v53  ;;  %v7876_v3 = vadd.f32 %v13817_v61, %v13816_v47  ;;  %8041 = vrot.lane.b32.xlu1 %v7940_v59, %s9420_s30  ;;  %v7983_v2 = vadd.f32 %v7982_v6, %v7981_v1  ;;  %v7984_v42 = vsel %vm886_vm1, %v7886_v56, 0.0  ;;  %v9147_v45 = vld [vmem:[#allocation11 + $0xb8] sm:$0xff] }
 0x7c1   : > { %v7278_v0 = vrot.slane %v13814_v34, %v11306_v7  ;;  %v7949_v18 = vadd.f32 %v7948_v39, %v7947_v25  ;;  %v7960_v27 = vadd.f32 %v13819_v55, %v13818_v21  ;;  %v12769_v35 = vmul.f32 %v9147_v45, %v7246_v50  ;;  %v9148_v62 = vld [vmem:[#allocation10 + $0xf8] sm:$0xff]  ;;  %v13822_v25 = vld [vmem:[#allocation145_spill] sm:$0xff] }
 0x7c2   : > { %v7950_v46 = vsel %vm886_vm1, %v7868_v22, 0.0  ;;  %v7961_v17 = vsel %vm886_vm1, %v13820_v63, 0.0  ;;  %v7985_v34 = vadd.f32 %v7984_v42, %v7983_v2  ;;  %v7952_v59 = vsel %vm886_vm1, %v7869_v19, 0.0  ;;  %v13821_v56 = vld [vmem:[#allocation140_spill] sm:$0xff]  ;;  %v9149_v42 = vld [vmem:[#allocation10 + $0x170] sm:$0xff] }
 0x7c3   : > { %v7814_v53 = vmul.f32 %v9148_v62, %v7278_v0  ;;  %v7951_v52 = vadd.f32 %v7950_v46, %v7949_v18  ;;  %v7962_v6 = vadd.f32 %v7961_v17, %v7960_v27  ;;  %v7877_v1 = vadd.f32 %v7813_v8, %v13821_v56  ;;  %v13823_v36 = vld [vmem:[#allocation56_spill] sm:$0xff]  ;;  %v13825_v18 = vld [vmem:[#allocation161_spill] sm:$0xff]  ;;  %v13827_v17 = vld [vmem:[#allocation63_spill] sm:$0xff] }
 0x7c4   : > { %v7963_v50 = vsel %vm886_vm1, %v13823_v36, 0.0  ;;  %v13824_v22 = vcombine.high %v12465_v49, %v12465_v49  ;;  %8047 = vrot.lane.b32.xlu0 %v7985_v34, %s9420_s30  ;;  %v7829_v19 = vmul.f32 %v9149_v42, %v12491_v54  ;;  %v7892_v8 = vadd.f32 %v12540_v60, %v13825_v18  ;;  %v9150_v27 = vld [vmem:[#allocation10 + $0x178] sm:$0xff]  ;;  %v13829_v56 = vld [vmem:[#allocation53_spill] sm:$0xff]  ;;  %v9152_v36 = vld [vmem:[#allocation10 + $0x1b0] sm:$0xff] }
 0x7c5   : > { %v7878_v39 = vadd.f32 %v7814_v53, %v13822_v25  ;;  %v7953_v61 = vadd.f32 %v7952_v59, %v7951_v52  ;;  %v7964_v2 = vadd.f32 %v7963_v50, %v7962_v6  ;;  %v7954_v21 = vsel %vm886_vm1, %v7870_v57, 0.0  ;;  %v13826_v53 = vld [vmem:[#allocation171_spill] sm:$0xff]  ;;  %v9151_v52 = vld [vmem:[#allocation11 + $0xf8] sm:$0xff] }
 0x7c6   : > { %v7342_v47 = vrot.slane %v13824_v22, %v11306_v7  ;;  %v7965_v55 = vsel %vm886_vm1, %v7876_v3, 0.0  ;;  %v7990_v49 = vadd.f32 %v12545_v51, %v12527_v32  ;;  %v7893_v63 = vadd.f32 %v7829_v19, %v13826_v53  ;;  %v13828_v57 = vld [vmem:[#allocation175_spill] sm:$0xff]  ;;  %v13831_v22 = vld [vmem:[#allocation190_spill] sm:$0xff]  ;;  %v9153_v18 = vld [vmem:[#allocation10 + $0x1b8] sm:$0xff] }
 0x7c7   : > { %v7955_v46 = vadd.f32 %v7954_v21, %v7953_v61  ;;  %v7966_v62 = vadd.f32 %v7965_v55, %v7964_v2  ;;  %v7991_v34 = vsel %vm886_vm1, %v13827_v17, 0.0  ;;  %v7967_v54 = vsel %vm886_vm1, %v7877_v1, 0.0  ;;  %v13832_v55 = vld [vmem:[#allocation192_spill] sm:$0xff]  ;;  %v13834_v53 = vld [vmem:[#allocation194_spill] sm:$0xff] }
 0x7c8   : > { %v7830_v45 = vmul.f32 %v9150_v27, %v7342_v47  ;;  %v12795_v60 = vmul.f32 %v9151_v52, %v7278_v0  ;;  %v7992_v3 = vadd.f32 %v7991_v34, %v7990_v49  ;;  %v7993_v32 = vsel %vm886_vm1, %v13829_v56, 0.0  ;;  %v5901_v27 = vld [vmem:[#allocation10 + $0x1f0] sm:$0xff]  ;;  %v13836_v52 = vld [vmem:[#allocation201_spill] sm:$0xff] }
 0x7c9   : > { %8043 = vrot.lane.b32.xlu1 %v7955_v46, %s9420_s30  ;;  %v7968_v6 = vadd.f32 %v7967_v54, %v7966_v62  ;;  %v13830_v51 = vcombine.high %v12535_v14, %v12535_v14  ;;  %v7837_v1 = vmul.f32 %v9152_v36, %v12573_v37  ;;  %v7969_v0 = vsel %vm886_vm1, %v7878_v39, 0.0  ;;  %v5966_v46 = vld [vmem:[#allocation11 + $0x1f8] sm:$0xff] }
 0x7ca   : > { %v7894_v59 = vadd.f32 %v7830_v45, %v13828_v57  ;;  %v7994_v50 = vadd.f32 %v7993_v32, %v7992_v3  ;;  %v7900_v61 = vadd.f32 %v12609_v9, %v13831_v22  ;;  %v8005_v2 = vadd.f32 %v12615_v20, %v12595_v33  ;;  %v5902_v9 = vld [vmem:[#allocation10 + $0x1f8] sm:$0xff] }
 0x7cb   : > { %v7374_v25 = vrot.slane %v13830_v51, %v11306_v7  ;;  %v7970_v42 = vadd.f32 %v7969_v0, %v7968_v6  ;;  %v7995_v19 = vsel %vm886_vm1, %v7892_v8, 0.0  ;;  %v7901_v14 = vadd.f32 %v7837_v1, %v13832_v55  ;;  %v13833_v33 = vld [vmem:[#allocation200_spill] sm:$0xff] }
 0x7cc   : > { %v7996_v45 = vadd.f32 %v7995_v19, %v7994_v50  ;;  %v7997_v37 = vsel %vm886_vm1, %v7893_v63, 0.0  ;;  %v7999_v39 = vsel %vm886_vm1, %v7894_v59, 0.0  ;;  %v8006_v49 = vsel %vm886_vm1, %v12584_v29, 0.0  ;;  %v13837_v36 = vld [vmem:[#allocation212_spill] sm:$0xff]  ;;  %v13838_v19 = vld [vmem:[#allocation217_spill] sm:$0xff] }
 0x7cd   : > { %v7838_v21 = vmul.f32 %v9153_v18, %v7374_v25  ;;  %8045 = vrot.lane.b32.xlu1 %v7970_v42, %s9420_s30  ;;  %v8007_v8 = vadd.f32 %v8006_v49, %v8005_v2  ;;  %v8008_v62 = vsel %vm886_vm1, %v12587_v30, 0.0  ;;  %v13835_v17 = vcombine.high %v13834_v53, %v13834_v53  ;;  %v9154_v0 = vld [vmem:[#allocation11 + $0x178] sm:$0xff]  ;;  %v13839_v18 = vld [vmem:[#allocation43_spill] sm:$0xff]  ;;  %v13846_v53 = vld [vmem:[#allocation38_spill] sm:$0xff] }
 0x7ce   : > { %v7998_v34 = vadd.f32 %v7997_v37, %v7996_v45  ;;  %v8010_v54 = vsel %vm886_vm1, %v7900_v61, 0.0  ;;  %v12827_v29 = vmul.f32 %v13836_v52, %v5901_v27  ;;  %v7406_v57 = vrot.slane %v7150_v12, %v11306_v7  ;;  %v9155_v2 = vld [vmem:[#allocation11 + $0x1b8] sm:$0xff] }
 0x7cf   : > { %v7902_v20 = vadd.f32 %v7838_v21, %v13833_v33  ;;  %v6622_v63 = vrot.slane %v13835_v17, %v11306_v7  ;;  %v8009_v59 = vadd.f32 %v8008_v62, %v8007_v8  ;;  %v7781_v30 = vmul.f32 %v13836_v52, %v12628_v23  ;;  %v13845_v8 = vld [vmem:[#allocation216_spill] sm:$0xff]  ;;  %v13847_v17 = vld [vmem:[#allocation213_spill] sm:$0xff]  ;;  %v13850_v52 = vld [vmem:[#allocation30_spill] sm:$0xff] }
 0x7d0   : > { %v8000_v56 = vadd.f32 %v7999_v39, %v7998_v34  ;;  %v7845_v32 = vmul.f32 %v12625_v48, %v5901_v27  ;;  %v7846_v51 = vmul.f32 %v7406_v57, %v5902_v9  ;;  %v7908_v1 = vadd.f32 %v12689_v28, %v13837_v36  ;;  %v13841_v27 = vld [vmem:[#allocation214_spill] sm:$0xff] }
 0x7d1   : > { %v12833_v3 = vmul.f32 %v6622_v63, %v5902_v9  ;;  %v7782_v6 = vmul.f32 %v6622_v63, %v5966_v46  ;;  %v12840_v50 = vmul.f32 %v9154_v0, %v7342_v47  ;;  %v8011_v22 = vadd.f32 %v8010_v54, %v8009_v59  ;;  %v13843_v9 = vld [vmem:[#allocation218_spill] sm:$0xff] }
 0x7d2   : > { %v8012_v7 = vsel %vm886_vm1, %v7901_v14, 0.0  ;;  %v8020_v24 = vadd.f32 %v12692_v58, %v12680_v44  ;;  %8049 = vrot.lane.b32.xlu0 %v8000_v56, %s9420_s30  ;;  %v7909_v23 = vadd.f32 %v7845_v32, %v7781_v30  ;;  %v8021_v48 = vsel %vm886_vm1, %v12668_v41, 0.0  ;;  %v8071_v44 = vld [vmem:[%s13090_s6] sm:$0xff]  ;;  %v8072_v58 = vld [vmem:[%s13090_s6 + $0x8] sm:$0xff]  ;;  %v13852_v32 = vld [vmem:[#allocation24_spill] sm:$0xff] }
 0x7d3   : > { %v7910_v12 = vadd.f32 %v7846_v51, %v7782_v6  ;;  %v12848_v61 = vmul.f32 %v7406_v57, %v5966_v46  ;;  %v12850_v28 = vmul.f32 %v9155_v2, %v7374_v25  ;;  %v8013_v47 = vadd.f32 %v8012_v7, %v8011_v22  ;;  %v13840_v14 = vld [vmem:[#allocation37_spill] sm:$0xff]  ;;  %v13844_v46 = vld [vmem:[#allocation78_spill] sm:$0xff]  ;;  %v13851_v57 = vld [vmem:[#allocation35_spill] sm:$0xff] }
 0x7d4   : > { %v8022_v42 = vadd.f32 %v8021_v48, %v8020_v24  ;;  %v7540_v21 = vsub.f32 %v13839_v18, %v13838_v19  ;;  %v8014_v41 = vsel %vm886_vm1, %v7902_v20, 0.0  ;;  %v8023_v55 = vsel %vm886_vm1, %v12671_v31, 0.0  ;;  %v13849_v31 = vld [vmem:[#allocation97_spill] sm:$0xff]  ;;  %v13857_v48 = vld [vmem:[#allocation22_spill] sm:$0xff] }
 0x7d5   : > { %v8025_v25 = vsel %vm886_vm1, %v7908_v1, 0.0  ;;  %v13842_v45 = vsub.f32 %v13840_v14, %v13841_v27  ;;  %v8015_v39 = vadd.f32 %v8014_v41, %v8013_v47  ;;  %v7541_v33 = vsub.f32 %v13844_v46, %v13843_v9  ;;  %v13853_v51 = vld [vmem:[#allocation41_spill] sm:$0xff]  ;;  %v13859_v19 = vld [vmem:[#allocation42_spill] sm:$0xff]  ;;  %v13864_v27 = vld [vmem:[#allocation127_spill] sm:$0xff] }
 0x7d6   : > { %v8024_v49 = vadd.f32 %v8023_v55, %v8022_v42  ;;  %v13848_v20 = vsub.f32 %v13846_v53, %v13847_v17  ;;  %v7542_v34 = vsub.f32 %v13849_v31, %v12709_v11  ;;  %v8895_v54 = vpack.c.bf16 %v8072_v58, %v8071_v44  ;;  %v13855_v11 = vld [vmem:[#allocation48_spill] sm:$0xff]  ;;  %v13856_v7 = vld [vmem:[#allocation101_spill] sm:$0xff]  ;;  %v13866_v46 = vld [vmem:[#allocation31_spill] sm:$0xff] }
 0x7d7   : > { %v7604_v37 = vsel %vm886_vm1, %v13842_v45, 0.0  ;;  %v7548_v59 = vsub.f32 %v13851_v57, %v13850_v52  ;;  %8051 = vrot.lane.b32.xlu0 %v8015_v39, %s9420_s30  ;;  %v8027_v6 = vsel %vm886_vm1, %v7909_v23, 0.0  ;;  %v13854_v36 = vsub.f32 %v13852_v32, %v13853_v51  ;;  %v13858_v23 = vld [vmem:[#allocation33_spill] sm:$0xff]  ;;  %v13861_v58 = vld [vmem:[#allocation104_spill] sm:$0xff]  ;;  %v13869_v17 = vld [vmem:[#allocation126_spill] sm:$0xff] }
 0x7d8   : > { %v7605_v62 = vadd.f32 %v7604_v37, %v13845_v8  ;;  %v7606_v63 = vsel %vm886_vm1, %v13848_v20, 0.0  ;;  %v8026_v30 = vadd.f32 %v8025_v25, %v8024_v49  ;;  %v8029_v0 = vsel %vm886_vm1, %v7910_v12, 0.0  ;;  %8896 = vmatprep.subr.bf16.mxu0 %v8895_v54  ;;  %8899 = vmatprep.subr.bf16.mxu1 %v8895_v54  ;;  %v13862_v55 = vld [vmem:[#allocation40_spill] sm:$0xff]  ;;  %v13871_v52 = vld [vmem:[#allocation57_spill] sm:$0xff]  ;;  %v13872_v57 = vld [vmem:[#allocation46_spill] sm:$0xff] }
 0x7d9   : > { %v7619_v1 = vsel %vm886_vm1, %v13854_v36, 0.0  ;;  %v7608_v22 = vsel %vm886_vm1, %v7540_v21, 0.0  ;;  %v7549_v24 = vsub.f32 %v13856_v7, %v13855_v11  ;;  %8898 = vmatpush3.bf16.msra.mxu0 %v8895_v54  ;;  %v13860_v18 = vsub.f32 %v13858_v23, %v13859_v19  ;;  %8900 = vmatpush3.bf16.msra.mxu1 %v8895_v54  ;;  %v13863_v25 = vld [vmem:[#allocation64_spill] sm:$0xff]  ;;  %v13876_v36 = vld [vmem:[#allocation66_spill] sm:$0xff]  ;;  %v13883_v19 = vld [vmem:[#allocation91_spill] sm:$0xff] }
 0x7da   : > { %v7607_v56 = vadd.f32 %v7606_v63, %v7605_v62  ;;  %v7620_v2 = vadd.f32 %v7619_v1, %v13857_v48  ;;  %v8028_v47 = vadd.f32 %v8027_v6, %v8026_v30  ;;  %v7550_v12 = vsub.f32 %v13861_v58, %v12727_v38  ;;  %v13865_v9 = vld [vmem:[#allocation68_spill] sm:$0xff]  ;;  %v13870_v63 = vld [vmem:[#allocation45_spill] sm:$0xff]  ;;  %v13879_v48 = vld [vmem:[#allocation119_spill] sm:$0xff] }
 0x7db   : > { %v7621_v44 = vsel %vm886_vm1, %v13860_v18, 0.0  ;;  %v7610_v21 = vsel %vm886_vm1, %v7541_v33, 0.0  ;;  %v7556_v14 = vsub.f32 %v13863_v25, %v13862_v55  ;;  %v7558_v45 = vsub.f32 %v13864_v27, %v12769_v35  ;;  %v13868_v33 = vld [vmem:[#allocation23_spill] sm:$0xff]  ;;  %v13874_v6 = vld [vmem:[#allocation65_spill] sm:$0xff]  ;;  %v13877_v1 = vld [vmem:[#allocation128_spill] sm:$0xff] }
 0x7dc   : > { %v7609_v42 = vadd.f32 %v7608_v22, %v7607_v56  ;;  %v7622_v41 = vadd.f32 %v7621_v44, %v7620_v2  ;;  %v8030_v37 = vadd.f32 %v8029_v0, %v8028_v47  ;;  %v7623_v49 = vsel %vm886_vm1, %v7548_v59, 0.0  ;;  %v13875_v56 = vld [vmem:[#allocation120_spill] sm:$0xff]  ;;  %v13878_v22 = vld [vmem:[#allocation131_spill] sm:$0xff]  ;;  %v13882_v23 = vld [vmem:[#allocation62_spill] sm:$0xff] }
 0x7dd   : > { %v13867_v8 = vsub.f32 %v13865_v9, %v13866_v46  ;;  %v7612_v38 = vsel %vm886_vm1, %v7542_v34, 0.0  ;;  %v7557_v20 = vsub.f32 %v13869_v17, %v13868_v33  ;;  %v7625_v54 = vsel %vm886_vm1, %v7549_v24, 0.0  ;;  %v13880_v2 = vld [vmem:[#allocation51_spill] sm:$0xff]  ;;  %v13886_v25 = vld [vmem:[#allocation58_spill] sm:$0xff] }
 0x7de   : > { %v7611_v39 = vadd.f32 %v7610_v21, %v7609_v42  ;;  %v7624_v53 = vadd.f32 %v7623_v49, %v7622_v41  ;;  %8053 = vrot.lane.b32.xlu0 %v8030_v37, %s9420_s30  ;;  %v13873_v59 = vsub.f32 %v13871_v52, %v13872_v57  ;;  %v7572_v34 = vsub.f32 %v13875_v56, %v13874_v6  ;;  %v13884_v41 = vld [vmem:[#allocation61_spill] sm:$0xff]  ;;  %v13893_v17 = vld [vmem:[#allocation59_spill] sm:$0xff]  ;;  %v13897_v52 = vld [vmem:[#allocation144_spill] sm:$0xff] }
 0x7df   : > { %v7634_v62 = vsel %vm886_vm1, %v13867_v8, 0.0  ;;  %v7573_v0 = vsub.f32 %v13877_v1, %v13876_v36  ;;  %v7574_v11 = vsub.f32 %v13878_v22, %v12735_v40  ;;  %v7627_v7 = vsel %vm886_vm1, %v7550_v12, 0.0  ;;  %v13885_v12 = vld [vmem:[#allocation117_spill] sm:$0xff]  ;;  %v13902_v22 = vld [vmem:[#allocation170_spill] sm:$0xff] }
 0x7e0   : > { %v7635_v31 = vadd.f32 %v7634_v62, %v13870_v63  ;;  %v12911_v35 = vadd.f32 %v7612_v38, %v7611_v39  ;;  %v7636_v30 = vsel %vm886_vm1, %v13873_v59, 0.0  ;;  %v7626_v32 = vadd.f32 %v7625_v54, %v7624_v53  ;;  %v13888_v39 = vld [vmem:[#allocation88_spill] sm:$0xff]  ;;  %v13889_v49 = vld [vmem:[#allocation29_spill] sm:$0xff]  ;;  %v13892_v53 = vld [vmem:[#allocation135_spill] sm:$0xff] }
 0x7e1   : > { %v7638_v24 = vsel %vm886_vm1, %v7556_v14, 0.0  ;;  %v13881_v47 = vsub.f32 %v13879_v48, %v13880_v2  ;;  %v7564_v18 = vsub.f32 %v13883_v19, %v13882_v23  ;;  %v7640_v21 = vsel %vm886_vm1, %v7557_v20, 0.0  ;;  %v13891_v38 = vld [vmem:[#allocation52_spill] sm:$0xff]  ;;  %v13895_v63 = vld [vmem:[#allocation49_spill] sm:$0xff] }
 0x7e2   : > { %v7637_v51 = vadd.f32 %v7636_v30, %v7635_v31  ;;  %v12932_v44 = vadd.f32 %v7627_v7, %v7626_v32  ;;  %v7642_v40 = vsel %vm886_vm1, %v7558_v45, 0.0  ;;  %v13887_v14 = vsub.f32 %v13885_v12, %v13886_v25  ;;  %v13894_v45 = vld [vmem:[#allocation89_spill] sm:$0xff]  ;;  %v13908_v12 = vld [vmem:[#allocation71_spill] sm:$0xff] }
 0x7e3   : > { %v7664_v42 = vsel %vm886_vm1, %v13881_v47, 0.0  ;;  %v7668_v37 = vsel %vm886_vm1, %v7572_v34, 0.0  ;;  %v13890_v9 = vsub.f32 %v13888_v39, %v13889_v49  ;;  %v7565_v33 = vsub.f32 %v13892_v53, %v13891_v38  ;;  %v13898_v59 = vld [vmem:[#allocation69_spill] sm:$0xff]  ;;  %v13901_v34 = vld [vmem:[#allocation166_spill] sm:$0xff]  ;;  %v13903_v47 = vld [vmem:[#allocation155_spill] sm:$0xff] }
 0x7e4   : > { %v7639_v58 = vadd.f32 %v7638_v24, %v7637_v51  ;;  %v7665_v55 = vadd.f32 %v7664_v42, %v13884_v41  ;;  %v7666_v27 = vsel %vm886_vm1, %v13887_v14, 0.0  ;;  %v13896_v31 = vsub.f32 %v13894_v45, %v13895_v63  ;;  %v13899_v30 = vld [vmem:[#allocation157_spill] sm:$0xff]  ;;  %v13906_v41 = vld [vmem:[#allocation70_spill] sm:$0xff] }
 0x7e5   : > { %v7649_v46 = vsel %vm886_vm1, %v13890_v9, 0.0  ;;  %v7566_v57 = vsub.f32 %v13897_v52, %v12795_v60  ;;  %v7580_v6 = vsub.f32 %v13899_v30, %v13898_v59  ;;  %v13900_v56 = vld [vmem:[#allocation77_spill] sm:$0xff]  ;;  %v7582_v7 = vsub.f32 %v13902_v22, %v12840_v50  ;;  %v13904_v60 = vld [vmem:[#allocation67_spill] sm:$0xff]  ;;  %v13917_v63 = vld [vmem:[#allocation182_spill] sm:$0xff] }
 0x7e6   : > { %v7641_v8 = vadd.f32 %v7640_v21, %v7639_v58  ;;  %v7667_v62 = vadd.f32 %v7666_v27, %v7665_v55  ;;  %v7650_v20 = vadd.f32 %v7649_v46, %v13893_v17  ;;  %v7651_v54 = vsel %vm886_vm1, %v13896_v31, 0.0  ;;  %v13912_v27 = vld [vmem:[#allocation199_spill] sm:$0xff]  ;;  %v13913_v46 = vld [vmem:[#allocation181_spill] sm:$0xff]  ;;  %v13916_v17 = vld [vmem:[#allocation82_spill] sm:$0xff] }
 0x7e7   : > { %v7581_v32 = vsub.f32 %v13901_v34, %v13900_v56  ;;  %v7670_v24 = vsel %vm886_vm1, %v7573_v0, 0.0  ;;  %v7672_v48 = vsel %vm886_vm1, %v7574_v11, 0.0  ;;  %v7653_v2 = vsel %vm886_vm1, %v7564_v18, 0.0  ;;  %v13910_v11 = vld [vmem:[#allocation185_spill] sm:$0xff]  ;;  %v13911_v18 = vld [vmem:[#allocation191_spill] sm:$0xff]  ;;  %v13920_v52 = vld [vmem:[#allocation208_spill] sm:$0xff] }
 0x7e8   : > { %v7643_v51 = vadd.f32 %v7642_v40, %v7641_v8  ;;  %v7669_v36 = vadd.f32 %v7668_v37, %v7667_v62  ;;  %v7652_v1 = vadd.f32 %v7651_v54, %v7650_v20  ;;  %v13905_v42 = vsub.f32 %v13903_v47, %v13904_v60  ;;  %v13907_v40 = vld [vmem:[#allocation154_spill] sm:$0xff]  ;;  %v13914_v8 = vld [vmem:[#allocation84_spill] sm:$0xff]  ;;  %v13921_v56 = vld [vmem:[#allocation81_spill] sm:$0xff] }
 0x7e9   : > { %v7655_v21 = vsel %vm886_vm1, %v7565_v33, 0.0  ;;  %v13909_v50 = vsub.f32 %v13907_v40, %v13908_v12  ;;  %v7588_v25 = vsub.f32 %v13910_v11, %v12602_v16  ;;  %v7589_v14 = vsub.f32 %v13911_v18, %v12606_v4 }
 0x7ea   : > { %v7679_v23 = vsel %vm886_vm1, %v13905_v42, 0.0  ;;  %v7671_v19 = vadd.f32 %v7670_v24, %v7669_v36  ;;  %v7654_v58 = vadd.f32 %v7653_v2, %v7652_v1  ;;  %v7590_v37 = vsub.f32 %v13912_v27, %v12850_v28  ;;  %v13918_v28 = vld [vmem:[#allocation80_spill] sm:$0xff] }
 0x7eb   : > { %v7680_v55 = vadd.f32 %v7679_v23, %v13906_v41  ;;  %v7681_v0 = vsel %vm886_vm1, %v13909_v50, 0.0  ;;  %v13915_v62 = vsub.f32 %v13913_v46, %v13914_v8  ;;  %v7657_v53 = vsel %vm886_vm1, %v7566_v57, 0.0 }
 0x7ec   : > { %v7673_v39 = vadd.f32 %v7672_v48, %v7671_v19  ;;  %v7656_v49 = vadd.f32 %v7655_v21, %v7654_v58  ;;  %v7683_v33 = vsel %vm886_vm1, %v7580_v6, 0.0  ;;  %v7685_v16 = vsel %vm886_vm1, %v7581_v32, 0.0 }
 0x7ed   : > { %v7682_v9 = vadd.f32 %v7681_v0, %v7680_v55  ;;  %v7694_v38 = vsel %vm886_vm1, %v13915_v62, 0.0  ;;  %v13919_v31 = vsub.f32 %v13917_v63, %v13918_v28  ;;  %v7596_v59 = vsub.f32 %v13920_v52, %v12686_v26 }
 0x7ee   : > { %v7695_v20 = vadd.f32 %v7694_v38, %v13916_v17  ;;  %v7658_v4 = vadd.f32 %v7657_v53, %v7656_v49  ;;  %v7597_v57 = vsub.f32 %v12827_v29, %v13921_v56  ;;  %v7598_v6 = vsub.f32 %v12833_v3, %v12848_v61 }
 0x7ef   : > { %v7684_v45 = vadd.f32 %v7683_v33, %v7682_v9  ;;  %v7696_v54 = vsel %vm886_vm1, %v13919_v31, 0.0  ;;  %v13922_v34 = vsub.f32 %v13779_v43, %v12641_v5  ;;  %v7698_v1 = vsel %vm886_vm1, %v7588_v25, 0.0 }
 0x7f0   : > { %v7697_v30 = vadd.f32 %v7696_v54, %v7695_v20  ;;  %v7687_v24 = vsel %vm886_vm1, %v7582_v7, 0.0  ;;  %v13923_v48 = vsub.f32 %v13775_v13, %v12632_v15  ;;  %v7700_v3 = vsel %vm886_vm1, %v7589_v14, 0.0 }
 0x7f1   : > { %v7709_v32 = vsel %vm886_vm1, %v13922_v34, 0.0  ;;  %v7686_v36 = vadd.f32 %v7685_v16, %v7684_v45  ;;  %v7713_v43 = vsel %vm886_vm1, %v7596_v59, 0.0  ;;  %v7702_v47 = vsel %vm886_vm1, %v7590_v37, 0.0 }
 0x7f2   : > { %v7710_v22 = vadd.f32 %v7709_v32, %v12673_v10  ;;  %v7699_v26 = vadd.f32 %v7698_v1, %v7697_v30  ;;  %v7711_v29 = vsel %vm886_vm1, %v13923_v48, 0.0  ;;  %v7715_v10 = vsel %vm886_vm1, %v7597_v57, 0.0 }
 0x7f3   : > { %v7688_v2 = vadd.f32 %v7687_v24, %v7686_v36  ;;  %v7717_v23 = vsel %vm886_vm1, %v7598_v6, 0.0 }
 0x7f4   : > { %v7712_v61 = vadd.f32 %v7711_v29, %v7710_v22  ;;  %v7701_v5 = vadd.f32 %v7700_v3, %v7699_v26 }
 0x7f6   : > { %v7714_v60 = vadd.f32 %v7713_v43, %v7712_v61  ;;  %v7703_v42 = vadd.f32 %v7702_v47, %v7701_v5 }
 0x7f8   : > { %v7716_v7 = vadd.f32 %v7715_v10, %v7714_v60 }
 0x7fa   : > { %v7718_v19 = vadd.f32 %v7717_v23, %v7716_v7 }
 0x82e   : > { %v8040_v15 = vpop.permute.xlu1 %8039 }
 0x82f   : > { %v8063_v13 = vsel %vm886_vm1, %v12911_v35, %v8040_v15 }
 0x830   : > { %8875 = vmatprep.mubr.msk.f32.mxu0 %vm13924_vm11, %v8063_v13 }
 0x832   : > { %v8042_v58 = vpop.permute.xlu1 %8041 }
 0x833   : > { %v8064_v21 = vsel %vm886_vm1, %v12932_v44, %v8042_v58 }
 0x834   : > { %8876 = vmatmul.mubr.msk.f32.vlgmr.msra.gmra.mrb[34].mxu0 %vm13925_vm2, %v8064_v21 }
 0x836   : > { %v8048_v41 = vpop.permute.xlu0 %8047 }
 0x837   : > { %v8067_v55 = vsel %vm886_vm1, %v7673_v39, %v8048_v41 }
 0x838   : > { %8881 = vmatprep.mubr.msk.f32.mxu1 %vm13926_vm7, %v8067_v55 }
 0x83b   : > { %v8044_v40 = vpop.permute.xlu1 %8043 }
 0x83c   : > { %v8065_v12 = vsel %vm886_vm1, %v7643_v51, %v8044_v40 }
 0x83d   : > { %8878 = vmatprep.mubr.msk.f32.mxu0 %vm13927_vm0, %v8065_v12 }
 0x83f   : > { %v8046_v35 = vpop.permute.xlu1 %8045 }
 0x840   : > { %v8066_v50 = vsel %vm886_vm1, %v7658_v4, %v8046_v35 }
 0x841   : > { %8879 = vmatmul.mubr.msk.f32.gmra.mrb[36].mxu0 %vm13928_vm8, %v8066_v50 }
 0x844   : > { %v8050_v0 = vpop.permute.xlu0 %8049 }
 0x845   : > { %v8068_v44 = vsel %vm886_vm1, %v7688_v2, %v8050_v0 }
 0x846   : > { %8882 = vmatmul.mubr.msk.f32.vlgmr.msra.gmra.mrb[34].mxu1 %vm13929_vm15, %v8068_v44 }
 0x849   : > { %v8052_v11 = vpop.permute.xlu0 %8051 }
 0x84a   : > { %v8069_v25 = vsel %vm886_vm1, %v7703_v42, %v8052_v11 }
 0x84b   : > { %8884 = vmatprep.mubr.msk.f32.mxu1 %vm13930_vm4, %v8069_v25 }
 0x850   : > { %v8054_v18 = vpop.permute.xlu0 %8053 }
 0x851   : > { %v8070_v51 = vsel %vm886_vm1, %v7718_v19, %v8054_v18 }
 0x852   : > { %8885 = vmatmul.mubr.msk.f32.gmra.mrb[36].mxu1 %vm13931_vm14, %v8070_v51 }
 0x907   : > { %v8877_v14 = vpop.f32.mrb[34].mxu0 }
 0x908   : > { %8203 = vst [vmem:[%s394_s15 + $0x8] sm:$0xff] %v8877_v14  ;;  %v8163_v27 = vpop.f32.mrb[35].mxu0 }
 0x909   : > { %8202 = vst [vmem:[%s394_s15] sm:$0xff] %v8163_v27 }
 0x914   : > { %v8880_v37 = vpop.f32.mrb[36].mxu0 }
 0x915   : > { %8205 = vst [vmem:[%s394_s15 + $0x18] sm:$0xff] %v8880_v37  ;;  %v8173_v39 = vpop.f32.mrb[37].mxu0 }
 0x916   : > { %8204 = vst [vmem:[%s394_s15 + $0x10] sm:$0xff] %v8173_v39 }
 0x919   : > { %v8883_v49 = vpop.f32.mrb[34].mxu1 }
 0x91a   : > { %8207 = vst [vmem:[%s394_s15 + $0x28] sm:$0xff] %v8883_v49  ;;  %v8183_v9 = vpop.f32.mrb[35].mxu1 }
 0x91b   : > { %8206 = vst [vmem:[%s394_s15 + $0x20] sm:$0xff] %v8183_v9 }
 0x925   : > { %v8886_v46 = vpop.f32.mrb[36].mxu1 }
 0x926   : > { %8209 = vst [vmem:[%s394_s15 + $0x38] sm:$0xff] %v8886_v46  ;;  %v8193_v8 = vpop.f32.mrb[37].mxu1 }
 0x927   : > { %8208 = vst [vmem:[%s394_s15 + $0x30] sm:$0xff] %v8193_v8 }
 0x928   : > { %9341 = shalt.err (!%p9338_p8)
}
 0x929   : > { %s9342_s29 = scalar_lea.hbm %s13039_s21, 1024  ;;  %s9346_s17 = scalar_lea.hbm %s13091_s7, 2048 }
 0x92a   : > { %p9343_p11 = scmp.ne.s32.totalorder %s13039_s21, %s9342_s29  ;;  %p9347_p1 = scmp.lt.u32.totalorder %s13039_s21, %s13091_s7 }
 0x92b   : > { %p9348_p2 = scmp.lt.u32.totalorder %s9346_s17, %s9342_s29  ;;  %p9350_p0 = scmp.lt.u32.totalorder %s9342_s29, %s13039_s21 }
 0x92c   : > { %p9344_p7 = pnand %p9343_p11, %p9644_p10 }
 0x92d   : > { %p9349_p13 = por %p9348_p2, %p9347_p1 }
 0x92e   : > { %p9345_p12 = pneg %p9344_p7 }
 0x92f   : > { %p9351_p4 = por %p9350_p0, %p9349_p13 }
 0x931   : > { %p9352_p6 = pnand %p9351_p4, %p9345_p12 }
 0x933   : > { %9355 = shalt.err (!%p9352_p6)
}
 0x934   : > { %s9432_s15 = smov 128  }
 0x935   : > { %8969 = dma.vmem_to_hbm [thread:$0]  (%p9644_p10), %s13034_s11, 1024, %s13039_s21, %s8211_s2, %s9432_s15, %s9432_s15, %s9420_s30  }
 0x936 PF: > { %s13932_s14 = sld [smem:[#allocation20_spill]]  ;;  %s8239_s0 = sand.u32 1, %s9398_s24  }
 0x937   : > { %p13934_p5 = scmp.ge.s32.totalorder %s9410_s27, 2  ;;  %s8240_s18 = scalar_lea.sflag [#allocation4], %s8239_s0 }
 0x93c   : > { %p13933_p3 = scmp.ne.s32.totalorder %s13932_s14, 0 }
 0x93e   : > { %p8992_p9 = pnand %p13934_p5, %p13933_p3 }
 0x940   : > { %9393 = dma.done.wait (!%p8992_p9), %s8240_s18, 1024  }
 0x941   : > { %9395 = vsyncadd (!%p8992_p9), %s8240_s18, 4294966272  ;;  %p25_p8 = scmp.ge.s32.totalorder %s9634_s22, 4   ;;  %s13935_s24 = smov %s9402_s25 }
 0x942   : > { %s13936_s25 = smov %s9406_s26  ;;  %s13937_s26 = smov %s9650_s20 }
 0x943   : > { %s13938_s27 = smov %s9634_s22  ;;  %27 = sbr.rel (!%p25_p8) target bundleno = 13 (0xd), region = 122 }
 0x94a   :  { %8245 = vsyncpa [#allocation3], 1 }
 0x94b   :  { %8247 = vsyncpa [#allocation3 + $0x1], 1 }
 0x94c   :  { %8248 = vsyncpa [#allocation6], 1 }
 0x94d   :  { %8250 = vsyncpa [#allocation6 + $0x1], 1 }
 0x94e   :  { %8251 = vsyncpa [#allocation9], 1 }
 0x94f   :  { %8252 = vsyncpa [#allocation12], 1 }
 0x950   :  { %8253 = vsyncpa [#allocation4], 1 }
 0x951   :  { %8255 = vsyncpa [#allocation4 + $0x1], 1 }

</bundles_post_ra>
